<compile_context>
chip_gen: v7x
topology: tpu7x:2x2x1
jax: 0.10.0
libtpu: 0.0.40
codegen_flags: <defaults>
</compile_context>

<pallas_src>
import functools

import jax
import jax.numpy as jnp
from jax.experimental import pallas as pl
from jax.experimental.pallas import tpu as pltpu

NUM_GROUPS = 16
EPS = 1e-6


# ----------------------------- in-kernel helpers -----------------------------

def _group_norm_swish(x, gmap, backmap_gamma, beta):
    """GroupNorm(16) + Swish on (nb, H, W, C) f32 with per-image statistics.

    gmap: (C, G) one-hot group membership.
    backmap_gamma: (G, C) group->channel map-back with gamma folded in.
    beta: (1, C).
    Applied as a single fused scale/shift: y = x * scale + shift.
    NOTE: variance uses E[x^2]-E[x]^2 in f32 (clamped >= 0); fine for activation-scale
    inputs, could cancel if |mean| >> std."""
    nb, H, W, C = x.shape
    inv_n = 1.0 / float(H * W * (C // gmap.shape[1]))
    ch_sum = jnp.sum(jnp.sum(x, axis=1), axis=1)                     # (nb, C)
    ch_sq = jnp.sum(jnp.sum(x * x, axis=1), axis=1)                  # (nb, C)
    # Fused stats matmul: [sum; sumsq] (2nb, C) x (C, G) -> (2nb, G)
    stats = jnp.dot(jnp.concatenate([ch_sum, ch_sq], axis=0), gmap,
                    preferred_element_type=jnp.float32)
    mean_g = stats[:nb] * inv_n                                      # (nb, G)
    var_g = jnp.maximum(stats[nb:] * inv_n - mean_g * mean_g, 0.0)   # biased var (torch)
    inv_g = jax.lax.rsqrt(var_g + EPS)
    # Fused map-back: [inv; mean*inv] (2nb, G) x (G, C)*gamma -> [scale; mean*scale]
    back = jnp.dot(jnp.concatenate([inv_g, mean_g * inv_g], axis=0), backmap_gamma,
                   preferred_element_type=jnp.float32)               # (2nb, C)
    scale = back[:nb]
    shift = beta - back[nb:]
    y = x * scale[:, None, None, :] + shift[:, None, None, :]
    # swish: y * sigmoid(y); sigmoid(y) = 0.5*tanh(0.5*y) + 0.5 keeps it on the EUP.
    return y * (0.5 * jnp.tanh(0.5 * y) + 0.5)


def _zero_halo(pad_ref):
    """Zero only the 1-element border of the (nb, H+2, W+2, C) halo scratch."""
    nb, hp, wp, c = pad_ref.shape
    H = hp - 2
    dt = pad_ref.dtype
    pad_ref[:, 0:1, :, :] = jnp.zeros((nb, 1, wp, c), dt)            # top row
    pad_ref[:, hp - 1:hp, :, :] = jnp.zeros((nb, 1, wp, c), dt)      # bottom row
    pad_ref[:, 1:hp - 1, 0:1, :] = jnp.zeros((nb, H, 1, c), dt)      # left col
    pad_ref[:, 1:hp - 1, wp - 1:wp, :] = jnp.zeros((nb, H, 1, c), dt)  # right col


def _conv3x3_acc(pad_ref, w_ref, init):
    """3x3 / stride 1 / pad 1 conv over a zero-bordered VMEM halo scratch.

    pad_ref: (nb, H+2, W+2, Cin) scratch (border zero, interior filled this step),
    w_ref: (3, 3*Cin, Cout) with the dx taps folded into K,
    init: accumulator init broadcastable to (nb*H*W, Cout).
    Per dy: concatenate the 3 dx windows on the channel axis -> K = 3*Cin matmul.
    Returns (nb*H*W, Cout) f32."""
    nb, hp, wp, cin = pad_ref.shape
    H, W = hp - 2, wp - 2
    m = nb * H * W
    acc = init
    for dy in range(3):
        patch = jnp.concatenate(
            [pad_ref[:, dy:dy + H, dx:dx + W, :] for dx in range(3)],
            axis=-1)                                                 # (nb, H, W, 3*cin)
        acc = acc + jnp.dot(patch.reshape(m, 3 * cin), w_ref[dy],
                            preferred_element_type=jnp.float32)
    return acc


# --------------------------------- kernel ------------------------------------

def _resblock_kernel(x_ref, gm1_ref, bk1_ref, bt1_ref, w1_ref, cb1_ref,
                     gm2_ref, bk2_ref, bt2_ref, w2_ref, cb2_ref,
                     *rest, use_channel_up):
    if use_channel_up:
        upw_ref, upb_ref, o_ref, pad1_ref, pad2_ref = rest
    else:
        o_ref, pad1_ref, pad2_ref = rest

    x = x_ref[...].astype(jnp.float32)                  # (nb, H, W, Cin)
    nb, H, W, cin = x.shape
    cout = o_ref.shape[-1]
    m = nb * H * W
    md = pad1_ref.dtype                                 # matmul input dtype

    # Border-only zeroing of the halo scratches (interior fully rewritten below).
    _zero_halo(pad1_ref)
    _zero_halo(pad2_ref)

    # --- GroupNorm1 + Swish ---
    h = _group_norm_swish(x, gm1_ref[...], bk1_ref[...], bt1_ref[...])

    # --- Conv1: write interior, 3 per-dy MXU matmuls (bias folded into init) ---
    pad1_ref[:, 1:H + 1, 1:W + 1, :] = h.astype(md)
    a1 = _conv3x3_acc(pad1_ref, w1_ref, cb1_ref[...])   # (m, cout) f32

    # --- GroupNorm2 + Swish ---
    h2 = _group_norm_swish(a1.reshape(nb, H, W, cout),
                           gm2_ref[...], bk2_ref[...], bt2_ref[...])

    # --- Conv2: residual path + bias folded into the accumulator init.
    #     The skip/1x1 path stays in f32 even when matmul_dtype is bf16. ---
    x2d = x.reshape(m, cin)
    if use_channel_up:
        init2 = jnp.dot(x2d, upw_ref[...], preferred_element_type=jnp.float32)
        init2 = init2 + (cb2_ref[...] + upb_ref[...])
    else:
        init2 = x2d + cb2_ref[...]
    pad2_ref[:, 1:H + 1, 1:W + 1, :] = h2.astype(md)
    out = _conv3x3_acc(pad2_ref, w2_ref, init2)         # (m, cout) f32

    o_ref[...] = out.reshape(nb, H, W, cout).astype(o_ref.dtype)


# -------------------------------- wrapper -------------------------------------

def _group_map(c, g=NUM_GROUPS):
    gs = c // g
    gid = jnp.arange(c) // gs
    return (gid[:, None] == jnp.arange(g)[None, :]).astype(jnp.float32)   # (C, G)


def _is_v7():
    try:
        kind = jax.devices()[0].device_kind.lower()
    except Exception:
        return False
    return ("v7" in kind) or ("7x" in kind)


def _num_tensorcores_per_chip():
    # v7x has 2 TensorCores per chip; v5e/v6e have 1.
    return 2 if _is_v7() else 1


def _pick_batch_block(n, hw, num_cores=1, target_m=1024):
    """Pick nb (divisor of n) so M = nb*H*W feeds the MXU well, while guaranteeing
    at least `num_cores` grid steps so the batch axis shards across TensorCores."""
    divs = [d for d in range(1, n + 1) if n % d == 0]
    for min_steps in sorted({max(num_cores, 1), 1}, reverse=True):
        cands = [d for d in divs if n // d >= min_steps and d * hw <= target_m]
        if cands:
            return max(cands)
    return 1


def _vmem_limit_bytes(nb, H, W, cin, cout, md_itemsize, const_bytes):
    io = 2 * nb * H * W * (cin + cout) * 4                       # 2x-buffered x/out blocks (f32)
    pads = nb * (H + 2) * (W + 2) * (cin + cout) * md_itemsize   # halo scratches
    consts = 2 * const_bytes                                     # grid-invariant operands (2x-buffered)
    need = io + pads + consts + (4 << 20)                        # headroom
    cap = (56 << 20) if _is_v7() else (100 << 20)                # v7x: 64 MiB physical VMEM
    return int(min(cap, max(need, 32 << 20)))


def residual_block_nhwc(x, params, in_channels, out_channels,
                        matmul_dtype=jnp.float32):
    """x: (N, H, W, Cin) f32, NHWC. Returns (N, H, W, Cout) f32."""
    assert in_channels % NUM_GROUPS == 0 and out_channels % NUM_GROUPS == 0
    x = x.astype(jnp.float32)
    N, H, W, cin = x.shape
    cout = out_channels
    use_up = in_channels != out_channels
    nb = _pick_batch_block(N, H * W, num_cores=_num_tensorcores_per_chip())
    md = jnp.dtype(matmul_dtype)

    gmap1 = _group_map(cin)
    gmap2 = _group_map(cout)
    back1 = gmap1.T * params['gn1_gamma']                 # (G, cin), gamma folded in
    back2 = gmap2.T * params['gn2_gamma']                 # (G, cout)
    # Fold the dx taps into K: (3, 3, Cin, Cout) -> (3, 3*Cin, Cout).
    w1 = params['conv1_w'].reshape(3, 3 * cin, cout).astype(md)
    w2 = params['conv2_w'].reshape(3, 3 * cout, cout).astype(md)

    inputs = [x,
              gmap1, back1, params['gn1_beta'], w1, params['conv1_b'],
              gmap2, back2, params['gn2_beta'], w2, params['conv2_b']]
    if use_up:
        inputs += [params['up_w'], params['up_b']]        # residual path stays f32

    def const_spec(a):
        nd = a.ndim
        # (pipeline_mode=pl.Buffered(1) would single-buffer these grid-invariant
        #  operands and halve their VMEM; kept at the default for compatibility.)
        return pl.BlockSpec(a.shape, lambda n, _nd=nd: (0,) * _nd)

    in_specs = [pl.BlockSpec((nb, H, W, cin), lambda n: (n, 0, 0, 0))]
    in_specs += [const_spec(a) for a in inputs[1:]]

    const_bytes = sum(int(a.size) * jnp.dtype(a.dtype).itemsize for a in inputs[1:])
    vmem_limit = _vmem_limit_bytes(nb, H, W, cin, cout, md.itemsize, const_bytes)

    out = pl.pallas_call(
        functools.partial(_resblock_kernel, use_channel_up=use_up),
        out_shape=jax.ShapeDtypeStruct((N, H, W, cout), jnp.float32),
        grid=(N // nb,),
        in_specs=in_specs,
        out_specs=pl.BlockSpec((nb, H, W, cout), lambda n: (n, 0, 0, 0)),
        scratch_shapes=[pltpu.VMEM((nb, H + 2, W + 2, cin), md),
                        pltpu.VMEM((nb, H + 2, W + 2, cout), md)],
        compiler_params=pltpu.CompilerParams(
            dimension_semantics=("parallel",),
            vmem_limit_bytes=vmem_limit),
    )(*inputs)
    return out


def residual_block(x_nchw, params, in_channels, out_channels,
                   matmul_dtype=jnp.float32):
    """NCHW wrapper for PyTorch parity. Prefer residual_block_nhwc in an NHWC model:
    each transpose here is a full HBM read+write outside the kernel."""
    x = jnp.transpose(x_nchw, (0, 2, 3, 1))
    y = residual_block_nhwc(x, params, in_channels, out_channels, matmul_dtype)
    return jnp.transpose(y, (0, 3, 1, 2))


# -------------------------- params & pure-JAX reference ------------------------

def init_params(key, cin, cout):
    ks = jax.random.split(key, 10)
    nrm = lambda k, s, sc: sc * jax.random.normal(k, s, dtype=jnp.float32)
    p = dict(
        gn1_gamma=1.0 + 0.1 * jax.random.normal(ks[0], (1, cin), dtype=jnp.float32),
        gn1_beta=0.1 * jax.random.normal(ks[1], (1, cin), dtype=jnp.float32),
        conv1_w=nrm(ks[2], (3, 3, cin, cout), 0.1),
        conv1_b=nrm(ks[3], (1, cout), 0.05),
        gn2_gamma=1.0 + 0.1 * jax.random.normal(ks[4], (1, cout), dtype=jnp.float32),
        gn2_beta=0.1 * jax.random.normal(ks[5], (1, cout), dtype=jnp.float32),
        conv2_w=nrm(ks[6], (3, 3, cout, cout), 0.1),
        conv2_b=nrm(ks[7], (1, cout), 0.05),
    )
    if cin != cout:
        p['up_w'] = nrm(ks[8], (cin, cout), 0.1)
        p['up_b'] = nrm(ks[9], (1, cout), 0.05)
    return p


def _reference(x_nchw, p, cin, cout):
    def gn(x, gamma, beta):
        N, C, H, W = x.shape
        xg = x.reshape(N, NUM_GROUPS, C // NUM_GROUPS, H, W)
        mean = xg.mean(axis=(2, 3, 4), keepdims=True)
        var = jnp.mean((xg - mean) ** 2, axis=(2, 3, 4), keepdims=True)
        xn = ((xg - mean) / jnp.sqrt(var + EPS)).reshape(N, C, H, W)
        return xn * gamma.reshape(1, C, 1, 1) + beta.reshape(1, C, 1, 1)

    def swish(v):
        return v * jax.nn.sigmoid(v)

    def conv(v, w, b):
        y = jax.lax.conv_general_dilated(v, w, (1, 1), 'SAME',
                                         dimension_numbers=('NCHW', 'HWIO', 'NCHW'))
        return y + b.reshape(1, -1, 1, 1)

    h = swish(gn(x_nchw, p['gn1_gamma'], p['gn1_beta']))
    h = conv(h, p['conv1_w'], p['conv1_b'])
    h = swish(gn(h, p['gn2_gamma'], p['gn2_beta']))
    h = conv(h, p['conv2_w'], p['conv2_b'])
    if cin != cout:
        res = conv(x_nchw, p['up_w'].reshape(1, 1, cin, cout), p['up_b'])
    else:
        res = x_nchw
    return res + h


# ---------------------------------- main ---------------------------------------

if __name__ == "__main__":
    key = jax.random.PRNGKey(0)
    kx, kp1, kp2 = jax.random.split(key, 3)
    N, H, W = 2, 8, 8

    # Case 1: in_channels != out_channels (exercises the 1x1 channel_up path).
    cin, cout = 32, 64
    x = jax.random.normal(kx, (N, cin, H, W), dtype=jnp.float32)
    params = init_params(kp1, cin, cout)
    out = jax.block_until_ready(residual_block(x, params, cin, cout))
    ref = _reference(x, params, cin, cout)
    assert out.shape == (N, cout, H, W)
    assert jnp.allclose(out, ref, atol=1e-3, rtol=1e-3), float(jnp.max(jnp.abs(out - ref)))

    # Case 2: in_channels == out_channels (identity residual).
    cin2 = cout2 = 32
    params2 = init_params(kp2, cin2, cout2)
    out2 = jax.block_until_ready(residual_block(x, params2, cin2, cout2))
    ref2 = _reference(x, params2, cin2, cout2)
    assert out2.shape == (N, cout2, H, W)
    assert jnp.allclose(out2, ref2, atol=1e-3, rtol=1e-3), float(jnp.max(jnp.abs(out2 - ref2)))

    print("KERNEL_OK")
</pallas_src>

<mosaic_0001>
module attributes {stable_mosaic.version = 11 : i64} {
  func.func @_resblock_kernel(%arg0: i32, %arg1: memref<2x8x8x32xf32, #tpu.memory_space<vmem>>, %arg2: memref<32x16xf32, #tpu.memory_space<vmem>>, %arg3: memref<16x32xf32, #tpu.memory_space<vmem>>, %arg4: memref<1x32xf32, #tpu.memory_space<vmem>>, %arg5: memref<3x96x64xf32, #tpu.memory_space<vmem>>, %arg6: memref<1x64xf32, #tpu.memory_space<vmem>>, %arg7: memref<64x16xf32, #tpu.memory_space<vmem>>, %arg8: memref<16x64xf32, #tpu.memory_space<vmem>>, %arg9: memref<1x64xf32, #tpu.memory_space<vmem>>, %arg10: memref<3x192x64xf32, #tpu.memory_space<vmem>>, %arg11: memref<1x64xf32, #tpu.memory_space<vmem>>, %arg12: memref<32x64xf32, #tpu.memory_space<vmem>>, %arg13: memref<1x64xf32, #tpu.memory_space<vmem>>, %arg14: memref<2x8x8x64xf32, #tpu.memory_space<vmem>>, %arg15: memref<2x10x10x32xf32, #tpu.memory_space<vmem>>, %arg16: memref<2x10x10x64xf32, #tpu.memory_space<vmem>>) attributes {dimension_semantics = [#tpu.dimension_semantics<parallel>], iteration_bounds = array<i64: 1>, scalar_prefetch = 0 : i64, scratch_operands = 2 : i64, tpu.core_type = #tpu.core_type<tc>, window_params = [{transform_indices = @transform_0, window_bounds = array<i64: 2, 8, 8, 32>}, {pipeline_mode = #tpu.pipeline_mode<synchronous>, transform_indices = @transform_1, window_bounds = array<i64: 32, 16>}, {pipeline_mode = #tpu.pipeline_mode<synchronous>, transform_indices = @transform_2, window_bounds = array<i64: 16, 32>}, {pipeline_mode = #tpu.pipeline_mode<synchronous>, transform_indices = @transform_3, window_bounds = array<i64: 1, 32>}, {pipeline_mode = #tpu.pipeline_mode<synchronous>, transform_indices = @transform_4, window_bounds = array<i64: 3, 96, 64>}, {pipeline_mode = #tpu.pipeline_mode<synchronous>, transform_indices = @transform_5, window_bounds = array<i64: 1, 64>}, {pipeline_mode = #tpu.pipeline_mode<synchronous>, transform_indices = @transform_6, window_bounds = array<i64: 64, 16>}, {pipeline_mode = #tpu.pipeline_mode<synchronous>, transform_indices = @transform_7, window_bounds = array<i64: 16, 64>}, {pipeline_mode = #tpu.pipeline_mode<synchronous>, transform_indices = @transform_8, window_bounds = array<i64: 1, 64>}, {pipeline_mode = #tpu.pipeline_mode<synchronous>, transform_indices = @transform_9, window_bounds = array<i64: 3, 192, 64>}, {pipeline_mode = #tpu.pipeline_mode<synchronous>, transform_indices = @transform_10, window_bounds = array<i64: 1, 64>}, {pipeline_mode = #tpu.pipeline_mode<synchronous>, transform_indices = @transform_11, window_bounds = array<i64: 32, 64>}, {pipeline_mode = #tpu.pipeline_mode<synchronous>, transform_indices = @transform_12, window_bounds = array<i64: 1, 64>}, {transform_indices = @transform_13, window_bounds = array<i64: 2, 8, 8, 64>}]} {
    %c0 = arith.constant 0 : index
    %c0_0 = arith.constant 0 : index
    %c0_1 = arith.constant 0 : index
    %c0_2 = arith.constant 0 : index
    %0 = vector.load %arg1[%c0, %c0_0, %c0_1, %c0_2] : memref<2x8x8x32xf32, #tpu.memory_space<vmem>>, vector<2x8x8x32xf32>
    %cst = arith.constant 0.000000e+00 : f32
    %1 = vector.broadcast %cst : f32 to vector<2x1x10x32xf32>
    %c0_3 = arith.constant 0 : index
    %c0_4 = arith.constant 0 : index
    %c0_5 = arith.constant 0 : index
    %c0_6 = arith.constant 0 : index
    %2 = vector.load %arg15[%c0_3, %c0_4, %c0_5, %c0_6] : memref<2x10x10x32xf32, #tpu.memory_space<vmem>>, vector<2x1x10x32xf32>
    tpu.vector_store %arg15[%c0_3, %c0_4, %c0_5, %c0_6], %1 {strides = array<i32>} : memref<2x10x10x32xf32, #tpu.memory_space<vmem>>, vector<2x1x10x32xf32>,
    %cst_7 = arith.constant 0.000000e+00 : f32
    %3 = vector.broadcast %cst_7 : f32 to vector<2x1x10x32xf32>
    %c0_8 = arith.constant 0 : index
    %c9 = arith.constant 9 : index
    %c0_9 = arith.constant 0 : index
    %c0_10 = arith.constant 0 : index
    %4 = vector.load %arg15[%c0_8, %c9, %c0_9, %c0_10] : memref<2x10x10x32xf32, #tpu.memory_space<vmem>>, vector<2x1x10x32xf32>
    tpu.vector_store %arg15[%c0_8, %c9, %c0_9, %c0_10], %3 {strides = array<i32>} : memref<2x10x10x32xf32, #tpu.memory_space<vmem>>, vector<2x1x10x32xf32>,
    %cst_11 = arith.constant 0.000000e+00 : f32
    %5 = vector.broadcast %cst_11 : f32 to vector<2x8x1x32xf32>
    %c0_12 = arith.constant 0 : index
    %c1 = arith.constant 1 : index
    %c0_13 = arith.constant 0 : index
    %c0_14 = arith.constant 0 : index
    %6 = vector.load %arg15[%c0_12, %c1, %c0_13, %c0_14] : memref<2x10x10x32xf32, #tpu.memory_space<vmem>>, vector<2x8x1x32xf32>
    tpu.vector_store %arg15[%c0_12, %c1, %c0_13, %c0_14], %5 {strides = array<i32>} : memref<2x10x10x32xf32, #tpu.memory_space<vmem>>, vector<2x8x1x32xf32>,
    %cst_15 = arith.constant 0.000000e+00 : f32
    %7 = vector.broadcast %cst_15 : f32 to vector<2x8x1x32xf32>
    %c0_16 = arith.constant 0 : index
    %c1_17 = arith.constant 1 : index
    %c9_18 = arith.constant 9 : index
    %c0_19 = arith.constant 0 : index
    %8 = vector.load %arg15[%c0_16, %c1_17, %c9_18, %c0_19] : memref<2x10x10x32xf32, #tpu.memory_space<vmem>>, vector<2x8x1x32xf32>
    tpu.vector_store %arg15[%c0_16, %c1_17, %c9_18, %c0_19], %7 {strides = array<i32>} : memref<2x10x10x32xf32, #tpu.memory_space<vmem>>, vector<2x8x1x32xf32>,
    %cst_20 = arith.constant 0.000000e+00 : f32
    %9 = vector.broadcast %cst_20 : f32 to vector<2x1x10x64xf32>
    %c0_21 = arith.constant 0 : index
    %c0_22 = arith.constant 0 : index
    %c0_23 = arith.constant 0 : index
    %c0_24 = arith.constant 0 : index
    %10 = vector.load %arg16[%c0_21, %c0_22, %c0_23, %c0_24] : memref<2x10x10x64xf32, #tpu.memory_space<vmem>>, vector<2x1x10x64xf32>
    tpu.vector_store %arg16[%c0_21, %c0_22, %c0_23, %c0_24], %9 {strides = array<i32>} : memref<2x10x10x64xf32, #tpu.memory_space<vmem>>, vector<2x1x10x64xf32>,
    %cst_25 = arith.constant 0.000000e+00 : f32
    %11 = vector.broadcast %cst_25 : f32 to vector<2x1x10x64xf32>
    %c0_26 = arith.constant 0 : index
    %c9_27 = arith.constant 9 : index
    %c0_28 = arith.constant 0 : index
    %c0_29 = arith.constant 0 : index
    %12 = vector.load %arg16[%c0_26, %c9_27, %c0_28, %c0_29] : memref<2x10x10x64xf32, #tpu.memory_space<vmem>>, vector<2x1x10x64xf32>
    tpu.vector_store %arg16[%c0_26, %c9_27, %c0_28, %c0_29], %11 {strides = array<i32>} : memref<2x10x10x64xf32, #tpu.memory_space<vmem>>, vector<2x1x10x64xf32>,
    %cst_30 = arith.constant 0.000000e+00 : f32
    %13 = vector.broadcast %cst_30 : f32 to vector<2x8x1x64xf32>
    %c0_31 = arith.constant 0 : index
    %c1_32 = arith.constant 1 : index
    %c0_33 = arith.constant 0 : index
    %c0_34 = arith.constant 0 : index
    %14 = vector.load %arg16[%c0_31, %c1_32, %c0_33, %c0_34] : memref<2x10x10x64xf32, #tpu.memory_space<vmem>>, vector<2x8x1x64xf32>
    tpu.vector_store %arg16[%c0_31, %c1_32, %c0_33, %c0_34], %13 {strides = array<i32>} : memref<2x10x10x64xf32, #tpu.memory_space<vmem>>, vector<2x8x1x64xf32>,
    %cst_35 = arith.constant 0.000000e+00 : f32
    %15 = vector.broadcast %cst_35 : f32 to vector<2x8x1x64xf32>
    %c0_36 = arith.constant 0 : index
    %c1_37 = arith.constant 1 : index
    %c9_38 = arith.constant 9 : index
    %c0_39 = arith.constant 0 : index
    %16 = vector.load %arg16[%c0_36, %c1_37, %c9_38, %c0_39] : memref<2x10x10x64xf32, #tpu.memory_space<vmem>>, vector<2x8x1x64xf32>
    tpu.vector_store %arg16[%c0_36, %c1_37, %c9_38, %c0_39], %15 {strides = array<i32>} : memref<2x10x10x64xf32, #tpu.memory_space<vmem>>, vector<2x8x1x64xf32>,
    %c0_40 = arith.constant 0 : index
    %c0_41 = arith.constant 0 : index
    %17 = vector.load %arg2[%c0_40, %c0_41] : memref<32x16xf32, #tpu.memory_space<vmem>>, vector<32x16xf32>
    %c0_42 = arith.constant 0 : index
    %c0_43 = arith.constant 0 : index
    %18 = vector.load %arg3[%c0_42, %c0_43] : memref<16x32xf32, #tpu.memory_space<vmem>>, vector<16x32xf32>
    %c0_44 = arith.constant 0 : index
    %c0_45 = arith.constant 0 : index
    %19 = vector.load %arg4[%c0_44, %c0_45] : memref<1x32xf32, #tpu.memory_space<vmem>>, vector<1x32xf32>
    %cst_46 = arith.constant dense<0.000000e+00> : vector<2x8x32xf32>
    %20 = vector.multi_reduction <add>, %0, %cst_46 [1] : vector<2x8x8x32xf32> to vector<2x8x32xf32>
    %cst_47 = arith.constant dense<0.000000e+00> : vector<2x32xf32>
    %21 = vector.multi_reduction <add>, %20, %cst_47 [1] : vector<2x8x32xf32> to vector<2x32xf32>
    %22 = arith.mulf %0, %0 : vector<2x8x8x32xf32>
    %cst_48 = arith.constant dense<0.000000e+00> : vector<2x8x32xf32>
    %23 = vector.multi_reduction <add>, %22, %cst_48 [1] : vector<2x8x8x32xf32> to vector<2x8x32xf32>
    %cst_49 = arith.constant dense<0.000000e+00> : vector<2x32xf32>
    %24 = vector.multi_reduction <add>, %23, %cst_49 [1] : vector<2x8x32xf32> to vector<2x32xf32>
    %25 = tpu.concatenate %21, %24 in 0 : vector<2x32xf32>, vector<2x32xf32> -> vector<4x32xf32>
    %cst_50 = arith.constant dense<0.000000e+00> : vector<4x16xf32>
    %26 = tpu.matmul %25, %17, %cst_50 {dimension_numbers = #tpu.dot_dimension_numbers<[1], [0], [0], [1], [0, 0, 1, 1], [], []>} : vector<4x32xf32>, vector<32x16xf32>, vector<4x16xf32> -> vector<4x16xf32>
    %27 = vector.extract_strided_slice %26 {offsets = [0, 0], sizes = [2, 16], strides = [1, 1]} : vector<4x16xf32> to vector<2x16xf32>
    %cst_51 = arith.constant 7.812500e-03 : f32
    %28 = vector.broadcast %cst_51 : f32 to vector<2x16xf32>
    %29 = arith.mulf %27, %28 : vector<2x16xf32>
    %30 = vector.extract_strided_slice %26 {offsets = [2, 0], sizes = [2, 16], strides = [1, 1]} : vector<4x16xf32> to vector<2x16xf32>
    %cst_52 = arith.constant 7.812500e-03 : f32
    %31 = vector.broadcast %cst_52 : f32 to vector<2x16xf32>
    %32 = arith.mulf %30, %31 : vector<2x16xf32>
    %33 = arith.mulf %29, %29 : vector<2x16xf32>
    %34 = arith.subf %32, %33 : vector<2x16xf32>
    %cst_53 = arith.constant 0.000000e+00 : f32
    %35 = vector.broadcast %cst_53 : f32 to vector<2x16xf32>
    %36 = arith.maximumf %34, %35 : vector<2x16xf32>
    %cst_54 = arith.constant 9.99999997E-7 : f32
    %37 = vector.broadcast %cst_54 : f32 to vector<2x16xf32>
    %38 = arith.addf %36, %37 : vector<2x16xf32>
    %39 = math.rsqrt %38 : vector<2x16xf32>
    %40 = arith.mulf %29, %39 : vector<2x16xf32>
    %41 = tpu.concatenate %39, %40 in 0 : vector<2x16xf32>, vector<2x16xf32> -> vector<4x16xf32>
    %cst_55 = arith.constant dense<0.000000e+00> : vector<4x32xf32>
    %42 = tpu.matmul %41, %18, %cst_55 {dimension_numbers = #tpu.dot_dimension_numbers<[1], [0], [0], [1], [0, 0, 1, 1], [], []>} : vector<4x16xf32>, vector<16x32xf32>, vector<4x32xf32> -> vector<4x32xf32>
    %43 = vector.extract_strided_slice %42 {offsets = [0, 0], sizes = [2, 32], strides = [1, 1]} : vector<4x32xf32> to vector<2x32xf32>
    %44 = vector.extract_strided_slice %42 {offsets = [2, 0], sizes = [2, 32], strides = [1, 1]} : vector<4x32xf32> to vector<2x32xf32>
    %45 = vector.broadcast %19 : vector<1x32xf32> to vector<2x32xf32>
    %46 = arith.subf %45, %44 : vector<2x32xf32>
    %47 = vector.shape_cast %43 : vector<2x32xf32> to vector<2x1x1x32xf32>
    %48 = vector.broadcast %47 : vector<2x1x1x32xf32> to vector<2x8x8x32xf32>
    %49 = arith.mulf %0, %48 : vector<2x8x8x32xf32>
    %50 = vector.shape_cast %46 : vector<2x32xf32> to vector<2x1x1x32xf32>
    %51 = vector.broadcast %50 : vector<2x1x1x32xf32> to vector<2x8x8x32xf32>
    %52 = arith.addf %49, %51 : vector<2x8x8x32xf32>
    %cst_56 = arith.constant 5.000000e-01 : f32
    %53 = vector.broadcast %cst_56 : f32 to vector<2x8x8x32xf32>
    %54 = arith.mulf %53, %52 : vector<2x8x8x32xf32>
    %55 = math.tanh %54 : vector<2x8x8x32xf32>
    %cst_57 = arith.constant 5.000000e-01 : f32
    %56 = vector.broadcast %cst_57 : f32 to vector<2x8x8x32xf32>
    %57 = arith.mulf %56, %55 : vector<2x8x8x32xf32>
    %cst_58 = arith.constant 5.000000e-01 : f32
    %58 = vector.broadcast %cst_58 : f32 to vector<2x8x8x32xf32>
    %59 = arith.addf %57, %58 : vector<2x8x8x32xf32>
    %60 = arith.mulf %52, %59 : vector<2x8x8x32xf32>
    %c0_59 = arith.constant 0 : index
    %c1_60 = arith.constant 1 : index
    %c1_61 = arith.constant 1 : index
    %c0_62 = arith.constant 0 : index
    %61 = vector.load %arg15[%c0_59, %c1_60, %c1_61, %c0_62] : memref<2x10x10x32xf32, #tpu.memory_space<vmem>>, vector<2x8x8x32xf32>
    tpu.vector_store %arg15[%c0_59, %c1_60, %c1_61, %c0_62], %60 {strides = array<i32>} : memref<2x10x10x32xf32, #tpu.memory_space<vmem>>, vector<2x8x8x32xf32>,
    %c0_63 = arith.constant 0 : index
    %c0_64 = arith.constant 0 : index
    %62 = vector.load %arg6[%c0_63, %c0_64] : memref<1x64xf32, #tpu.memory_space<vmem>>, vector<1x64xf32>
    %c0_65 = arith.constant 0 : index
    %c0_66 = arith.constant 0 : index
    %c0_67 = arith.constant 0 : index
    %c0_68 = arith.constant 0 : index
    %63 = vector.load %arg15[%c0_65, %c0_66, %c0_67, %c0_68] : memref<2x10x10x32xf32, #tpu.memory_space<vmem>>, vector<2x8x8x32xf32>
    %c0_69 = arith.constant 0 : index
    %c0_70 = arith.constant 0 : index
    %c1_71 = arith.constant 1 : index
    %c0_72 = arith.constant 0 : index
    %64 = vector.load %arg15[%c0_69, %c0_70, %c1_71, %c0_72] : memref<2x10x10x32xf32, #tpu.memory_space<vmem>>, vector<2x8x8x32xf32>
    %c0_73 = arith.constant 0 : index
    %c0_74 = arith.constant 0 : index
    %c2 = arith.constant 2 : index
    %c0_75 = arith.constant 0 : index
    %65 = vector.load %arg15[%c0_73, %c0_74, %c2, %c0_75] : memref<2x10x10x32xf32, #tpu.memory_space<vmem>>, vector<2x8x8x32xf32>
    %66 = tpu.concatenate %63, %64, %65 in 3 : vector<2x8x8x32xf32>, vector<2x8x8x32xf32>, vector<2x8x8x32xf32> -> vector<2x8x8x96xf32>
    %67 = vector.shape_cast %66 : vector<2x8x8x96xf32> to vector<128x96xf32>
    %c0_76 = arith.constant 0 : index
    %c0_77 = arith.constant 0 : index
    %c0_78 = arith.constant 0 : index
    %68 = vector.load %arg5[%c0_76, %c0_77, %c0_78] : memref<3x96x64xf32, #tpu.memory_space<vmem>>, vector<1x96x64xf32>
    %69 = vector.shape_cast %68 : vector<1x96x64xf32> to vector<96x64xf32>
    %cst_79 = arith.constant dense<0.000000e+00> : vector<128x64xf32>
    %70 = tpu.matmul %67, %69, %cst_79 {dimension_numbers = #tpu.dot_dimension_numbers<[1], [0], [0], [1], [0, 0, 1, 1], [], []>} : vector<128x96xf32>, vector<96x64xf32>, vector<128x64xf32> -> vector<128x64xf32>
    %71 = vector.broadcast %62 : vector<1x64xf32> to vector<128x64xf32>
    %72 = arith.addf %71, %70 : vector<128x64xf32>
    %c0_80 = arith.constant 0 : index
    %c1_81 = arith.constant 1 : index
    %c0_82 = arith.constant 0 : index
    %c0_83 = arith.constant 0 : index
    %73 = vector.load %arg15[%c0_80, %c1_81, %c0_82, %c0_83] : memref<2x10x10x32xf32, #tpu.memory_space<vmem>>, vector<2x8x8x32xf32>
    %c0_84 = arith.constant 0 : index
    %c1_85 = arith.constant 1 : index
    %c1_86 = arith.constant 1 : index
    %c0_87 = arith.constant 0 : index
    %74 = vector.load %arg15[%c0_84, %c1_85, %c1_86, %c0_87] : memref<2x10x10x32xf32, #tpu.memory_space<vmem>>, vector<2x8x8x32xf32>
    %c0_88 = arith.constant 0 : index
    %c1_89 = arith.constant 1 : index
    %c2_90 = arith.constant 2 : index
    %c0_91 = arith.constant 0 : index
    %75 = vector.load %arg15[%c0_88, %c1_89, %c2_90, %c0_91] : memref<2x10x10x32xf32, #tpu.memory_space<vmem>>, vector<2x8x8x32xf32>
    %76 = tpu.concatenate %73, %74, %75 in 3 : vector<2x8x8x32xf32>, vector<2x8x8x32xf32>, vector<2x8x8x32xf32> -> vector<2x8x8x96xf32>
    %77 = vector.shape_cast %76 : vector<2x8x8x96xf32> to vector<128x96xf32>
    %c1_92 = arith.constant 1 : index
    %c0_93 = arith.constant 0 : index
    %c0_94 = arith.constant 0 : index
    %78 = vector.load %arg5[%c1_92, %c0_93, %c0_94] : memref<3x96x64xf32, #tpu.memory_space<vmem>>, vector<1x96x64xf32>
    %79 = vector.shape_cast %78 : vector<1x96x64xf32> to vector<96x64xf32>
    %cst_95 = arith.constant dense<0.000000e+00> : vector<128x64xf32>
    %80 = tpu.matmul %77, %79, %cst_95 {dimension_numbers = #tpu.dot_dimension_numbers<[1], [0], [0], [1], [0, 0, 1, 1], [], []>} : vector<128x96xf32>, vector<96x64xf32>, vector<128x64xf32> -> vector<128x64xf32>
    %81 = arith.addf %72, %80 : vector<128x64xf32>
    %c0_96 = arith.constant 0 : index
    %c2_97 = arith.constant 2 : index
    %c0_98 = arith.constant 0 : index
    %c0_99 = arith.constant 0 : index
    %82 = vector.load %arg15[%c0_96, %c2_97, %c0_98, %c0_99] : memref<2x10x10x32xf32, #tpu.memory_space<vmem>>, vector<2x8x8x32xf32>
    %c0_100 = arith.constant 0 : index
    %c2_101 = arith.constant 2 : index
    %c1_102 = arith.constant 1 : index
    %c0_103 = arith.constant 0 : index
    %83 = vector.load %arg15[%c0_100, %c2_101, %c1_102, %c0_103] : memref<2x10x10x32xf32, #tpu.memory_space<vmem>>, vector<2x8x8x32xf32>
    %c0_104 = arith.constant 0 : index
    %c2_105 = arith.constant 2 : index
    %c2_106 = arith.constant 2 : index
    %c0_107 = arith.constant 0 : index
    %84 = vector.load %arg15[%c0_104, %c2_105, %c2_106, %c0_107] : memref<2x10x10x32xf32, #tpu.memory_space<vmem>>, vector<2x8x8x32xf32>
    %85 = tpu.concatenate %82, %83, %84 in 3 : vector<2x8x8x32xf32>, vector<2x8x8x32xf32>, vector<2x8x8x32xf32> -> vector<2x8x8x96xf32>
    %86 = vector.shape_cast %85 : vector<2x8x8x96xf32> to vector<128x96xf32>
    %c2_108 = arith.constant 2 : index
    %c0_109 = arith.constant 0 : index
    %c0_110 = arith.constant 0 : index
    %87 = vector.load %arg5[%c2_108, %c0_109, %c0_110] : memref<3x96x64xf32, #tpu.memory_space<vmem>>, vector<1x96x64xf32>
    %88 = vector.shape_cast %87 : vector<1x96x64xf32> to vector<96x64xf32>
    %cst_111 = arith.constant dense<0.000000e+00> : vector<128x64xf32>
    %89 = tpu.matmul %86, %88, %cst_111 {dimension_numbers = #tpu.dot_dimension_numbers<[1], [0], [0], [1], [0, 0, 1, 1], [], []>} : vector<128x96xf32>, vector<96x64xf32>, vector<128x64xf32> -> vector<128x64xf32>
    %90 = arith.addf %81, %89 : vector<128x64xf32>
    %91 = vector.shape_cast %90 : vector<128x64xf32> to vector<2x8x8x64xf32>
    %c0_112 = arith.constant 0 : index
    %c0_113 = arith.constant 0 : index
    %92 = vector.load %arg7[%c0_112, %c0_113] : memref<64x16xf32, #tpu.memory_space<vmem>>, vector<64x16xf32>
    %c0_114 = arith.constant 0 : index
    %c0_115 = arith.constant 0 : index
    %93 = vector.load %arg8[%c0_114, %c0_115] : memref<16x64xf32, #tpu.memory_space<vmem>>, vector<16x64xf32>
    %c0_116 = arith.constant 0 : index
    %c0_117 = arith.constant 0 : index
    %94 = vector.load %arg9[%c0_116, %c0_117] : memref<1x64xf32, #tpu.memory_space<vmem>>, vector<1x64xf32>
    %cst_118 = arith.constant dense<0.000000e+00> : vector<2x8x64xf32>
    %95 = vector.multi_reduction <add>, %91, %cst_118 [1] : vector<2x8x8x64xf32> to vector<2x8x64xf32>
    %cst_119 = arith.constant dense<0.000000e+00> : vector<2x64xf32>
    %96 = vector.multi_reduction <add>, %95, %cst_119 [1] : vector<2x8x64xf32> to vector<2x64xf32>
    %97 = arith.mulf %91, %91 : vector<2x8x8x64xf32>
    %cst_120 = arith.constant dense<0.000000e+00> : vector<2x8x64xf32>
    %98 = vector.multi_reduction <add>, %97, %cst_120 [1] : vector<2x8x8x64xf32> to vector<2x8x64xf32>
    %cst_121 = arith.constant dense<0.000000e+00> : vector<2x64xf32>
    %99 = vector.multi_reduction <add>, %98, %cst_121 [1] : vector<2x8x64xf32> to vector<2x64xf32>
    %100 = tpu.concatenate %96, %99 in 0 : vector<2x64xf32>, vector<2x64xf32> -> vector<4x64xf32>
    %cst_122 = arith.constant dense<0.000000e+00> : vector<4x16xf32>
    %101 = tpu.matmul %100, %92, %cst_122 {dimension_numbers = #tpu.dot_dimension_numbers<[1], [0], [0], [1], [0, 0, 1, 1], [], []>} : vector<4x64xf32>, vector<64x16xf32>, vector<4x16xf32> -> vector<4x16xf32>
    %102 = vector.extract_strided_slice %101 {offsets = [0, 0], sizes = [2, 16], strides = [1, 1]} : vector<4x16xf32> to vector<2x16xf32>
    %cst_123 = arith.constant 3.906250e-03 : f32
    %103 = vector.broadcast %cst_123 : f32 to vector<2x16xf32>
    %104 = arith.mulf %102, %103 : vector<2x16xf32>
    %105 = vector.extract_strided_slice %101 {offsets = [2, 0], sizes = [2, 16], strides = [1, 1]} : vector<4x16xf32> to vector<2x16xf32>
    %cst_124 = arith.constant 3.906250e-03 : f32
    %106 = vector.broadcast %cst_124 : f32 to vector<2x16xf32>
    %107 = arith.mulf %105, %106 : vector<2x16xf32>
    %108 = arith.mulf %104, %104 : vector<2x16xf32>
    %109 = arith.subf %107, %108 : vector<2x16xf32>
    %cst_125 = arith.constant 0.000000e+00 : f32
    %110 = vector.broadcast %cst_125 : f32 to vector<2x16xf32>
    %111 = arith.maximumf %109, %110 : vector<2x16xf32>
    %cst_126 = arith.constant 9.99999997E-7 : f32
    %112 = vector.broadcast %cst_126 : f32 to vector<2x16xf32>
    %113 = arith.addf %111, %112 : vector<2x16xf32>
    %114 = math.rsqrt %113 : vector<2x16xf32>
    %115 = arith.mulf %104, %114 : vector<2x16xf32>
    %116 = tpu.concatenate %114, %115 in 0 : vector<2x16xf32>, vector<2x16xf32> -> vector<4x16xf32>
    %cst_127 = arith.constant dense<0.000000e+00> : vector<4x64xf32>
    %117 = tpu.matmul %116, %93, %cst_127 {dimension_numbers = #tpu.dot_dimension_numbers<[1], [0], [0], [1], [0, 0, 1, 1], [], []>} : vector<4x16xf32>, vector<16x64xf32>, vector<4x64xf32> -> vector<4x64xf32>
    %118 = vector.extract_strided_slice %117 {offsets = [0, 0], sizes = [2, 64], strides = [1, 1]} : vector<4x64xf32> to vector<2x64xf32>
    %119 = vector.extract_strided_slice %117 {offsets = [2, 0], sizes = [2, 64], strides = [1, 1]} : vector<4x64xf32> to vector<2x64xf32>
    %120 = vector.broadcast %94 : vector<1x64xf32> to vector<2x64xf32>
    %121 = arith.subf %120, %119 : vector<2x64xf32>
    %122 = vector.shape_cast %118 : vector<2x64xf32> to vector<2x1x1x64xf32>
    %123 = vector.broadcast %122 : vector<2x1x1x64xf32> to vector<2x8x8x64xf32>
    %124 = arith.mulf %91, %123 : vector<2x8x8x64xf32>
    %125 = vector.shape_cast %121 : vector<2x64xf32> to vector<2x1x1x64xf32>
    %126 = vector.broadcast %125 : vector<2x1x1x64xf32> to vector<2x8x8x64xf32>
    %127 = arith.addf %124, %126 : vector<2x8x8x64xf32>
    %cst_128 = arith.constant 5.000000e-01 : f32
    %128 = vector.broadcast %cst_128 : f32 to vector<2x8x8x64xf32>
    %129 = arith.mulf %128, %127 : vector<2x8x8x64xf32>
    %130 = math.tanh %129 : vector<2x8x8x64xf32>
    %cst_129 = arith.constant 5.000000e-01 : f32
    %131 = vector.broadcast %cst_129 : f32 to vector<2x8x8x64xf32>
    %132 = arith.mulf %131, %130 : vector<2x8x8x64xf32>
    %cst_130 = arith.constant 5.000000e-01 : f32
    %133 = vector.broadcast %cst_130 : f32 to vector<2x8x8x64xf32>
    %134 = arith.addf %132, %133 : vector<2x8x8x64xf32>
    %135 = arith.mulf %127, %134 : vector<2x8x8x64xf32>
    %136 = vector.shape_cast %0 : vector<2x8x8x32xf32> to vector<128x32xf32>
    %c0_131 = arith.constant 0 : index
    %c0_132 = arith.constant 0 : index
    %137 = vector.load %arg12[%c0_131, %c0_132] : memref<32x64xf32, #tpu.memory_space<vmem>>, vector<32x64xf32>
    %cst_133 = arith.constant dense<0.000000e+00> : vector<128x64xf32>
    %138 = tpu.matmul %136, %137, %cst_133 {dimension_numbers = #tpu.dot_dimension_numbers<[1], [0], [0], [1], [0, 0, 1, 1], [], []>} : vector<128x32xf32>, vector<32x64xf32>, vector<128x64xf32> -> vector<128x64xf32>
    %c0_134 = arith.constant 0 : index
    %c0_135 = arith.constant 0 : index
    %139 = vector.load %arg11[%c0_134, %c0_135] : memref<1x64xf32, #tpu.memory_space<vmem>>, vector<1x64xf32>
    %c0_136 = arith.constant 0 : index
    %c0_137 = arith.constant 0 : index
    %140 = vector.load %arg13[%c0_136, %c0_137] : memref<1x64xf32, #tpu.memory_space<vmem>>, vector<1x64xf32>
    %141 = arith.addf %139, %140 : vector<1x64xf32>
    %142 = vector.broadcast %141 : vector<1x64xf32> to vector<128x64xf32>
    %143 = arith.addf %138, %142 : vector<128x64xf32>
    %c0_138 = arith.constant 0 : index
    %c1_139 = arith.constant 1 : index
    %c1_140 = arith.constant 1 : index
    %c0_141 = arith.constant 0 : index
    %144 = vector.load %arg16[%c0_138, %c1_139, %c1_140, %c0_141] : memref<2x10x10x64xf32, #tpu.memory_space<vmem>>, vector<2x8x8x64xf32>
    tpu.vector_store %arg16[%c0_138, %c1_139, %c1_140, %c0_141], %135 {strides = array<i32>} : memref<2x10x10x64xf32, #tpu.memory_space<vmem>>, vector<2x8x8x64xf32>,
    %c0_142 = arith.constant 0 : index
    %c0_143 = arith.constant 0 : index
    %c0_144 = arith.constant 0 : index
    %c0_145 = arith.constant 0 : index
    %145 = vector.load %arg16[%c0_142, %c0_143, %c0_144, %c0_145] : memref<2x10x10x64xf32, #tpu.memory_space<vmem>>, vector<2x8x8x64xf32>
    %c0_146 = arith.constant 0 : index
    %c0_147 = arith.constant 0 : index
    %c1_148 = arith.constant 1 : index
    %c0_149 = arith.constant 0 : index
    %146 = vector.load %arg16[%c0_146, %c0_147, %c1_148, %c0_149] : memref<2x10x10x64xf32, #tpu.memory_space<vmem>>, vector<2x8x8x64xf32>
    %c0_150 = arith.constant 0 : index
    %c0_151 = arith.constant 0 : index
    %c2_152 = arith.constant 2 : index
    %c0_153 = arith.constant 0 : index
    %147 = vector.load %arg16[%c0_150, %c0_151, %c2_152, %c0_153] : memref<2x10x10x64xf32, #tpu.memory_space<vmem>>, vector<2x8x8x64xf32>
    %148 = tpu.concatenate %145, %146, %147 in 3 : vector<2x8x8x64xf32>, vector<2x8x8x64xf32>, vector<2x8x8x64xf32> -> vector<2x8x8x192xf32>
    %149 = vector.shape_cast %148 : vector<2x8x8x192xf32> to vector<128x192xf32>
    %c0_154 = arith.constant 0 : index
    %c0_155 = arith.constant 0 : index
    %c0_156 = arith.constant 0 : index
    %150 = vector.load %arg10[%c0_154, %c0_155, %c0_156] : memref<3x192x64xf32, #tpu.memory_space<vmem>>, vector<1x192x64xf32>
    %151 = vector.shape_cast %150 : vector<1x192x64xf32> to vector<192x64xf32>
    %cst_157 = arith.constant dense<0.000000e+00> : vector<128x64xf32>
    %152 = tpu.matmul %149, %151, %cst_157 {dimension_numbers = #tpu.dot_dimension_numbers<[1], [0], [0], [1], [0, 0, 1, 1], [], []>} : vector<128x192xf32>, vector<192x64xf32>, vector<128x64xf32> -> vector<128x64xf32>
    %153 = arith.addf %143, %152 : vector<128x64xf32>
    %c0_158 = arith.constant 0 : index
    %c1_159 = arith.constant 1 : index
    %c0_160 = arith.constant 0 : index
    %c0_161 = arith.constant 0 : index
    %154 = vector.load %arg16[%c0_158, %c1_159, %c0_160, %c0_161] : memref<2x10x10x64xf32, #tpu.memory_space<vmem>>, vector<2x8x8x64xf32>
    %c0_162 = arith.constant 0 : index
    %c1_163 = arith.constant 1 : index
    %c1_164 = arith.constant 1 : index
    %c0_165 = arith.constant 0 : index
    %155 = vector.load %arg16[%c0_162, %c1_163, %c1_164, %c0_165] : memref<2x10x10x64xf32, #tpu.memory_space<vmem>>, vector<2x8x8x64xf32>
    %c0_166 = arith.constant 0 : index
    %c1_167 = arith.constant 1 : index
    %c2_168 = arith.constant 2 : index
    %c0_169 = arith.constant 0 : index
    %156 = vector.load %arg16[%c0_166, %c1_167, %c2_168, %c0_169] : memref<2x10x10x64xf32, #tpu.memory_space<vmem>>, vector<2x8x8x64xf32>
    %157 = tpu.concatenate %154, %155, %156 in 3 : vector<2x8x8x64xf32>, vector<2x8x8x64xf32>, vector<2x8x8x64xf32> -> vector<2x8x8x192xf32>
    %158 = vector.shape_cast %157 : vector<2x8x8x192xf32> to vector<128x192xf32>
    %c1_170 = arith.constant 1 : index
    %c0_171 = arith.constant 0 : index
    %c0_172 = arith.constant 0 : index
    %159 = vector.load %arg10[%c1_170, %c0_171, %c0_172] : memref<3x192x64xf32, #tpu.memory_space<vmem>>, vector<1x192x64xf32>
    %160 = vector.shape_cast %159 : vector<1x192x64xf32> to vector<192x64xf32>
    %cst_173 = arith.constant dense<0.000000e+00> : vector<128x64xf32>
    %161 = tpu.matmul %158, %160, %cst_173 {dimension_numbers = #tpu.dot_dimension_numbers<[1], [0], [0], [1], [0, 0, 1, 1], [], []>} : vector<128x192xf32>, vector<192x64xf32>, vector<128x64xf32> -> vector<128x64xf32>
    %162 = arith.addf %153, %161 : vector<128x64xf32>
    %c0_174 = arith.constant 0 : index
    %c2_175 = arith.constant 2 : index
    %c0_176 = arith.constant 0 : index
    %c0_177 = arith.constant 0 : index
    %163 = vector.load %arg16[%c0_174, %c2_175, %c0_176, %c0_177] : memref<2x10x10x64xf32, #tpu.memory_space<vmem>>, vector<2x8x8x64xf32>
    %c0_178 = arith.constant 0 : index
    %c2_179 = arith.constant 2 : index
    %c1_180 = arith.constant 1 : index
    %c0_181 = arith.constant 0 : index
    %164 = vector.load %arg16[%c0_178, %c2_179, %c1_180, %c0_181] : memref<2x10x10x64xf32, #tpu.memory_space<vmem>>, vector<2x8x8x64xf32>
    %c0_182 = arith.constant 0 : index
    %c2_183 = arith.constant 2 : index
    %c2_184 = arith.constant 2 : index
    %c0_185 = arith.constant 0 : index
    %165 = vector.load %arg16[%c0_182, %c2_183, %c2_184, %c0_185] : memref<2x10x10x64xf32, #tpu.memory_space<vmem>>, vector<2x8x8x64xf32>
    %166 = tpu.concatenate %163, %164, %165 in 3 : vector<2x8x8x64xf32>, vector<2x8x8x64xf32>, vector<2x8x8x64xf32> -> vector<2x8x8x192xf32>
    %167 = vector.shape_cast %166 : vector<2x8x8x192xf32> to vector<128x192xf32>
    %c2_186 = arith.constant 2 : index
    %c0_187 = arith.constant 0 : index
    %c0_188 = arith.constant 0 : index
    %168 = vector.load %arg10[%c2_186, %c0_187, %c0_188] : memref<3x192x64xf32, #tpu.memory_space<vmem>>, vector<1x192x64xf32>
    %169 = vector.shape_cast %168 : vector<1x192x64xf32> to vector<192x64xf32>
    %cst_189 = arith.constant dense<0.000000e+00> : vector<128x64xf32>
    %170 = tpu.matmul %167, %169, %cst_189 {dimension_numbers = #tpu.dot_dimension_numbers<[1], [0], [0], [1], [0, 0, 1, 1], [], []>} : vector<128x192xf32>, vector<192x64xf32>, vector<128x64xf32> -> vector<128x64xf32>
    %171 = arith.addf %162, %170 : vector<128x64xf32>
    %172 = vector.shape_cast %171 : vector<128x64xf32> to vector<2x8x8x64xf32>
    %c0_190 = arith.constant 0 : index
    %c0_191 = arith.constant 0 : index
    %c0_192 = arith.constant 0 : index
    %c0_193 = arith.constant 0 : index
    %173 = vector.load %arg14[%c0_190, %c0_191, %c0_192, %c0_193] : memref<2x8x8x64xf32, #tpu.memory_space<vmem>>, vector<2x8x8x64xf32>
    tpu.vector_store %arg14[%c0_190, %c0_191, %c0_192, %c0_193], %172 {strides = array<i32>} : memref<2x8x8x64xf32, #tpu.memory_space<vmem>>, vector<2x8x8x64xf32>,
    return
  }
  func.func @transform_0(%arg0: i32) -> (i32, i32, i32, i32) {
    %c0_i32 = arith.constant 0 : i32
    %c0_i32_0 = arith.constant 0 : i32
    %c0_i32_1 = arith.constant 0 : i32
    %c0_i32_2 = arith.constant 0 : i32
    return %arg0, %c0_i32, %c0_i32_0, %c0_i32_1 : i32, i32, i32, i32
  }
  func.func @transform_1(%arg0: i32) -> (i32, i32) {
    %c0_i32 = arith.constant 0 : i32
    %c0_i32_0 = arith.constant 0 : i32
    %c0_i32_1 = arith.constant 0 : i32
    return %c0_i32, %c0_i32_0 : i32, i32
  }
  func.func @transform_2(%arg0: i32) -> (i32, i32) {
    %c0_i32 = arith.constant 0 : i32
    %c0_i32_0 = arith.constant 0 : i32
    %c0_i32_1 = arith.constant 0 : i32
    return %c0_i32, %c0_i32_0 : i32, i32
  }
  func.func @transform_3(%arg0: i32) -> (i32, i32) {
    %c0_i32 = arith.constant 0 : i32
    %c0_i32_0 = arith.constant 0 : i32
    %c0_i32_1 = arith.constant 0 : i32
    return %c0_i32, %c0_i32_0 : i32, i32
  }
  func.func @transform_4(%arg0: i32) -> (i32, i32, i32) {
    %c0_i32 = arith.constant 0 : i32
    %c0_i32_0 = arith.constant 0 : i32
    %c0_i32_1 = arith.constant 0 : i32
    %c0_i32_2 = arith.constant 0 : i32
    return %c0_i32, %c0_i32_0, %c0_i32_1 : i32, i32, i32
  }
  func.func @transform_5(%arg0: i32) -> (i32, i32) {
    %c0_i32 = arith.constant 0 : i32
    %c0_i32_0 = arith.constant 0 : i32
    %c0_i32_1 = arith.constant 0 : i32
    return %c0_i32, %c0_i32_0 : i32, i32
  }
  func.func @transform_6(%arg0: i32) -> (i32, i32) {
    %c0_i32 = arith.constant 0 : i32
    %c0_i32_0 = arith.constant 0 : i32
    %c0_i32_1 = arith.constant 0 : i32
    return %c0_i32, %c0_i32_0 : i32, i32
  }
  func.func @transform_7(%arg0: i32) -> (i32, i32) {
    %c0_i32 = arith.constant 0 : i32
    %c0_i32_0 = arith.constant 0 : i32
    %c0_i32_1 = arith.constant 0 : i32
    return %c0_i32, %c0_i32_0 : i32, i32
  }
  func.func @transform_8(%arg0: i32) -> (i32, i32) {
    %c0_i32 = arith.constant 0 : i32
    %c0_i32_0 = arith.constant 0 : i32
    %c0_i32_1 = arith.constant 0 : i32
    return %c0_i32, %c0_i32_0 : i32, i32
  }
  func.func @transform_9(%arg0: i32) -> (i32, i32, i32) {
    %c0_i32 = arith.constant 0 : i32
    %c0_i32_0 = arith.constant 0 : i32
    %c0_i32_1 = arith.constant 0 : i32
    %c0_i32_2 = arith.constant 0 : i32
    return %c0_i32, %c0_i32_0, %c0_i32_1 : i32, i32, i32
  }
  func.func @transform_10(%arg0: i32) -> (i32, i32) {
    %c0_i32 = arith.constant 0 : i32
    %c0_i32_0 = arith.constant 0 : i32
    %c0_i32_1 = arith.constant 0 : i32
    return %c0_i32, %c0_i32_0 : i32, i32
  }
  func.func @transform_11(%arg0: i32) -> (i32, i32) {
    %c0_i32 = arith.constant 0 : i32
    %c0_i32_0 = arith.constant 0 : i32
    %c0_i32_1 = arith.constant 0 : i32
    return %c0_i32, %c0_i32_0 : i32, i32
  }
  func.func @transform_12(%arg0: i32) -> (i32, i32) {
    %c0_i32 = arith.constant 0 : i32
    %c0_i32_0 = arith.constant 0 : i32
    %c0_i32_1 = arith.constant 0 : i32
    return %c0_i32, %c0_i32_0 : i32, i32
  }
  func.func @transform_13(%arg0: i32) -> (i32, i32, i32, i32) {
    %c0_i32 = arith.constant 0 : i32
    %c0_i32_0 = arith.constant 0 : i32
    %c0_i32_1 = arith.constant 0 : i32
    %c0_i32_2 = arith.constant 0 : i32
    return %arg0, %c0_i32, %c0_i32_0, %c0_i32_1 : i32, i32, i32, i32
  }
}

</mosaic_0001>

<bundles_post_ra>
// kernel: tpu_custom_call.1
= control target key start
LH: loop header
LB: loop body
LE: loop exit
PB: predicated region body
PF: predicated region fallthrough
CT: control target
= control target key end

     0   :  { %v4790_v3 = vmov 0.0|0.0   ;;  %vm4791_vm0 = vmmov 0   ;;  %v4792_v6 = vmov 0.0   ;;  %vm61_vm1 = vcmask 261120   ;;  %s7052_s0 = inlined_call_operand.vmem [shape: f32[2,8,8,32], index: 0, kind: input, shape index: {}]   ;;  %s7053_s1 = inlined_call_operand.vmem [shape: f32[32,16], index: 1, kind: input, shape index: {}]   ;;  %s7054_s2 = inlined_call_operand.vmem [shape: f32[16,32], index: 2, kind: input, shape index: {}]   ;;  %s7055_s3 = inlined_call_operand.vmem [shape: f32[1,32], index: 3, kind: input, shape index: {}]   ;;  %s7056_s4 = inlined_call_operand.vmem [shape: f32[3,96,64], index: 4, kind: input, shape index: {}]   ;;  %s7057_s5 = inlined_call_operand.vmem [shape: f32[1,64], index: 5, kind: input, shape index: {}]   ;;  %s7058_s6 = inlined_call_operand.vmem [shape: f32[64,16], index: 6, kind: input, shape index: {}]   ;;  %s7059_s7 = inlined_call_operand.vmem [shape: f32[16,64], index: 7, kind: input, shape index: {}]   ;;  %s7060_s8 = inlined_call_operand.vmem [shape: f32[1,64], index: 8, kind: input, shape index: {}]   ;;  %s7061_s9 = inlined_call_operand.vmem [shape: f32[3,192,64], index: 9, kind: input, shape index: {}]   ;;  %s7062_s10 = inlined_call_operand.vmem [shape: f32[1,64], index: 10, kind: input, shape index: {}]   ;;  %s7063_s11 = inlined_call_operand.vmem [shape: f32[32,64], index: 11, kind: input, shape index: {}]   ;;  %s7064_s12 = inlined_call_operand.vmem [shape: f32[1,64], index: 12, kind: input, shape index: {}]   ;;  %s7065_s13 = inlined_call_operand.hbm [shape: f32[2,8,8,64], index: 13, kind: output, shape index: {}]  }
   0x1   :  { %v151_v0 = vld [vmem:[%s7053_s1] sm:$0xff]  ;;  %v152_v1 = vld [vmem:[%s7053_s1 + $0x8] sm:$0xff]  ;;  %v153_v2 = vld [vmem:[%s7053_s1 + $0x10] sm:$0xff]  ;;  %4288 = vmatprep.subr.bf16.mxu0 %v4790_v3  ;;  %4076 = vmatprep.mubr.msk.f32.mxu0 %vm4791_vm0, %v4792_v6  ;;  %62 = vst.msk [vmem:[#allocation2] sm:$0xff] %vm61_vm1, %v4792_v6 }
   0x2   :  { %v4289_v4 = vpack.c.bf16 %v152_v1, %v151_v0  ;;  %v154_v5 = vld [vmem:[%s7053_s1 + $0x18] sm:$0xff]  ;;  %v4887_v7 = vld [vmem:[%s7052_s0] sm:$0xff]  ;;  %v4892_v8 = vld [vmem:[%s7052_s0 + $0x8] sm:$0xff]  ;;  %65 = vst.msk [vmem:[#allocation2 + $0xa0] sm:$0xff] %vm61_vm1, %v4792_v6  ;;  %4294 = vmatprep.subr.bf16.mxu1 %v4790_v3  ;;  %4083 = vmatprep.mubr.msk.f32.mxu1 %vm4791_vm0, %v4792_v6 }
   0x3   :  { %v4897_v9 = vld [vmem:[%s7052_s0 + $0x10] sm:$0xff]  ;;  %v158_v10 = vsel %vm61_vm1, %v4887_v7, 0.0  ;;  %v159_v11 = vsel %vm61_vm1, %v4892_v8, 0.0  ;;  %68 = vst.msk [vmem:[#allocation2 + $0x90] sm:$0xff] %vm61_vm1, %v4792_v6  ;;  %70 = vst.msk [vmem:[#allocation2 + $0x130] sm:$0xff] %vm61_vm1, %v4792_v6  ;;  %v4292_v12 = vpack.c.bf16 %v154_v5, %v153_v2  ;;  %v4917_v13 = vld [vmem:[%s7052_s0 + $0x18] sm:$0xff]  ;;  %v202_v31 = vmul.f32 %v4887_v7, %v4887_v7 }
   0x4   :  { %4290 = vmatpush3.bf16.msra.mxu0 %v4289_v4  ;;  %v160_v14 = vadd.f32 %v159_v11, %v158_v10  ;;  %v161_v15 = vsel %vm61_vm1, %v4897_v9, 0.0  ;;  %v4925_v16 = vld [vmem:[%s7052_s0 + $0x40] sm:$0xff]  ;;  %v4930_v17 = vld [vmem:[%s7052_s0 + $0x48] sm:$0xff]  ;;  %v4935_v18 = vld [vmem:[%s7052_s0 + $0x50] sm:$0xff]  ;;  %v163_v19 = vsel %vm61_vm1, %v4917_v13, 0.0 }
   0x5   :  { %4291 = vmatprep.subr.bf16.mxu0 %v4790_v3  ;;  %v4942_v20 = vld [vmem:[%s7052_s0 + $0x20] sm:$0xff]  ;;  %v4947_v21 = vld [vmem:[%s7052_s0 + $0x28] sm:$0xff]  ;;  %v173_v23 = vsel %vm61_vm1, %v4925_v16, 0.0  ;;  %v174_v24 = vsel %vm61_vm1, %v4930_v17, 0.0  ;;  %v176_v25 = vsel %vm61_vm1, %v4935_v18, 0.0  ;;  %v4958_v26 = vld [vmem:[%s7052_s0 + $0x30] sm:$0xff] }
   0x6   :  { %v162_v22 = vadd.f32 %v161_v15, %v160_v14  ;;  %v4963_v27 = vld [vmem:[%s7052_s0 + $0x38] sm:$0xff]  ;;  %v165_v29 = vsel %vm61_vm1, %v4942_v20, 0.0  ;;  %v175_v30 = vadd.f32 %v174_v24, %v173_v23  ;;  %v4977_v32 = vld [vmem:[%s7052_s0 + $0x60] sm:$0xff]  ;;  %v167_v34 = vsel %vm61_vm1, %v4947_v21, 0.0 }
   0x7   :  { %v4968_v28 = vld [vmem:[%s7052_s0 + $0x58] sm:$0xff]  ;;  %v169_v35 = vsel %vm61_vm1, %v4958_v26, 0.0 }
   0x8   :  { %4293 = vmatpush3.bf16.msra.mxu0 %v4292_v12  ;;  %v164_v33 = vadd.f32 %v163_v19, %v162_v22  ;;  %v178_v36 = vsel %vm61_vm1, %v4968_v28, 0.0 }
   0x9   :  { %18 = vsyncpa [#allocation5], 0  ;;  %v4988_v37 = vld [vmem:[%s7052_s0 + $0x68] sm:$0xff]  ;;  %v4993_v38 = vld [vmem:[%s7052_s0 + $0x70] sm:$0xff]  ;;  %v171_v39 = vsel %vm61_vm1, %v4963_v27, 0.0  ;;  %v177_v40 = vadd.f32 %v176_v25, %v175_v30  ;;  %v180_v41 = vsel %vm61_vm1, %v4977_v32, 0.0  ;;  %v203_v42 = vmul.f32 %v4892_v8, %v4892_v8  ;;  %4369 = vmatprep.subr.bf16.mxu0 %v4790_v3 }
   0xa   :  { %v5005_v43 = vld [vmem:[%s7052_s0 + $0x78] sm:$0xff]  ;;  %v166_v44 = vadd.f32 %v165_v29, %v164_v33  ;;  %v182_v45 = vsel %vm61_vm1, %v4988_v37, 0.0  ;;  %v184_v46 = vsel %vm61_vm1, %v4993_v38, 0.0  ;;  %v204_v47 = vmul.f32 %v4897_v9, %v4897_v9  ;;  %s4794_s16 = smov 64  }
   0xb   :  { %v179_v48 = vadd.f32 %v178_v36, %v177_v40  ;;  %v186_v49 = vsel %vm61_vm1, %v5005_v43, 0.0  ;;  %v205_v50 = vmul.f32 %v4917_v13, %v4917_v13  ;;  %v206_v51 = vmul.f32 %v4942_v20, %v4942_v20 }
   0xc   :  { %v168_v52 = vadd.f32 %v167_v34, %v166_v44  ;;  %v207_v53 = vmul.f32 %v4947_v21, %v4947_v21  ;;  %v210_v54 = vmul.f32 %v4925_v16, %v4925_v16  ;;  %v211_v55 = vmul.f32 %v4930_v17, %v4930_v17 }
   0xd   :  { %v181_v56 = vadd.f32 %v180_v41, %v179_v48  ;;  %v212_v57 = vmul.f32 %v4935_v18, %v4935_v18  ;;  %v218_v58 = vsel %vm61_vm1, %v202_v31, 0.0  ;;  %v219_v59 = vsel %vm61_vm1, %v203_v42, 0.0 }
   0xe   :  { %v170_v60 = vadd.f32 %v169_v35, %v168_v52  ;;  %v208_v61 = vmul.f32 %v4958_v26, %v4958_v26  ;;  %v220_v62 = vadd.f32 %v219_v59, %v218_v58  ;;  %v221_v63 = vsel %vm61_vm1, %v204_v47, 0.0 }
   0xf   :  { %v183_v0 = vadd.f32 %v182_v45, %v181_v56  ;;  %v209_v1 = vmul.f32 %v4963_v27, %v4963_v27  ;;  %v213_v2 = vmul.f32 %v4968_v28, %v4968_v28  ;;  %v223_v4 = vsel %vm61_vm1, %v205_v50, 0.0 }
  0x10   :  { %v172_v5 = vadd.f32 %v171_v39, %v170_v60  ;;  %v214_v10 = vmul.f32 %v4977_v32, %v4977_v32  ;;  %v222_v11 = vadd.f32 %v221_v63, %v220_v62  ;;  %v233_v12 = vsel %vm61_vm1, %v210_v54, 0.0 }
  0x11   :  { %v185_v14 = vadd.f32 %v184_v46, %v183_v0  ;;  %v225_v15 = vsel %vm61_vm1, %v206_v51, 0.0  ;;  %v234_v19 = vsel %vm61_vm1, %v211_v55, 0.0  ;;  %v236_v22 = vsel %vm61_vm1, %v212_v57, 0.0 }
  0x12   :  { %v188_v23 = vsel %vm61_vm1, %v172_v5, 0.0  ;;  %v215_v24 = vmul.f32 %v4988_v37, %v4988_v37  ;;  %v224_v25 = vadd.f32 %v223_v4, %v222_v11  ;;  %v235_v29 = vadd.f32 %v234_v19, %v233_v12 }
  0x13   :  { %v187_v30 = vadd.f32 %v186_v49, %v185_v14  ;;  %v189_v31 = vrot.slane %v188_v23, 4  ;;  %v227_v33 = vsel %vm61_vm1, %v207_v53, 0.0  ;;  %v238_v34 = vsel %vm61_vm1, %v213_v2, 0.0 }
  0x14   :  { %v226_v35 = vadd.f32 %v225_v15, %v224_v25  ;;  %v237_v36 = vadd.f32 %v236_v22, %v235_v29  ;;  %v216_v40 = vmul.f32 %v4993_v38, %v4993_v38  ;;  %v229_v41 = vsel %vm61_vm1, %v208_v61, 0.0 }
  0x15   :  { %v195_v39 = vsel %vm61_vm1, %v187_v30, 0.0  ;;  %v240_v42 = vsel %vm61_vm1, %v214_v10, 0.0  ;;  %v190_v47 = vadd.f32 %v189_v31, %v188_v23  ;;  %v217_v48 = vmul.f32 %v5005_v43, %v5005_v43 }
  0x16   :  { %v196_v44 = vrot.slane %v195_v39, 4  ;;  %v228_v45 = vadd.f32 %v227_v33, %v226_v35  ;;  %v239_v46 = vadd.f32 %v238_v34, %v237_v36  ;;  %v231_v49 = vsel %vm61_vm1, %v209_v1, 0.0  ;;  %v155_v36 = vld [vmem:[%s7054_s2] sm:$0xff] }
  0x17   :  { %v242_v50 = vsel %vm61_vm1, %v215_v24, 0.0  ;;  %v244_v54 = vsel %vm61_vm1, %v216_v40, 0.0  ;;  %v191_v57 = vrot.slane %v190_v47, 2  ;;  %v246_v59 = vsel %vm61_vm1, %v217_v48, 0.0 }
  0x18   :  { %v197_v51 = vadd.f32 %v196_v44, %v195_v39  ;;  %v230_v52 = vadd.f32 %v229_v41, %v228_v45  ;;  %v241_v53 = vadd.f32 %v240_v42, %v239_v46  ;;  %vm264_vm2 = vcmask 1041409   ;;  %v156_v39 = vld [vmem:[%s7054_s2 + $0x8] sm:$0xff]  ;;  %s4793_s2 = smov 32  }
  0x19   :  { %v192_v0 = vadd.f32 %v191_v57, %v190_v47  ;;  %vm269_vm3 = vcmask 1043459   ;;  %vm272_vm4 = vcmask 1041408   ;;  %v4295_v40 = vpack.c.bf16 %v156_v39, %v155_v36 }
  0x1a   :  { %v232_v55 = vadd.f32 %v231_v49, %v230_v52  ;;  %v243_v56 = vadd.f32 %v242_v50, %v241_v53  ;;  %v198_v58 = vrot.slane %v197_v51, 2  ;;  %vm364_vm5 = vcmask 130048  }
  0x1b   :  { %v193_v11 = vrot.slane %v192_v0, 1  ;;  %4296 = vmatpush3.bf16.msra.mxu1 %v4295_v40  ;;  %vm63_vm6 = vcmask 254976   ;;  %vm73_vm7 = vcmask 253952   ;;  %vm106_vm8 = vcmask 523264  }
  0x1c   :  { %v245_v60 = vadd.f32 %v244_v54, %v243_v56  ;;  %v248_v61 = vsel %vm61_vm1, %v232_v55, 0.0  ;;  %v199_v1 = vadd.f32 %v198_v58, %v197_v51  ;;  %64 = vst.msk [vmem:[#allocation2 + $0x8] sm:$0x3] %vm63_vm6, %v4792_v6  ;;  %66 = vst.msk [vmem:[#allocation2 + $0xa8] sm:$0x3] %vm63_vm6, %v4792_v6  ;;  %vm862_vm9 = vcmask 785408  }
  0x1d   :  { %v249_v62 = vrot.slane %v248_v61, 4  ;;  %v194_v23 = vadd.f32 %v193_v11, %v192_v0  ;;  %69 = vst.msk [vmem:[#allocation2 + $0x98] sm:$0x3] %vm63_vm6, %v4792_v6  ;;  %71 = vst.msk [vmem:[#allocation2 + $0x138] sm:$0x3] %vm63_vm6, %v4792_v6  ;;  %vm108_vm10 = vcmask 517120  }
  0x1e   :  { %v247_v63 = vadd.f32 %v246_v59, %v245_v60  ;;  %v200_v12 = vrot.slane %v199_v1, 1  ;;  %90 = vst.msk [vmem:[#allocation2 + $0x19] sm:$0x1] %vm73_vm7, %v4792_v6  ;;  %74 = vst.msk [vmem:[#allocation2 + $0x10] sm:$0x1] %vm73_vm7, %v4792_v6  ;;  %vm118_vm11 = vcmask 516096  }
  0x1f   :  { %v250_v2 = vadd.f32 %v249_v62, %v248_v61  ;;  %75 = vst.msk [vmem:[#allocation2 + $0x20] sm:$0x1] %vm73_vm7, %v4792_v6  ;;  %76 = vst.msk [vmem:[#allocation2 + $0x30] sm:$0x1] %vm73_vm7, %v4792_v6  ;;  %v4795_v61 = vmov 1966171168  }
  0x20   :  { %v255_v4 = vsel %vm61_vm1, %v247_v63, 0.0  ;;  %v201_v24 = vadd.f32 %v200_v12, %v199_v1  ;;  %77 = vst.msk [vmem:[#allocation2 + $0x40] sm:$0x1] %vm73_vm7, %v4792_v6  ;;  %78 = vst.msk [vmem:[#allocation2 + $0x50] sm:$0x1] %vm73_vm7, %v4792_v6  ;;  %v447_v62 = vunpack.c.l.s4 %v4795_v61  ;;  %v449_v63 = vlaneseq }
  0x21   :  { %v251_v5 = vrot.slane %v250_v2, 2  ;;  %v256_v10 = vrot.slane %v255_v4, 4  ;;  %79 = vst.msk [vmem:[#allocation2 + $0x60] sm:$0x1] %vm73_vm7, %v4792_v6  ;;  %80 = vst.msk [vmem:[#allocation2 + $0x70] sm:$0x1] %vm73_vm7, %v4792_v6 }
  0x22   :  { %v265_v33 = vsel %vm264_vm2, %v201_v24, %v194_v23  ;;  %81 = vst.msk [vmem:[#allocation2 + $0x80] sm:$0x1] %vm73_vm7, %v4792_v6  ;;  %82 = vst.msk [vmem:[#allocation2 + $0xb0] sm:$0x1] %vm73_vm7, %v4792_v6  ;;  %v448_v0 = vunpack.c.0.s8 %v447_v62  ;;  %v450_v1 = vshrl.u32 %v449_v63, 7 }
  0x23   :  { %v252_v14 = vadd.f32 %v251_v5, %v250_v2  ;;  %v257_v15 = vadd.f32 %v256_v10, %v255_v4  ;;  %83 = vst.msk [vmem:[#allocation2 + $0xc0] sm:$0x1] %vm73_vm7, %v4792_v6  ;;  %84 = vst.msk [vmem:[#allocation2 + $0xd0] sm:$0x1] %vm73_vm7, %v4792_v6  ;;  %v658_v55 = vld [vmem:[#allocation2 + $0x1] sm:$0xff] }
  0x24   :  { %85 = vst.msk [vmem:[#allocation2 + $0xe0] sm:$0x1] %vm73_vm7, %v4792_v6  ;;  %86 = vst.msk [vmem:[#allocation2 + $0xf0] sm:$0x1] %vm73_vm7, %v4792_v6  ;;  %v674_v56 = vld [vmem:[#allocation2 + $0x2] sm:$0xff]  ;;  %706 = vrot.lane.b32.xlu0 %v658_v55, %s4793_s2  ;;  %v1532_v58 = vld [vmem:[#allocation2 + $0x91] sm:$0xff]  ;;  %v5149_v2 = vsub.s32 %v448_v0, %v450_v1 }
  0x25   :  { %v253_v19 = vrot.slane %v252_v14, 1  ;;  %v258_v22 = vrot.slane %v257_v15, 2  ;;  %87 = vst.msk [vmem:[#allocation2 + $0x100] sm:$0x1] %vm73_vm7, %v4792_v6  ;;  %88 = vst.msk [vmem:[#allocation2 + $0x110] sm:$0x1] %vm73_vm7, %v4792_v6  ;;  %770 = vrot.lane.b32.xlu1 %v674_v56, %s4794_s16 }
  0x26   :  { %89 = vst.msk [vmem:[#allocation2 + $0x120] sm:$0x1] %vm73_vm7, %v4792_v6  ;;  %91 = vst.msk [vmem:[#allocation2 + $0x29] sm:$0x1] %vm73_vm7, %v4792_v6  ;;  %v666_v57 = vld [vmem:[#allocation2 + $0xa1] sm:$0xff]  ;;  %v1548_v60 = vld [vmem:[#allocation2 + $0x92] sm:$0xff] }
  0x27   :  { %v259_v25 = vadd.f32 %v258_v22, %v257_v15  ;;  %v254_v29 = vadd.f32 %v253_v19, %v252_v14  ;;  %92 = vst.msk [vmem:[#allocation2 + $0x39] sm:$0x1] %vm73_vm7, %v4792_v6  ;;  %93 = vst.msk [vmem:[#allocation2 + $0x49] sm:$0x1] %vm73_vm7, %v4792_v6  ;;  %v682_v59 = vld [vmem:[#allocation2 + $0xa2] sm:$0xff]  ;;  %v5155_v12 = vsub.s32 0, %v450_v1 }
  0x28   :  { %94 = vst.msk [vmem:[#allocation2 + $0x59] sm:$0x1] %vm73_vm7, %v4792_v6  ;;  %95 = vst.msk [vmem:[#allocation2 + $0x69] sm:$0x1] %vm73_vm7, %v4792_v6  ;;  %722 = vrot.lane.b32.xlu0 %v666_v57, %s4793_s2  ;;  %v3755_v4 = vld [vmem:[%s7055_s3] ss:$0 sm:$0xff] }
  0x29   :  { %v260_v30 = vrot.slane %v259_v25, 1  ;;  %96 = vst.msk [vmem:[#allocation2 + $0x79] sm:$0x1] %vm73_vm7, %v4792_v6  ;;  %97 = vst.msk [vmem:[#allocation2 + $0x89] sm:$0x1] %vm73_vm7, %v4792_v6  ;;  %1587 = vrot.lane.b32.xlu1 %v1532_v58, %s4793_s2  ;;  %v855_v1 = vld [vmem:[%s7056_s4 + $0x28] sm:$0xff] }
  0x2a   :  { %98 = vst.msk [vmem:[#allocation2 + $0xb9] sm:$0x1] %vm73_vm7, %v4792_v6  ;;  %99 = vst.msk [vmem:[#allocation2 + $0xc9] sm:$0x1] %vm73_vm7, %v4792_v6 }
  0x2b   :  { %v261_v31 = vadd.f32 %v260_v30, %v259_v25  ;;  %100 = vst.msk [vmem:[#allocation2 + $0xd9] sm:$0x1] %vm73_vm7, %v4792_v6  ;;  %101 = vst.msk [vmem:[#allocation2 + $0xe9] sm:$0x1] %vm73_vm7, %v4792_v6  ;;  %v850_v30 = vld [vmem:[%s7056_s4] sm:$0xff] }
  0x2c   :  { %102 = vst.msk [vmem:[#allocation2 + $0xf9] sm:$0x1] %vm73_vm7, %v4792_v6  ;;  %103 = vst.msk [vmem:[#allocation2 + $0x109] sm:$0x1] %vm73_vm7, %v4792_v6  ;;  %786 = vrot.lane.b32.xlu0 %v682_v59, %s4794_s16 }
  0x2d   :  { %v270_v34 = vsel %vm269_vm3, %v261_v31, %v254_v29  ;;  %104 = vst.msk [vmem:[#allocation2 + $0x119] sm:$0x1] %vm73_vm7, %v4792_v6  ;;  %105 = vst.msk [vmem:[#allocation2 + $0x129] sm:$0x1] %vm73_vm7, %v4792_v6  ;;  %1651 = vrot.lane.b32.xlu1 %v1548_v60, %s4794_s16  ;;  %v851_v31 = vld [vmem:[%s7056_s4 + $0x8] sm:$0xff] }
  0x2e   :  { %v273_v35 = vsel %vm272_vm4, %v265_v33, %v270_v34  ;;  %107 = vst.msk [vmem:[#allocation3] sm:$0xff] %vm106_vm8, %v4792_v6  ;;  %110 = vst.msk [vmem:[#allocation3 + $0xa0] sm:$0xff] %vm106_vm8, %v4792_v6 }
  0x2f   :  { %4077 = vmatmul.mubr.msk.f32.vlgmr.msra.gmra.mrb[0].mxu0 %vm61_vm1, %v273_v35  ;;  %113 = vst.msk [vmem:[#allocation3 + $0x90] sm:$0xff] %vm106_vm8, %v4792_v6  ;;  %115 = vst.msk [vmem:[#allocation3 + $0x130] sm:$0xff] %vm106_vm8, %v4792_v6 }
  0x30   :  { %4246 = vmatprep.mubr.msk.f32.mxu0 %vm4791_vm0, %v4792_v6  ;;  %109 = vst.msk [vmem:[#allocation3 + $0x8] sm:$0x3] %vm108_vm10, %v4792_v6  ;;  %111 = vst.msk [vmem:[#allocation3 + $0xa8] sm:$0x3] %vm108_vm10, %v4792_v6 }
  0x31   :  { %114 = vst.msk [vmem:[#allocation3 + $0x98] sm:$0x3] %vm108_vm10, %v4792_v6  ;;  %116 = vst.msk [vmem:[#allocation3 + $0x138] sm:$0x3] %vm108_vm10, %v4792_v6 }
  0x32   :  { %135 = vst.msk [vmem:[#allocation3 + $0x19] sm:$0x1] %vm118_vm11, %v4792_v6  ;;  %119 = vst.msk [vmem:[#allocation3 + $0x10] sm:$0x1] %vm118_vm11, %v4792_v6 }
  0x33   :  { %120 = vst.msk [vmem:[#allocation3 + $0x20] sm:$0x1] %vm118_vm11, %v4792_v6  ;;  %121 = vst.msk [vmem:[#allocation3 + $0x30] sm:$0x1] %vm118_vm11, %v4792_v6 }
  0x34   :  { %122 = vst.msk [vmem:[#allocation3 + $0x40] sm:$0x1] %vm118_vm11, %v4792_v6  ;;  %123 = vst.msk [vmem:[#allocation3 + $0x50] sm:$0x1] %vm118_vm11, %v4792_v6 }
  0x35   :  { %124 = vst.msk [vmem:[#allocation3 + $0x60] sm:$0x1] %vm118_vm11, %v4792_v6  ;;  %125 = vst.msk [vmem:[#allocation3 + $0x70] sm:$0x1] %vm118_vm11, %v4792_v6 }
  0x36   :  { %126 = vst.msk [vmem:[#allocation3 + $0x80] sm:$0x1] %vm118_vm11, %v4792_v6  ;;  %127 = vst.msk [vmem:[#allocation3 + $0xb0] sm:$0x1] %vm118_vm11, %v4792_v6 }
  0x37   :  { %128 = vst.msk [vmem:[#allocation3 + $0xc0] sm:$0x1] %vm118_vm11, %v4792_v6  ;;  %129 = vst.msk [vmem:[#allocation3 + $0xd0] sm:$0x1] %vm118_vm11, %v4792_v6 }
  0x38   :  { %130 = vst.msk [vmem:[#allocation3 + $0xe0] sm:$0x1] %vm118_vm11, %v4792_v6  ;;  %131 = vst.msk [vmem:[#allocation3 + $0xf0] sm:$0x1] %vm118_vm11, %v4792_v6 }
  0x39   :  { %132 = vst.msk [vmem:[#allocation3 + $0x100] sm:$0x1] %vm118_vm11, %v4792_v6  ;;  %133 = vst.msk [vmem:[#allocation3 + $0x110] sm:$0x1] %vm118_vm11, %v4792_v6 }
  0x3a   :  { %134 = vst.msk [vmem:[#allocation3 + $0x120] sm:$0x1] %vm118_vm11, %v4792_v6  ;;  %136 = vst.msk [vmem:[#allocation3 + $0x29] sm:$0x1] %vm118_vm11, %v4792_v6 }
  0x3b   :  { %137 = vst.msk [vmem:[#allocation3 + $0x39] sm:$0x1] %vm118_vm11, %v4792_v6  ;;  %138 = vst.msk [vmem:[#allocation3 + $0x49] sm:$0x1] %vm118_vm11, %v4792_v6 }
  0x3c   :  { %139 = vst.msk [vmem:[#allocation3 + $0x59] sm:$0x1] %vm118_vm11, %v4792_v6  ;;  %140 = vst.msk [vmem:[#allocation3 + $0x69] sm:$0x1] %vm118_vm11, %v4792_v6 }
  0x3d   :  { %141 = vst.msk [vmem:[#allocation3 + $0x79] sm:$0x1] %vm118_vm11, %v4792_v6  ;;  %142 = vst.msk [vmem:[#allocation3 + $0x89] sm:$0x1] %vm118_vm11, %v4792_v6 }
  0x3e   :  { %143 = vst.msk [vmem:[#allocation3 + $0xb9] sm:$0x1] %vm118_vm11, %v4792_v6  ;;  %144 = vst.msk [vmem:[#allocation3 + $0xc9] sm:$0x1] %vm118_vm11, %v4792_v6 }
  0x3f   :  { %145 = vst.msk [vmem:[#allocation3 + $0xd9] sm:$0x1] %vm118_vm11, %v4792_v6  ;;  %146 = vst.msk [vmem:[#allocation3 + $0xe9] sm:$0x1] %vm118_vm11, %v4792_v6 }
  0x40   :  { %147 = vst.msk [vmem:[#allocation3 + $0xf9] sm:$0x1] %vm118_vm11, %v4792_v6  ;;  %148 = vst.msk [vmem:[#allocation3 + $0x109] sm:$0x1] %vm118_vm11, %v4792_v6 }
  0x41   :  { %149 = vst.msk [vmem:[#allocation3 + $0x119] sm:$0x1] %vm118_vm11, %v4792_v6  ;;  %150 = vst.msk [vmem:[#allocation3 + $0x129] sm:$0x1] %vm118_vm11, %v4792_v6 }
  0x97   :  { %v771_v60 = vpop.permute.xlu1 %770 }
 0x102   :  { %v343_v41 = vpop.f32.mrb[0].mxu0 }
 0x103   :  { %v347_v42 = vmul.f32 0.0078125, %v343_v41  ;;  %v4078_v44 = vpop.f32.mrb[1].mxu0 }
 0x104   :  { %v4297_v44 = vpack.c.bf16 %v851_v31, %v850_v30 }
 0x105   :  { %v348_v45 = vmul.f32 %v347_v42, %v347_v42 }
 0x106   :  { %4298 = vmatprep.subr.bf16.mxu1 %v4297_v44 }
 0x107   :  { %v350_v46 = vrot.slane %v348_v45, 6  ;;  %v852_v45 = vld [vmem:[%s7056_s4 + $0x10] sm:$0xff] }
 0x109   :  { %v352_v47 = vsub.f32 %v347_v42, %v350_v46  ;;  %v642_v46 = vld [vmem:[#allocation2] sm:$0xff] }
 0x10b   :  { %v353_v48 = vmax.f32 %v352_v47, 0.0 }
 0x10d   :  { %v354_v49 = vadd.f32 1e-06, %v353_v48 }
 0x10f   :  { %4682 = vrsqrt.f32 %v354_v49 }
 0x119   :  { %v4683_v50 = vpop.eup %4682 }
 0x11a   :  { %v357_v51 = vrot.slane %v4683_v50, 2 }
 0x11c   :  { %v359_v52 = vmul.f32 %v357_v51, %v347_v42 }
 0x11e   :  { %v361_v53 = vrot.slane %v359_v52, 6 }
 0x120   :  { %v363_v54 = vsel %vm272_vm4, %v357_v51, %v361_v53 }
 0x121   :  { %4084 = vmatmul.mubr.msk.f32.vlgmr.msra.gmra.mrb[0].mxu1 %vm364_vm5, %v363_v54 }
 0x122   :  { %4300 = vmatpush3.bf16.msra.mxu1 %v4297_v44 }
 0x1f4   :  { %v434_v5 = vpop.f32.mrb[0].mxu1 }
 0x1f5   :  { %v444_v10 = vsub.f32 %v3755_v4, %v434_v5  ;;  %v452_v11 = vrot.slane %v434_v5, %v5149_v2  ;;  %v4085_v14 = vpop.f32.mrb[1].mxu1 }
 0x1f7   :  { %v453_v15 = vcombine.high %v452_v11, %v452_v11  ;;  %v460_v19 = vrot.slane %v452_v11, %v5149_v2  ;;  %v501_v22 = vrot.slane %v444_v10, %v5149_v2 }
 0x1f9   :  { %v467_v23 = vrot.slane %v453_v15, %v5149_v2  ;;  %v471_v24 = vrot.slane %v460_v19, %v5155_v12  ;;  %v502_v25 = vcombine.high %v501_v22, %v501_v22  ;;  %v509_v29 = vrot.slane %v501_v22, %v5149_v2  ;;  %v856_v15 = vld [vmem:[%s7056_s4 + $0x30] sm:$0xff]  ;;  %v857_v19 = vld [vmem:[%s7056_s4 + $0x38] sm:$0xff] }
 0x1fb   :  { %v5169_v33 = vrot.slane %v467_v23, %v5155_v12  ;;  %v478_v34 = vmul.f32 %v471_v24, %v4887_v7  ;;  %v479_v35 = vmul.f32 %v471_v24, %v4892_v8  ;;  %v480_v36 = vmul.f32 %v471_v24, %v4897_v9  ;;  %v853_v7 = vld [vmem:[%s7056_s4 + $0x18] sm:$0xff] }
 0x1fc   :  { %v516_v39 = vrot.slane %v502_v25, %v5149_v2  ;;  %v517_v40 = vcombine.high %v509_v29, %v509_v29  ;;  %v481_v41 = vmul.f32 %v471_v24, %v4917_v13  ;;  %v482_v42 = vmul.f32 %v471_v24, %v4942_v20  ;;  %v707_v13 = vpop.permute.xlu0 %706 }
 0x1fd   :  { %v483_v8 = vmul.f32 %v471_v24, %v4947_v21  ;;  %v4301_v48 = vpack.c.bf16 %v853_v7, %v852_v45  ;;  %v484_v20 = vmul.f32 %v471_v24, %v4958_v26  ;;  %v485_v21 = vmul.f32 %v471_v24, %v4963_v27 }
 0x1fe   :  { %v518_v9 = vcombine.high %v516_v39, %v516_v39  ;;  %v522_v47 = vrot.slane %v517_v40, %v5155_v12  ;;  %v486_v49 = vmul.f32 %v5169_v33, %v4925_v16  ;;  %v818_v50 = vsel %vm61_vm1, %v642_v46, %v707_v13 }
 0x1ff   :  { %v487_v16 = vmul.f32 %v5169_v33, %v4930_v17  ;;  %4302 = vmatprep.subr.bf16.mxu1 %v4301_v48  ;;  %v488_v63 = vmul.f32 %v5169_v33, %v4935_v18  ;;  %v834_v0 = vsel %vm106_vm8, %v818_v50, %v771_v60  ;;  %v854_v17 = vld [vmem:[%s7056_s4 + $0x20] sm:$0xff]  ;;  %v489_v18 = vmul.f32 %v5169_v33, %v4968_v28 }
 0x200   :  { %v5199_v51 = vrot.slane %v518_v9, %v5155_v12  ;;  %v5201_v52 = vadd.f32 %v522_v47, %v478_v34  ;;  %v5203_v53 = vadd.f32 %v522_v47, %v480_v36  ;;  %v5205_v54 = vadd.f32 %v522_v47, %v479_v35  ;;  %4304 = vmatpush3.bf16.msra.mxu1 %v4301_v48  ;;  %v858_v36 = vld [vmem:[%s7056_s4 + $0x40] sm:$0xff] }
 0x201   :  { %v5207_v55 = vadd.f32 %v522_v47, %v482_v42  ;;  %v5209_v26 = vadd.f32 %v522_v47, %v481_v41  ;;  %v5211_v27 = vadd.f32 %v522_v47, %v484_v20  ;;  %v5218_v59 = vadd.f32 %v522_v47, %v483_v8  ;;  %4110 = vmatprep.mubr.msk.f32.mxu1 %vm862_vm9, %v834_v0  ;;  %v861_v8 = vld [vmem:[%s7056_s4 + $0x58] sm:$0xff] }
 0x202   :  { %v545_v56 = vmul.f32 0.5, %v5201_v52  ;;  %v547_v57 = vmul.f32 0.5, %v5203_v53  ;;  %v546_v58 = vmul.f32 0.5, %v5205_v54  ;;  %v5221_v62 = vadd.f32 %v522_v47, %v485_v21 }
 0x203   :  { %v549_v61 = vmul.f32 0.5, %v5207_v55  ;;  %v548_v4 = vmul.f32 0.5, %v5209_v26  ;;  %v5234_v5 = vadd.f32 %v5199_v51, %v486_v49  ;;  %v551_v10 = vmul.f32 0.5, %v5211_v27 }
 0x204   :  { %4684 = vtanh.f32 %v545_v56  ;;  %v5240_v11 = vadd.f32 %v5199_v51, %v487_v16  ;;  %v5243_v14 = vadd.f32 %v5199_v51, %v488_v63  ;;  %v550_v28 = vmul.f32 0.5, %v5218_v59 }
 0x205   :  { %4686 = vtanh.f32 %v547_v57  ;;  %v490_v22 = vmul.f32 %v5169_v33, %v4977_v32  ;;  %v4305_v23 = vpack.c.bf16 %v855_v1, %v854_v17  ;;  %v552_v24 = vmul.f32 0.5, %v5221_v62 }
 0x206   :  { %4688 = vtanh.f32 %v546_v58  ;;  %v5256_v25 = vadd.f32 %v5199_v51, %v489_v18  ;;  %v491_v29 = vmul.f32 %v5169_v33, %v4988_v37  ;;  %v553_v30 = vmul.f32 0.5, %v5234_v5  ;;  %v859_v37 = vld [vmem:[%s7056_s4 + $0x48] sm:$0xff] }
 0x207   :  { %4690 = vtanh.f32 %v549_v61  ;;  %v5262_v31 = vadd.f32 %v5199_v51, %v490_v22  ;;  %4306 = vmatprep.subr.bf16.mxu1 %v4305_v23  ;;  %v4309_v34 = vpack.c.bf16 %v857_v19, %v856_v15  ;;  %v554_v32 = vmul.f32 0.5, %v5240_v11 }
 0x208   :  { %4692 = vtanh.f32 %v548_v4  ;;  %v555_v35 = vmul.f32 0.5, %v5243_v14  ;;  %4308 = vmatpush3.bf16.msra.mxu1 %v4305_v23  ;;  %v5274_v39 = vadd.f32 %v5199_v51, %v491_v29  ;;  %v492_v40 = vmul.f32 %v5169_v33, %v4993_v38  ;;  %v860_v38 = vld [vmem:[%s7056_s4 + $0x50] sm:$0xff] }
 0x209   :  { %4694 = vtanh.f32 %v551_v10  ;;  %4310 = vmatprep.subr.bf16.mxu1 %v4309_v34  ;;  %v4313_v41 = vpack.c.bf16 %v859_v37, %v858_v36  ;;  %v556_v42 = vmul.f32 0.5, %v5256_v25  ;;  %v493_v44 = vmul.f32 %v5169_v33, %v5005_v43 }
 0x20a   :  { %4696 = vtanh.f32 %v550_v28  ;;  %v557_v45 = vmul.f32 0.5, %v5262_v31  ;;  %v5283_v7 = vadd.f32 %v5199_v51, %v492_v40  ;;  %v558_v46 = vmul.f32 0.5, %v5274_v39 }
 0x20b   :  { %4698 = vtanh.f32 %v552_v24  ;;  %v5293_v43 = vadd.f32 %v5199_v51, %v493_v44  ;;  %v4317_v47 = vpack.c.bf16 %v861_v8, %v860_v38 }
 0x20c   :  { %4700 = vtanh.f32 %v553_v30  ;;  %4312 = vmatpush3.bf16.msra.mxu1 %v4309_v34  ;;  %v559_v9 = vmul.f32 0.5, %v5283_v7 }
 0x20d   :  { %4702 = vtanh.f32 %v554_v32  ;;  %4314 = vmatprep.subr.bf16.mxu1 %v4313_v41  ;;  %v560_v20 = vmul.f32 0.5, %v5293_v43 }
 0x20e   :  { %v4685_v33 = vpop.eup %4684  ;;  %4704 = vtanh.f32 %v555_v35 }
 0x20f   :  { %v4687_v48 = vpop.eup %4686  ;;  %v577_v13 = vmul.f32 0.5, %v4685_v33  ;;  %4706 = vtanh.f32 %v556_v42 }
 0x210   :  { %v4689_v21 = vpop.eup %4688  ;;  %v579_v49 = vmul.f32 0.5, %v4687_v48  ;;  %4708 = vtanh.f32 %v557_v45  ;;  %4316 = vmatpush3.bf16.msra.mxu1 %v4313_v41 }
 0x211   :  { %v4691_v50 = vpop.eup %4690  ;;  %v593_v16 = vadd.f32 0.5, %v577_v13  ;;  %v578_v56 = vmul.f32 0.5, %v4689_v21  ;;  %4710 = vtanh.f32 %v558_v46  ;;  %4318 = vmatprep.subr.bf16.mxu1 %v4317_v47 }
 0x212   :  { %v4693_v51 = vpop.eup %4692  ;;  %v595_v57 = vadd.f32 0.5, %v579_v49  ;;  %v581_v58 = vmul.f32 0.5, %v4691_v50  ;;  %4712 = vtanh.f32 %v559_v9 }
 0x213   :  { %v4695_v60 = vpop.eup %4694  ;;  %v609_v61 = vmul.f32 %v593_v16, %v5201_v52  ;;  %v594_v63 = vadd.f32 0.5, %v578_v56  ;;  %v580_v0 = vmul.f32 0.5, %v4693_v51  ;;  %4714 = vtanh.f32 %v560_v20 }
 0x214   :  { %v4697_v17 = vpop.eup %4696  ;;  %v611_v1 = vmul.f32 %v595_v57, %v5203_v53  ;;  %v597_v4 = vadd.f32 0.5, %v581_v58  ;;  %v583_v18 = vmul.f32 0.5, %v4695_v60  ;;  %4320 = vmatpush3.bf16.msra.mxu1 %v4317_v47 }
 0x215   :  { %v4699_v10 = vpop.eup %4698  ;;  %625 = vst.msk [vmem:[#allocation2 + $0x11] sm:$0xff] %vm61_vm1, %v609_v61  ;;  %v610_v15 = vmul.f32 %v594_v63, %v5205_v54  ;;  %v596_v19 = vadd.f32 0.5, %v580_v0  ;;  %v582_v28 = vmul.f32 0.5, %v4697_v17 }
 0x216   :  { %v4701_v22 = vpop.eup %4700  ;;  %627 = vst.msk [vmem:[#allocation2 + $0x31] sm:$0xff] %vm61_vm1, %v611_v1  ;;  %v613_v52 = vmul.f32 %v597_v4, %v5207_v55  ;;  %v599_v23 = vadd.f32 0.5, %v583_v18  ;;  %v584_v24 = vmul.f32 0.5, %v4699_v10 }
 0x217   :  { %v4703_v29 = vpop.eup %4702  ;;  %626 = vst.msk [vmem:[#allocation2 + $0x21] sm:$0xff] %vm61_vm1, %v610_v15  ;;  %v612_v53 = vmul.f32 %v596_v19, %v5209_v26  ;;  %v598_v30 = vadd.f32 0.5, %v582_v28  ;;  %v585_v34 = vmul.f32 0.5, %v4701_v22  ;;  %v3773_v15 = vld [vmem:[%s7056_s4 + $0x60] sm:$0xff]  ;;  %v3774_v19 = vld [vmem:[%s7056_s4 + $0x68] sm:$0xff] }
 0x218   :  { %v4705_v32 = vpop.eup %4704  ;;  %629 = vst.msk [vmem:[#allocation2 + $0x51] sm:$0xff] %vm61_vm1, %v613_v52  ;;  %v615_v54 = vmul.f32 %v599_v23, %v5211_v27  ;;  %v600_v35 = vadd.f32 0.5, %v584_v24  ;;  %v586_v36 = vmul.f32 0.5, %v4703_v29  ;;  %v4321_v28 = vpack.c.bf16 %v3774_v19, %v3773_v15  ;;  %v3801_v19 = vld [vmem:[%s7056_s4 + $0xc0] sm:$0xff] }
 0x219   :  { %v4707_v37 = vpop.eup %4706  ;;  %628 = vst.msk [vmem:[#allocation2 + $0x41] sm:$0xff] %vm61_vm1, %v612_v53  ;;  %v614_v55 = vmul.f32 %v598_v30, %v5218_v59  ;;  %v601_v40 = vadd.f32 0.5, %v585_v34  ;;  %v587_v41 = vmul.f32 0.5, %v4705_v32 }
 0x21a   :  { %v4709_v42 = vpop.eup %4708  ;;  %631 = vst.msk [vmem:[#allocation2 + $0x71] sm:$0xff] %vm61_vm1, %v615_v54  ;;  %v616_v26 = vmul.f32 %v600_v35, %v5221_v62  ;;  %v602_v44 = vadd.f32 0.5, %v586_v36  ;;  %v588_v45 = vmul.f32 0.5, %v4707_v37  ;;  %4322 = vmatprep.subr.bf16.mxu1 %v4321_v28  ;;  %v5409_v35 = vpop.permute.xlu0 %722 }
 0x21b   :  { %v4711_v46 = vpop.eup %4710  ;;  %630 = vst.msk [vmem:[#allocation2 + $0x61] sm:$0xff] %vm61_vm1, %v614_v55  ;;  %v617_v27 = vmul.f32 %v601_v40, %v5234_v5  ;;  %v603_v38 = vadd.f32 0.5, %v587_v41  ;;  %v589_v8 = vmul.f32 0.5, %v4709_v42  ;;  %v5411_v36 = vpop.permute.xlu1 %1587 }
 0x21c   :  { %v4713_v33 = vpop.eup %4712  ;;  %v675_v9 = vld [vmem:[#allocation2 + $0x12] sm:$0xff]  ;;  %632 = vst.msk [vmem:[#allocation2 + $0x81] sm:$0xff] %vm61_vm1, %v616_v26  ;;  %v618_v59 = vmul.f32 %v602_v44, %v5240_v11  ;;  %v604_v48 = vadd.f32 0.5, %v588_v45  ;;  %v590_v13 = vmul.f32 0.5, %v4711_v46 }
 0x21d   :  { %v659_v47 = vld [vmem:[#allocation2 + $0x11] sm:$0xff]  ;;  %v4715_v20 = vpop.eup %4714  ;;  %772 = vrot.lane.b32.xlu1 %v675_v9, %s4794_s16  ;;  %633 = vst.msk [vmem:[#allocation2 + $0xb1] sm:$0xff] %vm61_vm1, %v617_v27  ;;  %v619_v62 = vmul.f32 %v603_v38, %v5243_v14  ;;  %v605_v5 = vadd.f32 0.5, %v589_v8  ;;  %v591_v21 = vmul.f32 0.5, %v4713_v33 }
 0x21e   :  { %708 = vrot.lane.b32.xlu0 %v659_v47, %s4793_s2  ;;  %634 = vst.msk [vmem:[#allocation2 + $0xc1] sm:$0xff] %vm61_vm1, %v618_v59  ;;  %v620_v49 = vmul.f32 %v604_v48, %v5256_v25  ;;  %v606_v50 = vadd.f32 0.5, %v590_v13  ;;  %v592_v16 = vmul.f32 0.5, %v4715_v20  ;;  %v661_v51 = vld [vmem:[#allocation2 + $0x31] sm:$0xff]  ;;  %v660_v57 = vld [vmem:[#allocation2 + $0x21] sm:$0xff]  ;;  %v5425_v40 = vpop.permute.xlu0 %786 }
 0x21f   :  { %635 = vst.msk [vmem:[#allocation2 + $0xd1] sm:$0xff] %vm61_vm1, %v619_v62  ;;  %v621_v11 = vmul.f32 %v605_v5, %v5262_v31  ;;  %v607_v56 = vadd.f32 0.5, %v591_v21  ;;  %v677_v60 = vld [vmem:[#allocation2 + $0x32] sm:$0xff]  ;;  %v676_v61 = vld [vmem:[#allocation2 + $0x22] sm:$0xff]  ;;  %v5427_v41 = vpop.permute.xlu1 %1651 }
 0x220   :  { %636 = vst.msk [vmem:[#allocation2 + $0xe1] sm:$0xff] %vm61_vm1, %v620_v49  ;;  %v622_v58 = vmul.f32 %v606_v50, %v5274_v39  ;;  %v608_v14 = vadd.f32 0.5, %v592_v16  ;;  %v663_v39 = vld [vmem:[#allocation2 + $0x51] sm:$0xff]  ;;  %v662_v63 = vld [vmem:[#allocation2 + $0x41] sm:$0xff] }
 0x221   :  { %712 = vrot.lane.b32.xlu1 %v661_v51, %s4793_s2  ;;  %637 = vst.msk [vmem:[#allocation2 + $0xf1] sm:$0xff] %vm61_vm1, %v621_v11  ;;  %v623_v25 = vmul.f32 %v607_v56, %v5283_v7  ;;  %v679_v7 = vld [vmem:[#allocation2 + $0x52] sm:$0xff]  ;;  %v678_v0 = vld [vmem:[#allocation2 + $0x42] sm:$0xff] }
 0x222   :  { %710 = vrot.lane.b32.xlu0 %v660_v57, %s4793_s2  ;;  %638 = vst.msk [vmem:[#allocation2 + $0x101] sm:$0xff] %vm61_vm1, %v622_v58  ;;  %v624_v31 = vmul.f32 %v608_v14, %v5293_v43  ;;  %v665_v43 = vld [vmem:[#allocation2 + $0x71] sm:$0xff]  ;;  %v664_v17 = vld [vmem:[#allocation2 + $0x61] sm:$0xff] }
 0x223   :  { %639 = vst.msk [vmem:[#allocation2 + $0x111] sm:$0xff] %vm61_vm1, %v623_v25  ;;  %v681_v1 = vld [vmem:[#allocation2 + $0x72] sm:$0xff]  ;;  %v680_v4 = vld [vmem:[#allocation2 + $0x62] sm:$0xff] }
 0x224   :  { %640 = vst.msk [vmem:[#allocation2 + $0x121] sm:$0xff] %vm61_vm1, %v624_v31  ;;  %v1101_v18 = vld [vmem:[#allocation2 + $0x81] sm:$0xff]  ;;  %v667_v22 = vld [vmem:[#allocation2 + $0xb1] sm:$0xff] }
 0x225   :  { %776 = vrot.lane.b32.xlu1 %v677_v60, %s4794_s16  ;;  %v1117_v10 = vld [vmem:[#allocation2 + $0x82] sm:$0xff]  ;;  %v683_v52 = vld [vmem:[#allocation2 + $0xb2] sm:$0xff] }
 0x226   :  { %774 = vrot.lane.b32.xlu0 %v676_v61, %s4794_s16  ;;  %v5381_v23 = vld [vmem:[#allocation2 + $0xc1] sm:$0xff]  ;;  %v5383_v24 = vld [vmem:[#allocation2 + $0xd1] sm:$0xff] }
 0x227   :  { %v5389_v29 = vld [vmem:[#allocation2 + $0xc2] sm:$0xff]  ;;  %v5391_v53 = vld [vmem:[#allocation2 + $0xd2] sm:$0xff] }
 0x228   :  { %v5397_v30 = vld [vmem:[#allocation2 + $0xe1] sm:$0xff]  ;;  %v5399_v34 = vld [vmem:[#allocation2 + $0xf1] sm:$0xff] }
 0x229   :  { %716 = vrot.lane.b32.xlu1 %v663_v39, %s4793_s2  ;;  %v5405_v32 = vld [vmem:[#allocation2 + $0xe2] sm:$0xff]  ;;  %v5407_v54 = vld [vmem:[#allocation2 + $0xf2] sm:$0xff] }
 0x22a   :  { %714 = vrot.lane.b32.xlu0 %v662_v63, %s4793_s2  ;;  %v5417_v37 = vld [vmem:[#allocation2 + $0x101] sm:$0xff]  ;;  %v5419_v55 = vld [vmem:[#allocation2 + $0x111] sm:$0xff] }
 0x22b   :  { %v5429_v42 = vld [vmem:[#allocation2 + $0x102] sm:$0xff]  ;;  %v5431_v26 = vld [vmem:[#allocation2 + $0x112] sm:$0xff] }
 0x22c   :  { %v3775_v44 = vld [vmem:[%s7056_s4 + $0x70] sm:$0xff]  ;;  %v3776_v45 = vld [vmem:[%s7056_s4 + $0x78] sm:$0xff]  ;;  %v3778_v59 = vld [vmem:[%s7056_s4 + $0x88] sm:$0xff] }
 0x22d   :  { %780 = vrot.lane.b32.xlu1 %v679_v7, %s4794_s16  ;;  %v5443_v38 = vld [vmem:[#allocation2 + $0x10] sm:$0xff]  ;;  %v4325_v33 = vpack.c.bf16 %v3776_v45, %v3775_v44  ;;  %v3780_v5 = vld [vmem:[%s7056_s4 + $0x98] sm:$0xff]  ;;  %v5469_v49 = vld [vmem:[#allocation2 + $0x20] sm:$0xff] }
 0x22e   :  { %778 = vrot.lane.b32.xlu0 %v678_v0, %s4794_s16  ;;  %v3779_v62 = vld [vmem:[%s7056_s4 + $0x90] sm:$0xff]  ;;  %v3781_v14 = vld [vmem:[%s7056_s4 + $0xa0] sm:$0xff]  ;;  %v3782_v25 = vld [vmem:[%s7056_s4 + $0xa8] sm:$0xff] }
 0x22f   :  { %v5467_v21 = vld [vmem:[#allocation2 + $0x30] sm:$0xff]  ;;  %v4333_v58 = vpack.c.bf16 %v3780_v5, %v3779_v62  ;;  %v650_v44 = vld [vmem:[#allocation2 + $0xa0] sm:$0xff] }
 0x231   :  { %720 = vrot.lane.b32.xlu1 %v665_v43, %s4793_s2 }
 0x232   :  { %718 = vrot.lane.b32.xlu0 %v664_v17, %s4793_s2 }
 0x235   :  { %784 = vrot.lane.b32.xlu1 %v681_v1, %s4794_s16 }
 0x236   :  { %782 = vrot.lane.b32.xlu0 %v680_v4, %s4794_s16 }
 0x239   :  { %1144 = vrot.lane.b32.xlu1 %v660_v57, %s4793_s2 }
 0x23a   :  { %1142 = vrot.lane.b32.xlu0 %v659_v47, %s4793_s2  ;;  %v3777_v47 = vld [vmem:[%s7056_s4 + $0x80] sm:$0xff] }
 0x23b   :  { %v4329_v20 = vpack.c.bf16 %v3778_v59, %v3777_v47 }
 0x23d   :  { %1208 = vrot.lane.b32.xlu1 %v676_v61, %s4794_s16 }
 0x23e   :  { %1206 = vrot.lane.b32.xlu0 %v675_v9, %s4794_s16 }
 0x241   :  { %1148 = vrot.lane.b32.xlu1 %v662_v63, %s4793_s2 }
 0x242   :  { %1146 = vrot.lane.b32.xlu0 %v661_v51, %s4793_s2 }
 0x245   :  { %1212 = vrot.lane.b32.xlu1 %v678_v0, %s4794_s16 }
 0x246   :  { %1210 = vrot.lane.b32.xlu0 %v677_v60, %s4794_s16 }
 0x249   :  { %1152 = vrot.lane.b32.xlu1 %v664_v17, %s4793_s2 }
 0x24a   :  { %1150 = vrot.lane.b32.xlu0 %v663_v39, %s4793_s2 }
 0x24d   :  { %1216 = vrot.lane.b32.xlu1 %v680_v4, %s4794_s16 }
 0x24e   :  { %1214 = vrot.lane.b32.xlu0 %v679_v7, %s4794_s16 }
 0x251   :  { %1156 = vrot.lane.b32.xlu1 %v1101_v18, %s4793_s2 }
 0x252   :  { %1154 = vrot.lane.b32.xlu0 %v665_v43, %s4793_s2 }
 0x255   :  { %1220 = vrot.lane.b32.xlu1 %v1117_v10, %s4794_s16 }
 0x256   :  { %1218 = vrot.lane.b32.xlu0 %v681_v1, %s4794_s16 }
 0x259   :  { %1575 = vrot.lane.b32.xlu1 %v661_v51, %s4793_s2 }
 0x25a   :  { %1573 = vrot.lane.b32.xlu0 %v660_v57, %s4793_s2 }
 0x25d   :  { %1639 = vrot.lane.b32.xlu1 %v677_v60, %s4794_s16 }
 0x25e   :  { %1637 = vrot.lane.b32.xlu0 %v676_v61, %s4794_s16  ;;  %v4337_v61 = vpack.c.bf16 %v3782_v25, %v3781_v14 }
 0x261   :  { %1579 = vrot.lane.b32.xlu1 %v663_v39, %s4793_s2  ;;  %v3783_v39 = vld [vmem:[%s7056_s4 + $0xb0] sm:$0xff] }
 0x262   :  { %1577 = vrot.lane.b32.xlu0 %v662_v63, %s4793_s2  ;;  %v3784_v63 = vld [vmem:[%s7056_s4 + $0xb8] sm:$0xff] }
 0x263   :  { %v4341_v15 = vpack.c.bf16 %v3784_v63, %v3783_v39 }
 0x265   :  { %1643 = vrot.lane.b32.xlu1 %v679_v7, %s4794_s16  ;;  %v5497_v7 = vld [vmem:[#allocation2 + $0x50] sm:$0xff] }
 0x266   :  { %1641 = vrot.lane.b32.xlu0 %v678_v0, %s4794_s16  ;;  %v5499_v0 = vld [vmem:[#allocation2 + $0x40] sm:$0xff] }
 0x269   :  { %1583 = vrot.lane.b32.xlu1 %v665_v43, %s4793_s2 }
 0x26a   :  { %1581 = vrot.lane.b32.xlu0 %v664_v17, %s4793_s2 }
 0x26d   :  { %1647 = vrot.lane.b32.xlu1 %v681_v1, %s4794_s16 }
 0x26e   :  { %1645 = vrot.lane.b32.xlu0 %v680_v4, %s4794_s16 }
 0x271   :  { %724 = vrot.lane.b32.xlu1 %v667_v22, %s4793_s2 }
 0x272   :  { %1585 = vrot.lane.b32.xlu0 %v1101_v18, %s4793_s2 }
 0x275   :  { %788 = vrot.lane.b32.xlu1 %v683_v52, %s4794_s16 }
 0x276   :  { %1649 = vrot.lane.b32.xlu0 %v1117_v10, %s4794_s16 }
 0x279   :  { %728 = vrot.lane.b32.xlu1 %v5383_v24, %s4793_s2 }
 0x27a   :  { %726 = vrot.lane.b32.xlu0 %v5381_v23, %s4793_s2 }
 0x27d   :  { %792 = vrot.lane.b32.xlu1 %v5391_v53, %s4794_s16 }
 0x27e   :  { %790 = vrot.lane.b32.xlu0 %v5389_v29, %s4794_s16 }
 0x281   :  { %732 = vrot.lane.b32.xlu1 %v5399_v34, %s4793_s2 }
 0x282   :  { %730 = vrot.lane.b32.xlu0 %v5397_v30, %s4793_s2 }
 0x285   :  { %796 = vrot.lane.b32.xlu1 %v5407_v54, %s4794_s16 }
 0x286   :  { %794 = vrot.lane.b32.xlu0 %v5405_v32, %s4794_s16 }
 0x289   :  { %736 = vrot.lane.b32.xlu1 %v5419_v55, %s4793_s2 }
 0x28a   :  { %734 = vrot.lane.b32.xlu0 %v5417_v37, %s4793_s2 }
 0x28d   :  { %800 = vrot.lane.b32.xlu1 %v5431_v26, %s4794_s16 }
 0x28e   :  { %798 = vrot.lane.b32.xlu0 %v5429_v42, %s4794_s16 }
 0x28f   :  { %v773_v46 = vpop.permute.xlu1 %772 }
 0x290   :  { %v709_v27 = vpop.permute.xlu0 %708 }
 0x291   :  { %v819_v8 = vsel %vm61_vm1, %v5443_v38, %v709_v27  ;;  %1160 = vrot.lane.b32.xlu1 %v5381_v23, %s4793_s2  ;;  %v5527_v27 = vld [vmem:[#allocation2 + $0x60] sm:$0xff] }
 0x292   :  { %v835_v9 = vsel %vm106_vm8, %v819_v8, %v773_v46  ;;  %1158 = vrot.lane.b32.xlu0 %v667_v22, %s4793_s2  ;;  %v5525_v46 = vld [vmem:[#allocation2 + $0x70] sm:$0xff]  ;;  %v826_v8 = vsel %vm61_vm1, %v650_v44, %v5409_v35  ;;  %v1109_v35 = vld [vmem:[#allocation2 + $0x121] sm:$0xff] }
 0x293   :  { %4111 = vmatmul.mubr.msk.f32.vlgmr.msra.gmra.mrb[2].mxu1 %vm862_vm9, %v835_v9  ;;  %v713_v48 = vpop.permute.xlu1 %712 }
 0x294   :  { %v711_v13 = vpop.permute.xlu0 %710  ;;  %4324 = vmatpush3.bf16.msra.mxu1 %v4321_v28  ;;  %v821_v50 = vsel %vm61_vm1, %v5467_v21, %v713_v48  ;;  %v3802_v28 = vld [vmem:[%s7056_s4 + $0xc8] sm:$0xff] }
 0x295   :  { %4326 = vmatprep.subr.bf16.mxu1 %v4325_v33  ;;  %1224 = vrot.lane.b32.xlu1 %v5389_v29, %s4794_s16  ;;  %v820_v16 = vsel %vm61_vm1, %v5469_v49, %v711_v13  ;;  %v5521_v45 = vpack.c.bf16 %v3802_v28, %v3801_v19 }
 0x296   :  { %1222 = vrot.lane.b32.xlu0 %v683_v52, %s4794_s16 }
 0x297   :  { %v777_v11 = vpop.permute.xlu1 %776 }
 0x298   :  { %v775_v56 = vpop.permute.xlu0 %774  ;;  %4328 = vmatpush3.bf16.msra.mxu1 %v4325_v33  ;;  %v837_v51 = vsel %vm106_vm8, %v821_v50, %v777_v11  ;;  %v1125_v50 = vld [vmem:[#allocation2 + $0x122] sm:$0xff] }
 0x299   :  { %v836_v57 = vsel %vm106_vm8, %v820_v16, %v775_v56  ;;  %4330 = vmatprep.subr.bf16.mxu1 %v4329_v20  ;;  %1164 = vrot.lane.b32.xlu1 %v5397_v30, %s4793_s2 }
 0x29a   :  { %4113 = vmatprep.mubr.msk.f32.mxu1 %vm862_vm9, %v836_v57  ;;  %1162 = vrot.lane.b32.xlu0 %v5383_v24, %s4793_s2 }
 0x29b   :  { %4114 = vmatmul.mubr.msk.f32.gmra.mrb[4].mxu1 %vm862_vm9, %v837_v51  ;;  %v717_v31 = vpop.permute.xlu1 %716 }
 0x29c   :  { %v715_v60 = vpop.permute.xlu0 %714  ;;  %4332 = vmatpush3.bf16.msra.mxu1 %v4329_v20  ;;  %v823_v43 = vsel %vm61_vm1, %v5497_v7, %v717_v31  ;;  %v842_v20 = vsel %vm106_vm8, %v826_v8, %v5425_v40  ;;  %v1540_v40 = vld [vmem:[#allocation2 + $0x131] sm:$0xff] }
 0x29d   :  { %4334 = vmatprep.subr.bf16.mxu1 %v4333_v58  ;;  %1228 = vrot.lane.b32.xlu1 %v5405_v32, %s4794_s16  ;;  %v822_v17 = vsel %vm61_vm1, %v5499_v0, %v715_v60 }
 0x29e   :  { %1226 = vrot.lane.b32.xlu0 %v5391_v53, %s4794_s16 }
 0x29f   :  { %v781_v1 = vpop.permute.xlu1 %780 }
 0x2a0   :  { %v779_v4 = vpop.permute.xlu0 %778  ;;  %4336 = vmatpush3.bf16.msra.mxu1 %v4333_v58  ;;  %v839_v18 = vsel %vm106_vm8, %v823_v43, %v781_v1  ;;  %v1556_v1 = vld [vmem:[#allocation2 + $0x132] sm:$0xff] }
 0x2a1   :  { %v838_v10 = vsel %vm106_vm8, %v822_v17, %v779_v4  ;;  %4338 = vmatprep.subr.bf16.mxu1 %v4337_v61  ;;  %1168 = vrot.lane.b32.xlu1 %v5417_v37, %s4793_s2 }
 0x2a2   :  { %4116 = vmatprep.mubr.msk.f32.mxu1 %vm862_vm9, %v838_v10  ;;  %1166 = vrot.lane.b32.xlu0 %v5399_v34, %s4793_s2 }
 0x2a3   :  { %4117 = vmatmul.mubr.msk.f32.gmra.mrb[6].mxu1 %vm862_vm9, %v839_v18  ;;  %v721_v22 = vpop.permute.xlu1 %720 }
 0x2a4   :  { %v719_v52 = vpop.permute.xlu0 %718  ;;  %4340 = vmatpush3.bf16.msra.mxu1 %v4337_v61  ;;  %v825_v33 = vsel %vm61_vm1, %v5525_v46, %v721_v22  ;;  %v1085_v61 = vld [vmem:[#allocation2 + $0x80] sm:$0xff] }
 0x2a5   :  { %4342 = vmatprep.subr.bf16.mxu1 %v4341_v15  ;;  %1232 = vrot.lane.b32.xlu1 %v5429_v42, %s4794_s16  ;;  %v824_v9 = vsel %vm61_vm1, %v5527_v27, %v719_v52 }
 0x2a6   :  { %1230 = vrot.lane.b32.xlu0 %v5407_v54, %s4794_s16 }
 0x2a7   :  { %v785_v47 = vpop.permute.xlu1 %784 }
 0x2a8   :  { %v783_v59 = vpop.permute.xlu0 %782  ;;  %4344 = vmatpush3.bf16.msra.mxu1 %v4341_v15  ;;  %v841_v48 = vsel %vm106_vm8, %v825_v33, %v785_v47 }
 0x2a9   :  { %v840_v13 = vsel %vm106_vm8, %v824_v9, %v783_v59  ;;  %4346 = vmatprep.subr.bf16.mxu1 %v5521_v45  ;;  %1172 = vrot.lane.b32.xlu1 %v1109_v35, %s4793_s2 }
 0x2aa   :  { %4119 = vmatprep.mubr.msk.f32.mxu1 %vm862_vm9, %v840_v13  ;;  %1170 = vrot.lane.b32.xlu0 %v5419_v55, %s4793_s2 }
 0x2ab   :  { %4120 = vmatmul.mubr.msk.f32.gmra.mrb[8].mxu1 %vm862_vm9, %v841_v48  ;;  %v5547_v62 = vpop.permute.xlu1 %1144 }
 0x2ac   :  { %v5549_v5 = vpop.permute.xlu0 %1142  ;;  %4122 = vmatprep.mubr.msk.f32.mxu1 %vm862_vm9, %v842_v20 }
 0x2ad   :  { %1236 = vrot.lane.b32.xlu1 %v1125_v50, %s4794_s16 }
 0x2ae   :  { %1234 = vrot.lane.b32.xlu0 %v5431_v26, %s4794_s16 }
 0x2af   :  { %v5555_v16 = vpop.permute.xlu1 %1208 }
 0x2b0   :  { %v5557_v11 = vpop.permute.xlu0 %1206 }
 0x2b1   :  { %1603 = vrot.lane.b32.xlu1 %v1540_v40, %s4793_s2 }
 0x2b2   :  { %1589 = vrot.lane.b32.xlu0 %v5381_v23, %s4793_s2 }
 0x2b3   :  { %v5562_v56 = vpop.permute.xlu1 %1148 }
 0x2b4   :  { %v5564_v51 = vpop.permute.xlu0 %1146 }
 0x2b5   :  { %1591 = vrot.lane.b32.xlu1 %v5383_v24, %s4793_s2 }
 0x2b6   :  { %1653 = vrot.lane.b32.xlu0 %v5389_v29, %s4794_s16 }
 0x2b7   :  { %v5570_v57 = vpop.permute.xlu1 %1212 }
 0x2b8   :  { %v5572_v58 = vpop.permute.xlu0 %1210 }
 0x2b9   :  { %1655 = vrot.lane.b32.xlu1 %v5391_v53, %s4794_s16 }
 0x2ba   :  { %1593 = vrot.lane.b32.xlu0 %v5397_v30, %s4793_s2 }
 0x2bb   :  { %v1153_v23 = vpop.permute.xlu1 %1152 }
 0x2bc   :  { %v1151_v14 = vpop.permute.xlu0 %1150  ;;  %v1259_v25 = vsel %vm61_vm1, %v5527_v27, %v1153_v23 }
 0x2bd   :  { %1595 = vrot.lane.b32.xlu1 %v5399_v34, %s4793_s2  ;;  %v1258_v24 = vsel %vm61_vm1, %v5497_v7, %v1151_v14  ;;  %v5644_v14 = vld [vmem:[#allocation2 + $0xb0] sm:$0xff] }
 0x2be   :  { %1657 = vrot.lane.b32.xlu0 %v5405_v32, %s4794_s16 }
 0x2bf   :  { %v1217_v29 = vpop.permute.xlu1 %1216 }
 0x2c0   :  { %v1215_v31 = vpop.permute.xlu0 %1214  ;;  %v5587_v30 = vsel %vm106_vm8, %v1259_v25, %v1217_v29 }
 0x2c1   :  { %v5590_v53 = vsel %vm106_vm8, %v1258_v24, %v1215_v31  ;;  %1659 = vrot.lane.b32.xlu1 %v5407_v54, %s4794_s16 }
 0x2c2   :  { %1597 = vrot.lane.b32.xlu0 %v5417_v37, %s4793_s2 }
 0x2c3   :  { %v1157_v32 = vpop.permute.xlu1 %1156 }
 0x2c4   :  { %v1155_v60 = vpop.permute.xlu0 %1154  ;;  %v1261_v39 = vsel %vm61_vm1, %v1085_v61, %v1157_v32 }
 0x2c5   :  { %v1260_v34 = vsel %vm61_vm1, %v5525_v46, %v1155_v60  ;;  %1599 = vrot.lane.b32.xlu1 %v5419_v55, %s4793_s2 }
 0x2c6   :  { %1661 = vrot.lane.b32.xlu0 %v5429_v42, %s4794_s16 }
 0x2c7   :  { %v1221_v63 = vpop.permute.xlu1 %1220 }
 0x2c8   :  { %v1219_v43 = vpop.permute.xlu0 %1218  ;;  %v5604_v37 = vsel %vm106_vm8, %v1261_v39, %v1221_v63  ;;  %v5656_v39 = vld [vmem:[#allocation2 + $0xd0] sm:$0xff] }
 0x2c9   :  { %v5607_v54 = vsel %vm106_vm8, %v1260_v34, %v1219_v43  ;;  %1663 = vrot.lane.b32.xlu1 %v5431_v26, %s4794_s16  ;;  %v5654_v34 = vld [vmem:[#allocation2 + $0xc0] sm:$0xff] }
 0x2ca   :  { %1601 = vrot.lane.b32.xlu0 %v1109_v35, %s4793_s2 }
 0x2cb   :  { %v1576_v42 = vpop.permute.xlu1 %1575 }
 0x2cc   :  { %v1574_v17 = vpop.permute.xlu0 %1573  ;;  %v1686_v55 = vsel %vm61_vm1, %v5467_v21, %v1576_v42 }
 0x2cd   :  { %v1685_v4 = vsel %vm61_vm1, %v5469_v49, %v1574_v17  ;;  %1667 = vrot.lane.b32.xlu1 %v1556_v1, %s4794_s16 }
 0x2ce   :  { %1665 = vrot.lane.b32.xlu0 %v1125_v50, %s4794_s16 }
 0x2cf   :  { %v1640_v18 = vpop.permute.xlu1 %1639 }
 0x2d0   :  { %v1638_v10 = vpop.permute.xlu0 %1637  ;;  %v5619_v15 = vsel %vm106_vm8, %v1686_v55, %v1640_v18  ;;  %v5666_v18 = vld [vmem:[#allocation2 + $0xe0] sm:$0xff] }
 0x2d1   :  { %v5622_v26 = vsel %vm106_vm8, %v1685_v4, %v1638_v10  ;;  %v5668_v10 = vld [vmem:[#allocation2 + $0xf0] sm:$0xff] }
 0x2d3   :  { %v1580_v19 = vpop.permute.xlu1 %1579 }
 0x2d4   :  { %v1578_v28 = vpop.permute.xlu0 %1577  ;;  %v1688_v22 = vsel %vm61_vm1, %v5497_v7, %v1580_v19 }
 0x2d5   :  { %v1687_v52 = vsel %vm61_vm1, %v5499_v0, %v1578_v28 }
 0x2d7   :  { %v1644_v44 = vpop.permute.xlu1 %1643 }
 0x2d8   :  { %v1642_v8 = vpop.permute.xlu0 %1641  ;;  %v5629_v33 = vsel %vm106_vm8, %v1688_v22, %v1644_v44 }
 0x2d9   :  { %v5632_v9 = vsel %vm106_vm8, %v1687_v52, %v1642_v8 }
 0x2db   :  { %v1584_v47 = vpop.permute.xlu1 %1583 }
 0x2dc   :  { %v1582_v59 = vpop.permute.xlu0 %1581  ;;  %v1690_v48 = vsel %vm61_vm1, %v5525_v46, %v1584_v47 }
 0x2dd   :  { %v1689_v13 = vsel %vm61_vm1, %v5527_v27, %v1582_v59 }
 0x2df   :  { %v1648_v7 = vpop.permute.xlu1 %1647 }
 0x2e0   :  { %v1646_v35 = vpop.permute.xlu0 %1645  ;;  %v5639_v20 = vsel %vm106_vm8, %v1690_v48, %v1648_v7  ;;  %v5678_v48 = vld [vmem:[#allocation2 + $0x100] sm:$0xff] }
 0x2e1   :  { %v5642_v50 = vsel %vm106_vm8, %v1689_v13, %v1646_v35  ;;  %v5680_v13 = vld [vmem:[#allocation2 + $0x110] sm:$0xff] }
 0x2e3   :  { %v725_v23 = vpop.permute.xlu1 %724 }
 0x2e4   :  { %v1586_v40 = vpop.permute.xlu0 %1585  ;;  %v827_v46 = vsel %vm61_vm1, %v5644_v14, %v725_v23 }
 0x2e5   :  { %v1691_v25 = vsel %vm61_vm1, %v1085_v61, %v1586_v40 }
 0x2e7   :  { %v789_v29 = vpop.permute.xlu1 %788 }
 0x2e8   :  { %v1650_v24 = vpop.permute.xlu0 %1649  ;;  %v843_v31 = vsel %vm106_vm8, %v827_v46, %v789_v29  ;;  %v3803_v29 = vld [vmem:[%s7056_s4 + $0xd0] sm:$0xff] }
 0x2e9   :  { %v5650_v27 = vsel %vm106_vm8, %v1691_v25, %v1650_v24  ;;  %4123 = vmatmul.mubr.msk.f32.gmra.mrb[10].mxu1 %vm862_vm9, %v843_v31  ;;  %v1254_v24 = vsel %vm61_vm1, %v5443_v38, %v5549_v5  ;;  %v3804_v31 = vld [vmem:[%s7056_s4 + $0xd8] sm:$0xff]  ;;  %v1255_v38 = vsel %vm61_vm1, %v5469_v49, %v5547_v62 }
 0x2ea   :  { %v4349_v5 = vpack.c.bf16 %v3804_v31, %v3803_v29 }
 0x2eb   :  { %v729_v60 = vpop.permute.xlu1 %728 }
 0x2ec   :  { %v727_v32 = vpop.permute.xlu0 %726  ;;  %v829_v63 = vsel %vm61_vm1, %v5656_v39, %v729_v60 }
 0x2ed   :  { %v828_v61 = vsel %vm61_vm1, %v5654_v34, %v727_v32  ;;  %v1270_v32 = vsel %vm106_vm8, %v1254_v24, %v5557_v11  ;;  %v3805_v11 = vld [vmem:[%s7056_s4 + $0xe0] sm:$0xff] }
 0x2ef   :  { %v793_v42 = vpop.permute.xlu1 %792 }
 0x2f0   :  { %v791_v43 = vpop.permute.xlu0 %790  ;;  %v845_v1 = vsel %vm106_vm8, %v829_v63, %v793_v42  ;;  %v1271_v63 = vsel %vm106_vm8, %v1255_v38, %v5555_v16  ;;  %v3806_v42 = vld [vmem:[%s7056_s4 + $0xe8] sm:$0xff] }
 0x2f1   :  { %v844_v17 = vsel %vm106_vm8, %v828_v61, %v791_v43  ;;  %v1256_v43 = vsel %vm61_vm1, %v5467_v21, %v5564_v51  ;;  %v1257_v21 = vsel %vm61_vm1, %v5499_v0, %v5562_v56  ;;  %v4353_v16 = vpack.c.bf16 %v3806_v42, %v3805_v11 }
 0x2f2   :  { %4125 = vmatprep.mubr.msk.f32.mxu1 %vm862_vm9, %v844_v17  ;;  %v1272_v17 = vsel %vm106_vm8, %v1256_v43, %v5572_v58  ;;  %v1273_v51 = vsel %vm106_vm8, %v1257_v21, %v5570_v57  ;;  %v3807_v58 = vld [vmem:[%s7056_s4 + $0xf0] sm:$0xff]  ;;  %v3809_v57 = vld [vmem:[%s7056_s4 + $0x100] sm:$0xff] }
 0x2f3   :  { %4126 = vmatmul.mubr.msk.f32.gmra.mrb[12].mxu1 %vm862_vm9, %v845_v1  ;;  %v733_v4 = vpop.permute.xlu1 %732  ;;  %v1516_v21 = vld [vmem:[#allocation2 + $0x90] sm:$0xff] }
 0x2f4   :  { %v731_v55 = vpop.permute.xlu0 %730  ;;  %v831_v28 = vsel %vm61_vm1, %v5668_v10, %v733_v4 }
 0x2f5   :  { %v830_v19 = vsel %vm61_vm1, %v5666_v18, %v731_v55  ;;  %v3810_v55 = vld [vmem:[%s7056_s4 + $0x108] sm:$0xff] }
 0x2f7   :  { %v797_v52 = vpop.permute.xlu1 %796 }
 0x2f8   :  { %v795_v22 = vpop.permute.xlu0 %794  ;;  %v847_v8 = vsel %vm106_vm8, %v831_v28, %v797_v52  ;;  %v3812_v52 = vld [vmem:[%s7056_s4 + $0x118] sm:$0xff] }
 0x2f9   :  { %v846_v44 = vsel %vm106_vm8, %v830_v19, %v795_v22  ;;  %v4361_v19 = vpack.c.bf16 %v3810_v55, %v3809_v57  ;;  %v3811_v22 = vld [vmem:[%s7056_s4 + $0x110] sm:$0xff] }
 0x2fa   :  { %4128 = vmatprep.mubr.msk.f32.mxu1 %vm862_vm9, %v846_v44 }
 0x2fb   :  { %4129 = vmatmul.mubr.msk.f32.gmra.mrb[14].mxu1 %vm862_vm9, %v847_v8  ;;  %v737_v59 = vpop.permute.xlu1 %736  ;;  %v4365_v8 = vpack.c.bf16 %v3812_v52, %v3811_v22 }
 0x2fc   :  { %v735_v47 = vpop.permute.xlu0 %734  ;;  %v833_v35 = vsel %vm61_vm1, %v5680_v13, %v737_v59 }
 0x2fd   :  { %v832_v7 = vsel %vm61_vm1, %v5678_v48, %v735_v47 }
 0x2ff   :  { %v801_v23 = vpop.permute.xlu1 %800 }
 0x300   :  { %v799_v40 = vpop.permute.xlu0 %798  ;;  %v849_v46 = vsel %vm106_vm8, %v833_v35, %v801_v23 }
 0x301   :  { %v848_v25 = vsel %vm106_vm8, %v832_v7, %v799_v40 }
 0x302   :  { %4131 = vmatprep.mubr.msk.f32.mxu1 %vm862_vm9, %v848_v25 }
 0x303   :  { %4132 = vmatmul.mubr.msk.f32.gmra.mrb[16].mxu1 %vm862_vm9, %v849_v46  ;;  %v1161_v61 = vpop.permute.xlu1 %1160 }
 0x304   :  { %v1159_v60 = vpop.permute.xlu0 %1158  ;;  %4158 = vmatprep.mubr.msk.f32.mxu1 %vm862_vm9, %v1270_v32 }
 0x305   :  { %v1262_v28 = vsel %vm61_vm1, %v5644_v14, %v1159_v60  ;;  %v1263_v14 = vsel %vm61_vm1, %v5654_v34, %v1161_v61  ;;  %v1093_v61 = vld [vmem:[#allocation2 + $0x120] sm:$0xff] }
 0x307   :  { %4159 = vmatmul.mubr.msk.f32.vlgmr.msra.gmra.mrb[2].mxu1 %vm862_vm9, %v1271_v63  ;;  %v1225_v62 = vpop.permute.xlu1 %1224 }
 0x308   :  { %4348 = vmatpush3.bf16.msra.mxu1 %v5521_v45  ;;  %v1223_v49 = vpop.permute.xlu0 %1222  ;;  %4161 = vmatprep.mubr.msk.f32.mxu1 %vm862_vm9, %v1272_v17  ;;  %v3808_v45 = vld [vmem:[%s7056_s4 + $0xf8] sm:$0xff]  ;;  %v1279_v47 = vsel %vm106_vm8, %v1263_v14, %v1225_v62  ;;  %v1940_v14 = vld [vmem:[%s7058_s6 + $0x8] sm:$0xff] }
 0x309   :  { %4350 = vmatprep.subr.bf16.mxu1 %v4349_v5  ;;  %v4357_v56 = vpack.c.bf16 %v3808_v45, %v3807_v58 }
 0x30b   :  { %4162 = vmatmul.mubr.msk.f32.gmra.mrb[4].mxu1 %vm862_vm9, %v1273_v51  ;;  %v1165_v0 = vpop.permute.xlu1 %1164 }
 0x30c   :  { %v1163_v1 = vpop.permute.xlu0 %1162  ;;  %4164 = vmatprep.mubr.msk.f32.mxu1 %vm862_vm9, %v5590_v53  ;;  %4352 = vmatpush3.bf16.msra.mxu1 %v4349_v5  ;;  %v1265_v35 = vsel %vm61_vm1, %v5666_v18, %v1165_v0 }
 0x30d   :  { %4354 = vmatprep.subr.bf16.mxu1 %v4353_v16  ;;  %v1264_v59 = vsel %vm61_vm1, %v5656_v39, %v1163_v1 }
 0x30f   :  { %4165 = vmatmul.mubr.msk.f32.gmra.mrb[6].mxu1 %vm862_vm9, %v5587_v30  ;;  %v1229_v53 = vpop.permute.xlu1 %1228  ;;  %v1278_v30 = vsel %vm106_vm8, %v1262_v28, %v1223_v49 }
 0x310   :  { %v1227_v4 = vpop.permute.xlu0 %1226  ;;  %4167 = vmatprep.mubr.msk.f32.mxu1 %vm862_vm9, %v5607_v54  ;;  %4356 = vmatpush3.bf16.msra.mxu1 %v4353_v16  ;;  %v1281_v23 = vsel %vm106_vm8, %v1265_v35, %v1229_v53 }
 0x311   :  { %4358 = vmatprep.subr.bf16.mxu1 %v4357_v56  ;;  %v1280_v7 = vsel %vm106_vm8, %v1264_v59, %v1227_v4 }
 0x313   :  { %4168 = vmatmul.mubr.msk.f32.gmra.mrb[8].mxu1 %vm862_vm9, %v5604_v37  ;;  %v1169_v44 = vpop.permute.xlu1 %1168 }
 0x314   :  { %v1167_v54 = vpop.permute.xlu0 %1166  ;;  %4170 = vmatprep.mubr.msk.f32.mxu1 %vm862_vm9, %v1278_v30  ;;  %4360 = vmatpush3.bf16.msra.mxu1 %v4357_v56  ;;  %v1267_v29 = vsel %vm61_vm1, %v5678_v48, %v1169_v44  ;;  %v1941_v44 = vld [vmem:[%s7058_s6 + $0x10] sm:$0xff] }
 0x315   :  { %4362 = vmatprep.subr.bf16.mxu1 %v4361_v19  ;;  %v1266_v25 = vsel %vm61_vm1, %v5668_v10, %v1167_v54 }
 0x317   :  { %4171 = vmatmul.mubr.msk.f32.gmra.mrb[10].mxu1 %vm862_vm9, %v1279_v47  ;;  %v1233_v40 = vpop.permute.xlu1 %1232  ;;  %v1942_v47 = vld [vmem:[%s7058_s6 + $0x18] sm:$0xff] }
 0x318   :  { %v1231_v37 = vpop.permute.xlu0 %1230  ;;  %4173 = vmatprep.mubr.msk.f32.mxu1 %vm862_vm9, %v1280_v7  ;;  %4364 = vmatpush3.bf16.msra.mxu1 %v4361_v19  ;;  %v1283_v32 = vsel %vm106_vm8, %v1267_v29, %v1233_v40  ;;  %v1524_v19 = vld [vmem:[#allocation2 + $0x130] sm:$0xff]  ;;  %v4373_v59 = vpack.c.bf16 %v1942_v47, %v1941_v44  ;;  %v1943_v7 = vld [vmem:[%s7058_s6 + $0x20] sm:$0xff] }
 0x319   :  { %4366 = vmatprep.subr.bf16.mxu1 %v4365_v8  ;;  %v1282_v46 = vsel %vm106_vm8, %v1266_v25, %v1231_v37  ;;  %v1944_v37 = vld [vmem:[%s7058_s6 + $0x28] sm:$0xff]  ;;  %v1945_v40 = vld [vmem:[%s7058_s6 + $0x30] sm:$0xff] }
 0x31a   :  { %v4376_v35 = vpack.c.bf16 %v1944_v37, %v1943_v7 }
 0x31b   :  { %4174 = vmatmul.mubr.msk.f32.gmra.mrb[12].mxu1 %vm862_vm9, %v1281_v23  ;;  %v1173_v31 = vpop.permute.xlu1 %1172  ;;  %v1946_v23 = vld [vmem:[%s7058_s6 + $0x38] sm:$0xff] }
 0x31c   :  { %v1171_v24 = vpop.permute.xlu0 %1170  ;;  %4176 = vmatprep.mubr.msk.f32.mxu1 %vm862_vm9, %v1282_v46  ;;  %4368 = vmatpush3.bf16.msra.mxu1 %v4365_v8  ;;  %v1269_v5 = vsel %vm61_vm1, %v1093_v61, %v1173_v31  ;;  %v4379_v25 = vpack.c.bf16 %v1946_v23, %v1945_v40  ;;  %v5865_v46 = vld [vmem:[%s7057_s5] ss:$0 sm:$0xff] }
 0x31d   :  { %4428 = vmatprep.subr.bf16.mxu1 %v4790_v3  ;;  %v1268_v60 = vsel %vm61_vm1, %v5680_v13, %v1171_v24 }
 0x31f   :  { %4177 = vmatmul.mubr.msk.f32.gmra.mrb[14].mxu1 %vm862_vm9, %v1283_v32  ;;  %v1237_v43 = vpop.permute.xlu1 %1236 }
 0x320   :  { %v1235_v38 = vpop.permute.xlu0 %1234  ;;  %v1285_v11 = vsel %vm106_vm8, %v1269_v5, %v1237_v43 }
 0x321   :  { %v1284_v63 = vsel %vm106_vm8, %v1268_v60, %v1235_v38 }
 0x322   :  { %4179 = vmatprep.mubr.msk.f32.mxu1 %vm862_vm9, %v1284_v63 }
 0x323   :  { %4180 = vmatmul.mubr.msk.f32.gmra.mrb[16].mxu1 %vm862_vm9, %v1285_v11  ;;  %v1604_v17 = vpop.permute.xlu1 %1603 }
 0x324   :  { %v1590_v42 = vpop.permute.xlu0 %1589  ;;  %4206 = vmatprep.mubr.msk.f32.mxu1 %vm862_vm9, %v5622_v26  ;;  %v1692_v26 = vsel %vm61_vm1, %v1516_v21, %v5411_v36  ;;  %v1700_v22 = vsel %vm61_vm1, %v1524_v19, %v1604_v17 }
 0x325   :  { %v1693_v58 = vsel %vm61_vm1, %v5654_v34, %v1590_v42 }
 0x327   :  { %4207 = vmatmul.mubr.msk.f32.vlgmr.msra.gmra.mrb[2].mxu1 %vm862_vm9, %v5619_v15  ;;  %v1592_v62 = vpop.permute.xlu1 %1591 }
 0x328   :  { %v1654_v49 = vpop.permute.xlu0 %1653  ;;  %4209 = vmatprep.mubr.msk.f32.mxu1 %vm862_vm9, %v5632_v9  ;;  %v1694_v36 = vsel %vm61_vm1, %v5656_v39, %v1592_v62 }
 0x32b   :  { %4210 = vmatmul.mubr.msk.f32.gmra.mrb[4].mxu1 %vm862_vm9, %v5629_v33  ;;  %v1656_v51 = vpop.permute.xlu1 %1655  ;;  %v1708_v33 = vsel %vm106_vm8, %v1692_v26, %v5427_v41 }
 0x32c   :  { %v1594_v16 = vpop.permute.xlu0 %1593  ;;  %4212 = vmatprep.mubr.msk.f32.mxu1 %vm862_vm9, %v5642_v50  ;;  %v1709_v50 = vsel %vm106_vm8, %v1693_v58, %v1654_v49  ;;  %v1710_v1 = vsel %vm106_vm8, %v1694_v36, %v1656_v51 }
 0x32f   :  { %4213 = vmatmul.mubr.msk.f32.gmra.mrb[6].mxu1 %vm862_vm9, %v5639_v20  ;;  %v1596_v9 = vpop.permute.xlu1 %1595 }
 0x330   :  { %v1658_v15 = vpop.permute.xlu0 %1657  ;;  %4215 = vmatprep.mubr.msk.f32.mxu1 %vm862_vm9, %v5650_v27  ;;  %v1695_v27 = vsel %vm61_vm1, %v5666_v18, %v1594_v16  ;;  %v1696_v0 = vsel %vm61_vm1, %v5668_v10, %v1596_v9 }
 0x331   :  { %v1711_v41 = vsel %vm106_vm8, %v1695_v27, %v1658_v15 }
 0x333   :  { %4216 = vmatmul.mubr.msk.f32.gmra.mrb[8].mxu1 %vm862_vm9, %v1708_v33  ;;  %v1660_v20 = vpop.permute.xlu1 %1659 }
 0x334   :  { %v1598_v45 = vpop.permute.xlu0 %1597  ;;  %4218 = vmatprep.mubr.msk.f32.mxu1 %vm862_vm9, %v1709_v50  ;;  %v1712_v57 = vsel %vm106_vm8, %v1696_v0, %v1660_v20 }
 0x335   :  { %v1697_v39 = vsel %vm61_vm1, %v5678_v48, %v1598_v45 }
 0x337   :  { %4219 = vmatmul.mubr.msk.f32.gmra.mrb[10].mxu1 %vm862_vm9, %v1710_v1  ;;  %v1600_v56 = vpop.permute.xlu1 %1599 }
 0x338   :  { %v1662_v34 = vpop.permute.xlu0 %1661  ;;  %4221 = vmatprep.mubr.msk.f32.mxu1 %vm862_vm9, %v1711_v41  ;;  %v1698_v4 = vsel %vm61_vm1, %v5680_v13, %v1600_v56  ;;  %v1939_v13 = vld [vmem:[%s7058_s6] sm:$0xff] }
 0x339   :  { %v1713_v18 = vsel %vm106_vm8, %v1697_v39, %v1662_v34  ;;  %v4370_v8 = vpack.c.bf16 %v1940_v14, %v1939_v13 }
 0x33b   :  { %4222 = vmatmul.mubr.msk.f32.gmra.mrb[12].mxu1 %vm862_vm9, %v1712_v57  ;;  %v1664_v53 = vpop.permute.xlu1 %1663  ;;  %4371 = vmatpush3.bf16.msra.mxu0 %v4370_v8 }
 0x33c   :  { %v1602_v55 = vpop.permute.xlu0 %1601  ;;  %4224 = vmatprep.mubr.msk.f32.mxu1 %vm862_vm9, %v1713_v18  ;;  %v1714_v10 = vsel %vm106_vm8, %v1698_v4, %v1664_v53  ;;  %4372 = vmatprep.subr.bf16.mxu0 %v4790_v3 }
 0x33d   :  { %v1699_v48 = vsel %vm61_vm1, %v1093_v61, %v1602_v55 }
 0x33f   :  { %4225 = vmatmul.mubr.msk.f32.gmra.mrb[14].mxu1 %vm862_vm9, %v1714_v10  ;;  %v1668_v30 = vpop.permute.xlu1 %1667  ;;  %4374 = vmatpush3.bf16.msra.mxu0 %v4373_v59 }
 0x340   :  { %v1666_v28 = vpop.permute.xlu0 %1665  ;;  %v1716_v54 = vsel %vm106_vm8, %v1700_v22, %v1668_v30  ;;  %4375 = vmatprep.subr.bf16.mxu0 %v4790_v3 }
 0x341   :  { %v1715_v52 = vsel %vm106_vm8, %v1699_v48, %v1666_v28 }
 0x342   :  { %4227 = vmatprep.mubr.msk.f32.mxu1 %vm862_vm9, %v1715_v52 }
 0x343   :  { %4228 = vmatmul.mubr.msk.f32.gmra.mrb[16].mxu1 %vm862_vm9, %v1716_v54  ;;  %4377 = vmatpush3.bf16.msra.mxu0 %v4376_v35 }
 0x344   :  { %4378 = vmatprep.subr.bf16.mxu0 %v4790_v3 }
 0x347   :  { %4380 = vmatpush3.bf16.msra.mxu0 %v4379_v25 }
 0x348   :  { %4381 = vmatprep.subr.bf16.mxu0 %v4790_v3 }
 0x3fa   :  { %v4208_v24 = vpop.f32.mrb[2].mxu1 }
 0x3fb   :  { %v5868_v29 = vadd.f32 %v4208_v24, %v5865_v46  ;;  %v1844_v31 = vpop.f32.mrb[3].mxu1 }
 0x3fc   :  { %v5871_v32 = vadd.f32 %v5865_v46, %v1844_v31 }
 0x3fd   :  { %v1995_v60 = vmul.f32 %v5868_v29, %v5868_v29  ;;  %v1951_v61 = vsel %vm106_vm8, %v5868_v29, 0.0 }
 0x3fe   :  { %v1950_v38 = vsel %vm106_vm8, %v5871_v32, 0.0  ;;  %v1994_v5 = vmul.f32 %v5871_v32, %v5871_v32  ;;  %v4211_v63 = vpop.f32.mrb[4].mxu1 }
 0x3ff   :  { %v5882_v43 = vadd.f32 %v4211_v63, %v5865_v46  ;;  %v1854_v11 = vpop.f32.mrb[5].mxu1  ;;  %v2011_v42 = vsel %vm106_vm8, %v1995_v60, 0.0  ;;  %v1952_v62 = vadd.f32 %v1951_v61, %v1950_v38 }
 0x400   :  { %v2010_v17 = vsel %vm106_vm8, %v1994_v5, 0.0  ;;  %v5887_v49 = vadd.f32 %v5865_v46, %v1854_v11 }
 0x401   :  { %v1997_v21 = vmul.f32 %v5882_v43, %v5882_v43  ;;  %v2012_v15 = vadd.f32 %v2011_v42, %v2010_v17  ;;  %v1955_v50 = vsel %vm106_vm8, %v5882_v43, 0.0 }
 0x402   :  { %v1953_v16 = vsel %vm106_vm8, %v5887_v49, 0.0  ;;  %v1996_v51 = vmul.f32 %v5887_v49, %v5887_v49  ;;  %v4214_v26 = vpop.f32.mrb[6].mxu1 }
 0x403   :  { %v1954_v9 = vadd.f32 %v1953_v16, %v1952_v62  ;;  %v5896_v33 = vadd.f32 %v4214_v26, %v5865_v46  ;;  %v1864_v58 = vpop.f32.mrb[7].mxu1  ;;  %v2015_v1 = vsel %vm106_vm8, %v1997_v21, 0.0 }
 0x404   :  { %v2013_v45 = vsel %vm106_vm8, %v1996_v51, 0.0  ;;  %v5902_v36 = vadd.f32 %v5865_v46, %v1864_v58 }
 0x405   :  { %v2014_v20 = vadd.f32 %v2013_v45, %v2012_v15  ;;  %v1956_v27 = vadd.f32 %v1955_v50, %v1954_v9  ;;  %v1999_v41 = vmul.f32 %v5896_v33, %v5896_v33  ;;  %v1959_v55 = vsel %vm106_vm8, %v5896_v33, 0.0 }
 0x406   :  { %v1957_v34 = vsel %vm106_vm8, %v5902_v36, 0.0  ;;  %v1998_v0 = vmul.f32 %v5902_v36, %v5902_v36  ;;  %v4217_v56 = vpop.f32.mrb[8].mxu1 }
 0x407   :  { %v1958_v39 = vadd.f32 %v1957_v34, %v1956_v27  ;;  %v2016_v57 = vadd.f32 %v2015_v1, %v2014_v20  ;;  %v1874_v18 = vpop.f32.mrb[9].mxu1  ;;  %v5918_v10 = vadd.f32 %v4217_v56, %v5865_v46  ;;  %v2019_v28 = vsel %vm106_vm8, %v1999_v41, 0.0 }
 0x408   :  { %v2017_v4 = vsel %vm106_vm8, %v1998_v0, 0.0  ;;  %v5915_v53 = vadd.f32 %v5865_v46, %v1874_v18 }
 0x409   :  { %v2018_v19 = vadd.f32 %v2017_v4, %v2016_v57  ;;  %v1960_v48 = vadd.f32 %v1959_v55, %v1958_v39  ;;  %v2001_v47 = vmul.f32 %v5918_v10, %v5918_v10  ;;  %v1963_v31 = vsel %vm106_vm8, %v5918_v10, 0.0 }
 0x40a   :  { %v1961_v22 = vsel %vm106_vm8, %v5915_v53, 0.0  ;;  %v2000_v52 = vmul.f32 %v5915_v53, %v5915_v53  ;;  %v4220_v30 = vpop.f32.mrb[10].mxu1 }
 0x40b   :  { %v2020_v54 = vadd.f32 %v2019_v28, %v2018_v19  ;;  %v5926_v13 = vadd.f32 %v4220_v30, %v5865_v46  ;;  %v1884_v14 = vpop.f32.mrb[11].mxu1  ;;  %v1962_v59 = vadd.f32 %v1961_v22, %v1960_v48  ;;  %v2023_v38 = vsel %vm106_vm8, %v2001_v47, 0.0 }
 0x40c   :  { %v2021_v44 = vsel %vm106_vm8, %v2000_v52, 0.0  ;;  %v5930_v8 = vadd.f32 %v5865_v46, %v1884_v14 }
 0x40d   :  { %v2003_v7 = vmul.f32 %v5926_v13, %v5926_v13  ;;  %v2022_v37 = vadd.f32 %v2021_v44, %v2020_v54  ;;  %v1966_v23 = vsel %vm106_vm8, %v5926_v13, 0.0  ;;  %v1964_v5 = vadd.f32 %v1963_v31, %v1962_v59 }
 0x40e   :  { %v2002_v35 = vmul.f32 %v5930_v8, %v5930_v8  ;;  %v4223_v40 = vpop.f32.mrb[12].mxu1  ;;  %v1965_v25 = vsel %vm106_vm8, %v5930_v8, 0.0 }
 0x40f   :  { %v1894_v24 = vpop.f32.mrb[13].mxu1  ;;  %v5945_v60 = vadd.f32 %v4223_v40, %v5865_v46  ;;  %v2026_v63 = vsel %vm106_vm8, %v2003_v7, 0.0  ;;  %v2024_v42 = vadd.f32 %v2023_v38, %v2022_v37  ;;  %v1967_v17 = vadd.f32 %v1966_v23, %v1965_v25 }
 0x410   :  { %v5948_v61 = vadd.f32 %v5865_v46, %v1894_v24  ;;  %v2025_v11 = vsel %vm106_vm8, %v2002_v35, 0.0  ;;  %v1980_v50 = vsel %vm106_vm8, %v1964_v5, 0.0 }
 0x411   :  { %v2005_v62 = vmul.f32 %v5945_v60, %v5945_v60  ;;  %v2027_v9 = vadd.f32 %v2026_v63, %v2025_v11  ;;  %v1970_v45 = vsel %vm106_vm8, %v5945_v60, 0.0  ;;  %v2040_v1 = vsel %vm106_vm8, %v2024_v42, 0.0 }
 0x412   :  { %v4226_v21 = vpop.f32.mrb[14].mxu1  ;;  %v1968_v16 = vsel %vm106_vm8, %v5948_v61, 0.0  ;;  %v2004_v51 = vmul.f32 %v5948_v61, %v5948_v61  ;;  %v1981_v22 = vrot.slane %v1980_v50, 4  ;;  %v2041_v52 = vrot.slane %v2040_v1, 4 }
 0x413   :  { %v5960_v26 = vadd.f32 %v4226_v21, %v5865_v46  ;;  %v1904_v15 = vpop.f32.mrb[15].mxu1  ;;  %v1969_v58 = vadd.f32 %v1968_v16, %v1967_v17  ;;  %v2030_v41 = vsel %vm106_vm8, %v2005_v62, 0.0 }
 0x414   :  { %v2028_v20 = vsel %vm106_vm8, %v2004_v51, 0.0  ;;  %v5967_v27 = vadd.f32 %v5865_v46, %v1904_v15  ;;  %v1982_v23 = vadd.f32 %v1981_v22, %v1980_v50  ;;  %v2042_v25 = vadd.f32 %v2041_v52, %v2040_v1  ;;  %v1947_v52 = vld [vmem:[%s7059_s7] sm:$0xff] }
 0x415   :  { %v2029_v34 = vadd.f32 %v2028_v20, %v2027_v9  ;;  %v1971_v0 = vadd.f32 %v1970_v45, %v1969_v58  ;;  %v2007_v39 = vmul.f32 %v5960_v26, %v5960_v26  ;;  %v1974_v30 = vsel %vm106_vm8, %v5960_v26, 0.0 }
 0x416   :  { %v4229_v56 = vpop.f32.mrb[16].mxu1  ;;  %v1972_v57 = vsel %vm106_vm8, %v5967_v27, 0.0  ;;  %v2006_v18 = vmul.f32 %v5967_v27, %v5967_v27  ;;  %v1983_v42 = vrot.slane %v1982_v23, 2  ;;  %v2043_v17 = vrot.slane %v2042_v25, 2 }
 0x417   :  { %v5978_v55 = vadd.f32 %v4229_v56, %v5865_v46  ;;  %v1914_v4 = vpop.f32.mrb[17].mxu1  ;;  %v1973_v19 = vadd.f32 %v1972_v57, %v1971_v0  ;;  %v2031_v48 = vadd.f32 %v2030_v41, %v2029_v34  ;;  %v2034_v7 = vsel %vm106_vm8, %v2007_v39, 0.0 }
 0x418   :  { %v5981_v28 = vadd.f32 %v5865_v46, %v1914_v4  ;;  %v2032_v54 = vsel %vm106_vm8, %v2006_v18, 0.0  ;;  %v1984_v15 = vadd.f32 %v1983_v42, %v1982_v23  ;;  %v2044_v50 = vadd.f32 %v2043_v17, %v2042_v25 }
 0x419   :  { %v2033_v14 = vadd.f32 %v2032_v54, %v2031_v48  ;;  %v1975_v44 = vadd.f32 %v1974_v30, %v1973_v19  ;;  %v2009_v46 = vmul.f32 %v5978_v55, %v5978_v55  ;;  %v1978_v24 = vsel %vm106_vm8, %v5978_v55, 0.0  ;;  %v1948_v30 = vld [vmem:[%s7059_s7 + $0x8] sm:$0xff] }
 0x41a   :  { %v1976_v47 = vsel %vm106_vm8, %v5981_v28, 0.0  ;;  %v2008_v59 = vmul.f32 %v5981_v28, %v5981_v28  ;;  %v1985_v1 = vrot.slane %v1984_v15, 1  ;;  %v2045_v34 = vrot.slane %v2044_v50, 1 }
 0x41b   :  { %v1977_v37 = vadd.f32 %v1976_v47, %v1975_v44  ;;  %v2035_v35 = vadd.f32 %v2034_v7, %v2033_v14  ;;  %v2038_v5 = vsel %vm106_vm8, %v2009_v46, 0.0  ;;  %v4382_v54 = vpack.c.bf16 %v1948_v30, %v1947_v52  ;;  %v2413_v14 = vld [vmem:[%s7063_s11] sm:$0xff]  ;;  %v2414_v44 = vld [vmem:[%s7063_s11 + $0x8] sm:$0xff]  ;;  %v4765_v52 = vld [vmem:[%s7052_s0 + $0x78] sm:$0xff] }
 0x41c   :  { %v2036_v40 = vsel %vm106_vm8, %v2008_v59, 0.0  ;;  %v1986_v57 = vadd.f32 %v1985_v1, %v1984_v15  ;;  %v2046_v18 = vadd.f32 %v2045_v34, %v2044_v50  ;;  %v4384_v47 = vpack.c.bf16 %v2414_v44, %v2413_v14  ;;  %v2651_v59 = vld [vmem:[#allocation3 + $0x1] sm:$0xff]  ;;  %v4753_v1 = vld [vmem:[%s7052_s0 + $0x18] sm:$0xff]  ;;  %v2769_v44 = vld [vmem:[%s7061_s9 + $0x30] sm:$0xff] }
 0x41d   :  { %v1979_v31 = vadd.f32 %v1978_v24, %v1977_v37  ;;  %v2037_v38 = vadd.f32 %v2036_v40, %v2035_v35  ;;  %2699 = vrot.lane.b32.xlu0 %v2651_v59, %s4794_s16  ;;  %v4751_v50 = vld [vmem:[%s7052_s0 + $0x8] sm:$0xff]  ;;  %v2767_v30 = vld [vmem:[%s7061_s9 + $0x20] sm:$0xff] }
 0x41e   :  { %v4755_v34 = vld [vmem:[%s7052_s0 + $0x28] sm:$0xff] }
 0x41f   :  { %v1987_v63 = vsel %vm106_vm8, %v1979_v31, 0.0  ;;  %v2039_v11 = vadd.f32 %v2038_v5, %v2037_v38 }
 0x420   :  { %v1988_v62 = vrot.slane %v1987_v63, 4 }
 0x421   :  { %v2047_v21 = vsel %vm106_vm8, %v2039_v11, 0.0  ;;  %v2416_v11 = vld [vmem:[%s7063_s11 + $0x18] sm:$0xff] }
 0x422   :  { %v1989_v16 = vadd.f32 %v1988_v62, %v1987_v63  ;;  %v2048_v51 = vrot.slane %v2047_v21, 4  ;;  %v2415_v63 = vld [vmem:[%s7063_s11 + $0x10] sm:$0xff] }
 0x423   :  { %v4388_v17 = vpack.c.bf16 %v2416_v11, %v2415_v63  ;;  %v2779_v11 = vld [vmem:[%s7061_s9 + $0x80] sm:$0xff] }
 0x424   :  { %v1990_v9 = vrot.slane %v1989_v16, 2  ;;  %v2049_v58 = vadd.f32 %v2048_v51, %v2047_v21  ;;  %v4750_v21 = vld [vmem:[%s7052_s0] sm:$0xff]  ;;  %v2764_v51 = vld [vmem:[%s7061_s9 + $0x8] sm:$0xff] }
 0x426   :  { %v1991_v45 = vadd.f32 %v1990_v9, %v1989_v16  ;;  %v2050_v20 = vrot.slane %v2049_v58, 2  ;;  %v2763_v16 = vld [vmem:[%s7061_s9] sm:$0xff]  ;;  %v2765_v9 = vld [vmem:[%s7061_s9 + $0x10] sm:$0xff] }
 0x427   :  { %v4393_v15 = vpack.c.bf16 %v2764_v51, %v2763_v16  ;;  %v2783_v51 = vld [vmem:[%s7061_s9 + $0xa0] sm:$0xff] }
 0x428   :  { %v1992_v41 = vrot.slane %v1991_v45, 1  ;;  %v2051_v0 = vadd.f32 %v2050_v20, %v2049_v58  ;;  %v2766_v58 = vld [vmem:[%s7061_s9 + $0x18] sm:$0xff]  ;;  %v4752_v20 = vld [vmem:[%s7052_s0 + $0x10] sm:$0xff] }
 0x42a   :  { %v1993_v56 = vadd.f32 %v1992_v41, %v1991_v45  ;;  %v2052_v39 = vrot.slane %v2051_v0, 1  ;;  %v4396_v45 = vpack.c.bf16 %v2766_v58, %v2765_v9  ;;  %v4754_v41 = vld [vmem:[%s7052_s0 + $0x20] sm:$0xff] }
 0x42b   :  { %v2667_v9 = vld [vmem:[#allocation3 + $0x2] sm:$0xff] }
 0x42c   :  { %v2053_v4 = vadd.f32 %v2052_v39, %v2051_v0  ;;  %v2056_v19 = vsel %vm264_vm2, %v1993_v56, %v1986_v57  ;;  %v4756_v0 = vld [vmem:[%s7052_s0 + $0x30] sm:$0xff]  ;;  %v4757_v56 = vld [vmem:[%s7052_s0 + $0x38] sm:$0xff]  ;;  %v4758_v39 = vld [vmem:[%s7052_s0 + $0x40] sm:$0xff] }
 0x42d   :  { %v4759_v57 = vld [vmem:[%s7052_s0 + $0x48] sm:$0xff] }
 0x42e   :  { %v2060_v48 = vsel %vm269_vm3, %v2053_v4, %v2046_v18  ;;  %v4760_v18 = vld [vmem:[%s7052_s0 + $0x50] sm:$0xff]  ;;  %v4761_v4 = vld [vmem:[%s7052_s0 + $0x58] sm:$0xff] }
 0x42f   :  { %v2062_v22 = vsel %vm272_vm4, %v2056_v19, %v2060_v48  ;;  %v4762_v19 = vld [vmem:[%s7052_s0 + $0x60] sm:$0xff]  ;;  %v4763_v48 = vld [vmem:[%s7052_s0 + $0x68] sm:$0xff] }
 0x430   :  { %4247 = vmatmul.mubr.msk.f32.vlgmr.msra.gmra.mrb[2].mxu0 %vm106_vm8, %v2062_v22  ;;  %v4764_v22 = vld [vmem:[%s7052_s0 + $0x70] sm:$0xff] }
 0x431   :  { %4253 = vmatprep.mubr.msk.f32.mxu0 %vm4791_vm0, %v4792_v6  ;;  %4383 = vmatpush3.bf16.msra.mxu0 %v4382_v54  ;;  %v2768_v54 = vld [vmem:[%s7061_s9 + $0x28] sm:$0xff]  ;;  %v3866_v6 = vld [vmem:[%s7061_s9 + $0xd0] sm:$0xff] }
 0x432   :  { %4385 = vmatprep.subr.bf16.mxu0 %v4384_v47  ;;  %v4399_v14 = vpack.c.bf16 %v2768_v54, %v2767_v30  ;;  %v3870_v54 = vld [vmem:[%s7061_s9 + $0xf0] sm:$0xff] }
 0x503   :  { %v2132_v7 = vpop.f32.mrb[2].mxu0 }
 0x504   :  { %v2136_v46 = vmul.f32 0.00390625, %v2132_v7  ;;  %v4248_v37 = vpop.f32.mrb[3].mxu0  ;;  %v2771_v7 = vld [vmem:[%s7061_s9 + $0x40] sm:$0xff] }
 0x506   :  { %v2137_v35 = vmul.f32 %v2136_v46, %v2136_v46 }
 0x508   :  { %v2139_v40 = vrot.slane %v2137_v35, 6  ;;  %v2773_v35 = vld [vmem:[%s7061_s9 + $0x50] sm:$0xff] }
 0x50a   :  { %v2141_v23 = vsub.f32 %v2136_v46, %v2139_v40  ;;  %v2774_v40 = vld [vmem:[%s7061_s9 + $0x58] sm:$0xff] }
 0x50c   :  { %v2142_v25 = vmax.f32 %v2141_v23, 0.0  ;;  %v4408_v23 = vpack.c.bf16 %v2774_v40, %v2773_v35 }
 0x50e   :  { %v2143_v24 = vadd.f32 1e-06, %v2142_v25  ;;  %v2775_v25 = vld [vmem:[%s7061_s9 + $0x60] sm:$0xff] }
 0x510   :  { %4716 = vrsqrt.f32 %v2143_v24  ;;  %v2776_v24 = vld [vmem:[%s7061_s9 + $0x68] sm:$0xff] }
 0x51a   :  { %v4717_v31 = vpop.eup %4716 }
 0x51b   :  { %v2146_v38 = vrot.slane %v4717_v31, 2  ;;  %v4411_v31 = vpack.c.bf16 %v2776_v24, %v2775_v25 }
 0x51d   :  { %v2148_v5 = vmul.f32 %v2146_v38, %v2136_v46  ;;  %v2772_v46 = vld [vmem:[%s7061_s9 + $0x48] sm:$0xff] }
 0x51e   :  { %v4405_v37 = vpack.c.bf16 %v2772_v46, %v2771_v7  ;;  %v3831_v46 = vld [vmem:[%s7060_s8] ss:$0 sm:$0xff] }
 0x51f   :  { %v2150_v42 = vrot.slane %v2148_v5, 6  ;;  %v2778_v5 = vld [vmem:[%s7061_s9 + $0x78] sm:$0xff] }
 0x521   :  { %v2152_v62 = vsel %vm272_vm4, %v2146_v38, %v2150_v42  ;;  %v2777_v38 = vld [vmem:[%s7061_s9 + $0x70] sm:$0xff]  ;;  %v2780_v42 = vld [vmem:[%s7061_s9 + $0x88] sm:$0xff] }
 0x522   :  { %4254 = vmatmul.mubr.msk.f32.vlgmr.msra.gmra.mrb[4].mxu0 %vm364_vm5, %v2152_v62  ;;  %v4414_v63 = vpack.c.bf16 %v2778_v5, %v2777_v38  ;;  %v2781_v62 = vld [vmem:[%s7061_s9 + $0x90] sm:$0xff] }
 0x523   :  { %4387 = vmatpush3.bf16.msra.mxu0 %v4384_v47  ;;  %4264 = vmatprep.mubr.msk.f32.mxu0 %vm61_vm1, %v4750_v21  ;;  %v2770_v47 = vld [vmem:[%s7061_s9 + $0x38] sm:$0xff] }
 0x524   :  { %4389 = vmatprep.subr.bf16.mxu0 %v4388_v17  ;;  %v4402_v59 = vpack.c.bf16 %v2770_v47, %v2769_v44  ;;  %v2782_v21 = vld [vmem:[%s7061_s9 + $0x98] sm:$0xff]  ;;  %v3872_v47 = vld [vmem:[%s7061_s9 + $0x100] sm:$0xff] }
 0x525   :  { %v4420_v16 = vpack.c.bf16 %v2782_v21, %v2781_v62 }
 0x527   :  { %4391 = vmatpush3.bf16.msra.mxu0 %v4388_v17  ;;  %v4417_v17 = vpack.c.bf16 %v2780_v42, %v2779_v11 }
 0x528   :  { %4392 = vmatprep.subr.bf16.mxu0 %v4790_v3 }
 0x52a   :  { %4265 = vmatmul.mubr.msk.f32.vlgmr.msra.gmra.mrb[6].mxu0 %vm61_vm1, %v4751_v50  ;;  %v2785_v50 = vld [vmem:[%s7061_s9 + $0xb0] sm:$0xff] }
 0x52b   :  { %4394 = vmatpush1.bf16.msra.mxu0 %v4393_v15  ;;  %4267 = vmatprep.mubr.msk.f32.mxu0 %vm61_vm1, %v4752_v20  ;;  %v2784_v15 = vld [vmem:[%s7061_s9 + $0xa8] sm:$0xff] }
 0x52c   :  { %4395 = vmatprep.subr.bf16.mxu0 %v4790_v3  ;;  %v4423_v58 = vpack.c.bf16 %v2784_v15, %v2783_v51 }
 0x52e   :  { %4268 = vmatmul.mubr.msk.f32.gmra.mrb[8].mxu0 %vm61_vm1, %v4753_v1  ;;  %v2635_v1 = vld [vmem:[#allocation3] sm:$0xff] }
 0x52f   :  { %4397 = vmatpush1.bf16.msra.mxu0 %v4396_v45  ;;  %4270 = vmatprep.mubr.msk.f32.mxu0 %vm61_vm1, %v4754_v41  ;;  %v2786_v45 = vld [vmem:[%s7061_s9 + $0xb8] sm:$0xff]  ;;  %v2700_v41 = vpop.permute.xlu0 %2699 }
 0x530   :  { %4398 = vmatprep.subr.bf16.mxu0 %v4790_v3  ;;  %v4426_v20 = vpack.c.bf16 %v2786_v45, %v2785_v50 }
 0x532   :  { %4271 = vmatmul.mubr.msk.f32.gmra.mrb[10].mxu0 %vm61_vm1, %v4755_v34  ;;  %v2747_v34 = vsel %vm106_vm8, %v2635_v1, %v2700_v41 }
 0x533   :  { %4273 = vmatprep.mubr.msk.f32.mxu0 %vm61_vm1, %v4756_v0  ;;  %4400 = vmatpush1.bf16.msra.mxu0 %v4399_v14  ;;  %v3864_v0 = vld [vmem:[%s7061_s9 + $0xc0] sm:$0xff]  ;;  %v3871_v14 = vld [vmem:[%s7061_s9 + $0xf8] sm:$0xff] }
 0x534   :  { %4401 = vmatprep.subr.bf16.mxu0 %v4790_v3  ;;  %v4438_v44 = vpack.c.bf16 %v3871_v14, %v3870_v54 }
 0x536   :  { %4274 = vmatmul.mubr.msk.f32.gmra.mrb[12].mxu0 %vm61_vm1, %v4757_v56  ;;  %v3865_v56 = vld [vmem:[%s7061_s9 + $0xc8] sm:$0xff] }
 0x537   :  { %4276 = vmatprep.mubr.msk.f32.mxu0 %vm61_vm1, %v4758_v39  ;;  %4403 = vmatpush1.bf16.msra.mxu0 %v4402_v59  ;;  %v4429_v39 = vpack.c.bf16 %v3865_v56, %v3864_v0  ;;  %v3873_v59 = vld [vmem:[%s7061_s9 + $0x108] sm:$0xff] }
 0x538   :  { %4404 = vmatprep.subr.bf16.mxu0 %v4790_v3  ;;  %v4441_v7 = vpack.c.bf16 %v3873_v59, %v3872_v47 }
 0x539   :  { %4430 = vmatpush1.bf16.msra.mxu1 %v4429_v39 }
 0x53a   :  { %4277 = vmatmul.mubr.msk.f32.gmra.mrb[14].mxu0 %vm61_vm1, %v4759_v57  ;;  %v3867_v57 = vld [vmem:[%s7061_s9 + $0xd8] sm:$0xff]  ;;  %4431 = vmatprep.subr.bf16.mxu1 %v4790_v3 }
 0x53b   :  { %4279 = vmatprep.mubr.msk.f32.mxu0 %vm61_vm1, %v4760_v18  ;;  %4406 = vmatpush1.bf16.msra.mxu0 %v4405_v37  ;;  %v4432_v18 = vpack.c.bf16 %v3867_v57, %v3866_v6 }
 0x53c   :  { %4407 = vmatprep.subr.bf16.mxu0 %v4790_v3 }
 0x53d   :  { %4433 = vmatpush1.bf16.msra.mxu1 %v4432_v18 }
 0x53e   :  { %4280 = vmatmul.mubr.msk.f32.gmra.mrb[16].mxu0 %vm61_vm1, %v4761_v4  ;;  %v3904_v4 = vld [vmem:[%s7061_s9 + $0x180] sm:$0xff]  ;;  %4434 = vmatprep.subr.bf16.mxu1 %v4790_v3 }
 0x53f   :  { %4282 = vmatprep.mubr.msk.f32.mxu0 %vm61_vm1, %v4762_v19  ;;  %4409 = vmatpush1.bf16.msra.mxu0 %v4408_v23  ;;  %v3905_v19 = vld [vmem:[%s7061_s9 + $0x188] sm:$0xff] }
 0x540   :  { %4410 = vmatprep.subr.bf16.mxu0 %v4790_v3 }
 0x542   :  { %4283 = vmatmul.mubr.msk.f32.gmra.mrb[18].mxu0 %vm61_vm1, %v4763_v48  ;;  %v3868_v48 = vld [vmem:[%s7061_s9 + $0xe0] sm:$0xff] }
 0x543   :  { %4285 = vmatprep.mubr.msk.f32.mxu0 %vm61_vm1, %v4764_v22  ;;  %4412 = vmatpush1.bf16.msra.mxu0 %v4411_v31  ;;  %v3869_v22 = vld [vmem:[%s7061_s9 + $0xe8] sm:$0xff] }
 0x544   :  { %4413 = vmatprep.subr.bf16.mxu0 %v4790_v3  ;;  %v4435_v30 = vpack.c.bf16 %v3869_v22, %v3868_v48 }
 0x546   :  { %4286 = vmatmul.mubr.msk.f32.gmra.mrb[20].mxu0 %vm61_vm1, %v4765_v52  ;;  %v6270_v52 = vpack.c.bf16 %v3905_v19, %v3904_v4  ;;  %4436 = vmatpush1.bf16.msra.mxu1 %v4435_v30 }
 0x547   :  { %4415 = vmatpush1.bf16.msra.mxu0 %v4414_v63  ;;  %3848 = vmatprep.mubr.msk.f32.mxu0 %vm106_vm8, %v2667_v9 }
 0x548   :  { %4416 = vmatprep.subr.bf16.mxu0 %v4790_v3  ;;  %4437 = vmatprep.subr.bf16.mxu1 %v4790_v3 }
 0x54a   :  { %4439 = vmatpush1.bf16.msra.mxu1 %v4438_v44 }
 0x54b   :  { %4418 = vmatpush1.bf16.msra.mxu0 %v4417_v17  ;;  %4440 = vmatprep.subr.bf16.mxu1 %v4790_v3 }
 0x54c   :  { %4419 = vmatprep.subr.bf16.mxu0 %v4790_v3 }
 0x54e   :  { %4442 = vmatpush1.bf16.msra.mxu1 %v4441_v7 }
 0x54f   :  { %4421 = vmatpush1.bf16.msra.mxu0 %v4420_v16  ;;  %4443 = vmatprep.subr.bf16.mxu1 %v4790_v3 }
 0x550   :  { %4422 = vmatprep.subr.bf16.mxu0 %v4790_v3 }
 0x553   :  { %4424 = vmatpush1.bf16.msra.mxu0 %v4423_v58 }
 0x554   :  { %4425 = vmatprep.subr.bf16.mxu0 %v4790_v3 }
 0x557   :  { %4427 = vmatpush1.bf16.msra.mxu0 %v4426_v20 }
 0x558   :  { %4464 = vmatprep.subr.bf16.mxu0 %v4790_v3 }
 0x55a   :  { %2900 = vmatmul.mubr.f32.vlgmr.msra.gmra.mrb[22].mxu0 %v2747_v34 }
 0x55b   :  { %4466 = vmatpush1.bf16.msra.mxu0 %v6270_v52 }
 0x55c   :  { %4467 = vmatprep.subr.bf16.mxu0 %v4790_v3 }
 0x5f5   :  { %v2222_v37 = vpop.f32.mrb[4].mxu0 }
 0x5f6   :  { %v2232_v35 = vsub.f32 %v3831_v46, %v2222_v37  ;;  %v2240_v40 = vrot.slane %v2222_v37, %v5149_v2  ;;  %v4255_v23 = vpop.f32.mrb[5].mxu0 }
 0x5f8   :  { %v2241_v25 = vcombine.high %v2240_v40, %v2240_v40  ;;  %v2289_v24 = vrot.slane %v2232_v35, %v5149_v2  ;;  %v2248_v31 = vrot.slane %v2240_v40, %v5149_v2 }
 0x5fa   :  { %v2255_v38 = vrot.slane %v2241_v25, %v5149_v2  ;;  %v2290_v5 = vcombine.high %v2289_v24, %v2289_v24  ;;  %v2297_v63 = vrot.slane %v2289_v24, %v5149_v2  ;;  %v2259_v11 = vrot.slane %v2248_v31, %v5155_v12 }
 0x5fc   :  { %v2263_v42 = vrot.slane %v2255_v38, %v5155_v12  ;;  %v2304_v17 = vrot.slane %v2290_v5, %v5149_v2  ;;  %v2305_v62 = vcombine.high %v2297_v63, %v2297_v63  ;;  %v2266_v21 = vmul.f32 %v5871_v32, %v2259_v11 }
 0x5fd   :  { %v2267_v16 = vmul.f32 %v5868_v29, %v2259_v11  ;;  %v2273_v51 = vmul.f32 %v5918_v10, %v2259_v11  ;;  %v2268_v58 = vmul.f32 %v5887_v49, %v2259_v11  ;;  %v2269_v50 = vmul.f32 %v5882_v43, %v2259_v11 }
 0x5fe   :  { %v2306_v15 = vcombine.high %v2304_v17, %v2304_v17  ;;  %v2310_v9 = vrot.slane %v2305_v62, %v5155_v12  ;;  %v2279_v45 = vmul.f32 %v5960_v26, %v2263_v42  ;;  %v2280_v20 = vmul.f32 %v5981_v28, %v2263_v42 }
 0x5ff   :  { %v2281_v2 = vmul.f32 %v5978_v55, %v2263_v42  ;;  %v2270_v10 = vmul.f32 %v5902_v36, %v2259_v11  ;;  %v2271_v41 = vmul.f32 %v5896_v33, %v2259_v11  ;;  %v2272_v0 = vmul.f32 %v5915_v53, %v2259_v11 }
 0x600   :  { %v2314_v1 = vrot.slane %v2306_v15, %v5155_v12  ;;  %v6311_v32 = vadd.f32 %v2310_v9, %v2273_v51  ;;  %v6313_v29 = vadd.f32 %v2310_v9, %v2267_v16  ;;  %v6317_v34 = vadd.f32 %v2310_v9, %v2266_v21 }
 0x601   :  { %v6319_v49 = vadd.f32 %v2310_v9, %v2269_v50  ;;  %v6330_v6 = vadd.f32 %v2310_v9, %v2268_v58  ;;  %v6332_v36 = vadd.f32 %v2310_v9, %v2271_v41  ;;  %v2275_v18 = vmul.f32 %v5926_v13, %v2263_v42 }
 0x602   :  { %v6321_v43 = vadd.f32 %v2314_v1, %v2279_v45  ;;  %v6323_v26 = vadd.f32 %v2314_v1, %v2280_v20  ;;  %v6325_v28 = vadd.f32 %v2314_v1, %v2281_v2  ;;  %v2340_v55 = vmul.f32 0.5, %v6311_v32 }
 0x603   :  { %v2334_v56 = vmul.f32 0.5, %v6313_v29  ;;  %v2333_v4 = vmul.f32 0.5, %v6317_v34  ;;  %v6339_v19 = vadd.f32 %v2310_v9, %v2270_v10  ;;  %v2274_v53 = vmul.f32 %v5930_v8, %v2263_v42 }
 0x604   :  { %v2346_v33 = vmul.f32 0.5, %v6321_v43  ;;  %v2347_v39 = vmul.f32 0.5, %v6323_v26  ;;  %v2348_v57 = vmul.f32 0.5, %v6325_v28  ;;  %4718 = vtanh.f32 %v2340_v55  ;;  %v3874_v55 = vld [vmem:[%s7061_s9 + $0x110] sm:$0xff] }
 0x605   :  { %4720 = vtanh.f32 %v2334_v56  ;;  %v2336_v48 = vmul.f32 0.5, %v6319_v49  ;;  %v6343_v22 = vadd.f32 %v2310_v9, %v2272_v0  ;;  %v2277_v30 = vmul.f32 %v5945_v60, %v2263_v42 }
 0x606   :  { %4722 = vtanh.f32 %v2346_v33  ;;  %v2335_v54 = vmul.f32 0.5, %v6330_v6  ;;  %v6347_v14 = vadd.f32 %v2314_v1, %v2275_v18  ;;  %v2276_v13 = vmul.f32 %v5948_v61, %v2263_v42 }
 0x607   :  { %4724 = vtanh.f32 %v2347_v39  ;;  %v2338_v44 = vmul.f32 0.5, %v6332_v36  ;;  %v6351_v47 = vadd.f32 %v2314_v1, %v2274_v53  ;;  %v2278_v8 = vmul.f32 %v5967_v27, %v2263_v42 }
 0x608   :  { %4726 = vtanh.f32 %v2348_v57  ;;  %v2337_v59 = vmul.f32 0.5, %v6339_v19  ;;  %v6355_v7 = vadd.f32 %v2314_v1, %v2277_v30  ;;  %v2339_v60 = vmul.f32 0.5, %v6343_v22 }
 0x609   :  { %4728 = vtanh.f32 %v2333_v4  ;;  %v6358_v46 = vadd.f32 %v2314_v1, %v2276_v13  ;;  %v2342_v61 = vmul.f32 0.5, %v6347_v14  ;;  %v6361_v37 = vadd.f32 %v2314_v1, %v2278_v8  ;;  %v3907_v13 = vld [vmem:[%s7061_s9 + $0x198] sm:$0xff] }
 0x60a   :  { %4730 = vtanh.f32 %v2336_v48  ;;  %v2341_v35 = vmul.f32 0.5, %v6351_v47  ;;  %v2344_v27 = vmul.f32 0.5, %v6355_v7 }
 0x60b   :  { %4732 = vtanh.f32 %v2335_v54  ;;  %v2343_v23 = vmul.f32 0.5, %v6358_v46  ;;  %v2345_v31 = vmul.f32 0.5, %v6361_v37 }
 0x60c   :  { %4734 = vtanh.f32 %v2338_v44 }
 0x60d   :  { %4736 = vtanh.f32 %v2337_v59 }
 0x60e   :  { %v4719_v40 = vpop.eup %4718  ;;  %4738 = vtanh.f32 %v2339_v60  ;;  %v3876_v60 = vld [vmem:[%s7061_s9 + $0x120] sm:$0xff] }
 0x60f   :  { %v4721_v25 = vpop.eup %4720  ;;  %v2372_v24 = vmul.f32 0.5, %v4719_v40  ;;  %4740 = vtanh.f32 %v2342_v61  ;;  %v3877_v61 = vld [vmem:[%s7061_s9 + $0x128] sm:$0xff] }
 0x610   :  { %v4723_v38 = vpop.eup %4722  ;;  %v2366_v5 = vmul.f32 0.5, %v4721_v25  ;;  %4742 = vtanh.f32 %v2341_v35 }
 0x611   :  { %v4725_v63 = vpop.eup %4724  ;;  %v2388_v11 = vadd.f32 0.5, %v2372_v24  ;;  %4744 = vtanh.f32 %v2344_v27  ;;  %v2378_v42 = vmul.f32 0.5, %v4723_v38 }
 0x612   :  { %v4727_v17 = vpop.eup %4726  ;;  %v2382_v62 = vadd.f32 0.5, %v2366_v5  ;;  %4746 = vtanh.f32 %v2343_v23  ;;  %v2379_v21 = vmul.f32 0.5, %v4725_v63  ;;  %v4447_v23 = vpack.c.bf16 %v3877_v61, %v3876_v60 }
 0x613   :  { %v4729_v16 = vpop.eup %4728  ;;  %v2404_v51 = vmul.f32 %v2388_v11, %v6311_v32  ;;  %v2394_v15 = vadd.f32 0.5, %v2378_v42  ;;  %4748 = vtanh.f32 %v2345_v31  ;;  %v2380_v9 = vmul.f32 0.5, %v4727_v17  ;;  %v3875_v32 = vld [vmem:[%s7061_s9 + $0x118] sm:$0xff] }
 0x614   :  { %v4731_v58 = vpop.eup %4730  ;;  %v2398_v50 = vmul.f32 %v2382_v62, %v6313_v29  ;;  %v2365_v45 = vmul.f32 0.5, %v4729_v16  ;;  %v2395_v20 = vadd.f32 0.5, %v2379_v21  ;;  %v4444_v39 = vpack.c.bf16 %v3875_v32, %v3874_v55  ;;  %v3880_v32 = vld [vmem:[%s7061_s9 + $0x140] sm:$0xff] }
 0x615   :  { %v4733_v2 = vpop.eup %4732  ;;  %2626 = vst.msk [vmem:[#allocation3 + $0x81] sm:$0xff] %vm106_vm8, %v2404_v51  ;;  %v2368_v1 = vmul.f32 0.5, %v4731_v58  ;;  %v2410_v10 = vmul.f32 %v2394_v15, %v6321_v43  ;;  %v2396_v41 = vadd.f32 0.5, %v2380_v9  ;;  %v3878_v15 = vld [vmem:[%s7061_s9 + $0x130] sm:$0xff] }
 0x616   :  { %v4735_v0 = vpop.eup %4734  ;;  %2620 = vst.msk [vmem:[#allocation3 + $0x21] sm:$0xff] %vm106_vm8, %v2398_v50  ;;  %v2381_v29 = vadd.f32 0.5, %v2365_v45  ;;  %v2367_v56 = vmul.f32 0.5, %v4733_v2  ;;  %v2411_v33 = vmul.f32 %v2395_v20, %v6323_v26  ;;  %4445 = vmatpush1.bf16.msra.mxu1 %v4444_v39  ;;  %v3906_v26 = vld [vmem:[%s7061_s9 + $0x190] sm:$0xff]  ;;  %v3909_v45 = vld [vmem:[%s7061_s9 + $0x1a8] sm:$0xff] }
 0x617   :  { %v4737_v57 = vpop.eup %4736  ;;  %v2384_v18 = vadd.f32 0.5, %v2368_v1  ;;  %v2370_v43 = vmul.f32 0.5, %v4735_v0  ;;  %2632 = vst.msk [vmem:[#allocation3 + $0x101] sm:$0xff] %vm106_vm8, %v2410_v10  ;;  %v2412_v4 = vmul.f32 %v2396_v41, %v6325_v28  ;;  %4446 = vmatprep.subr.bf16.mxu1 %v4790_v3  ;;  %v3910_v0 = vld [vmem:[%s7061_s9 + $0x1b0] sm:$0xff] }
 0x618   :  { %v4739_v53 = vpop.eup %4738  ;;  %v2397_v48 = vmul.f32 %v2381_v29, %v6317_v34  ;;  %v2383_v30 = vadd.f32 0.5, %v2367_v56  ;;  %v2369_v54 = vmul.f32 0.5, %v4737_v57  ;;  %2633 = vst.msk [vmem:[#allocation3 + $0x111] sm:$0xff] %vm106_vm8, %v2411_v33  ;;  %v6392_v34 = vpack.c.bf16 %v3907_v13, %v3906_v26  ;;  %v3911_v29 = vld [vmem:[%s7061_s9 + $0x1b8] sm:$0xff]  ;;  %v3882_v57 = vld [vmem:[%s7061_s9 + $0x150] sm:$0xff]  ;;  %v3885_v13 = vld [vmem:[%s7061_s9 + $0x168] sm:$0xff] }
 0x619   :  { %v4741_v44 = vpop.eup %4740  ;;  %v2400_v8 = vmul.f32 %v2384_v18, %v6319_v49  ;;  %v2386_v28 = vadd.f32 0.5, %v2370_v43  ;;  %v2371_v59 = vmul.f32 0.5, %v4739_v53  ;;  %2634 = vst.msk [vmem:[#allocation3 + $0x121] sm:$0xff] %vm106_vm8, %v2412_v4  ;;  %v6470_v39 = vpack.c.bf16 %v3911_v29, %v3910_v0  ;;  %v3883_v18 = vld [vmem:[%s7061_s9 + $0x158] sm:$0xff]  ;;  %v2659_v43 = vld [vmem:[#allocation3 + $0xa1] sm:$0xff]  ;;  %v3926_v0 = vld [vmem:[%s7061_s9 + $0x230] sm:$0xff] }
 0x61a   :  { %v4743_v35 = vpop.eup %4742  ;;  %2619 = vst.msk [vmem:[#allocation3 + $0x11] sm:$0xff] %vm106_vm8, %v2397_v48  ;;  %v2399_v49 = vmul.f32 %v2383_v30, %v6330_v6  ;;  %v2385_v27 = vadd.f32 0.5, %v2369_v54  ;;  %v2374_v40 = vmul.f32 0.5, %v4741_v44  ;;  %4469 = vmatpush1.bf16.msra.mxu0 %v6392_v34  ;;  %4448 = vmatpush1.bf16.msra.mxu1 %v4447_v23  ;;  %v4456_v4 = vpack.c.bf16 %v3883_v18, %v3882_v57  ;;  %v3912_v53 = vld [vmem:[%s7061_s9 + $0x1c0] sm:$0xff]  ;;  %v3913_v48 = vld [vmem:[%s7061_s9 + $0x1c8] sm:$0xff]  ;;  %v3927_v29 = vld [vmem:[%s7061_s9 + $0x238] sm:$0xff] }
 0x61b   :  { %v4745_v25 = vpop.eup %4744  ;;  %2622 = vst.msk [vmem:[#allocation3 + $0x41] sm:$0xff] %vm106_vm8, %v2400_v8  ;;  %v2402_v24 = vmul.f32 %v2386_v28, %v6332_v36  ;;  %v2387_v31 = vadd.f32 0.5, %v2371_v59  ;;  %v2373_v38 = vmul.f32 0.5, %v4743_v35  ;;  %4470 = vmatprep.subr.bf16.mxu0 %v4790_v3  ;;  %4449 = vmatprep.subr.bf16.mxu1 %v4790_v3  ;;  %v3884_v30 = vld [vmem:[%s7061_s9 + $0x160] sm:$0xff]  ;;  %v6496_v26 = vpack.c.bf16 %v3913_v48, %v3912_v53  ;;  %v3886_v8 = vld [vmem:[%s7061_s9 + $0x170] sm:$0xff]  ;;  %v3887_v28 = vld [vmem:[%s7061_s9 + $0x178] sm:$0xff] }
 0x61c   :  { %v4747_v5 = vpop.eup %4746  ;;  %2621 = vst.msk [vmem:[#allocation3 + $0x31] sm:$0xff] %vm106_vm8, %v2399_v49  ;;  %v2401_v63 = vmul.f32 %v2385_v27, %v6339_v19  ;;  %v2390_v11 = vadd.f32 0.5, %v2374_v40  ;;  %v2376_v42 = vmul.f32 0.5, %v4745_v25  ;;  %v4459_v44 = vpack.c.bf16 %v3885_v13, %v3884_v30  ;;  %v3914_v59 = vld [vmem:[%s7061_s9 + $0x1d0] sm:$0xff]  ;;  %v3915_v35 = vld [vmem:[%s7061_s9 + $0x1d8] sm:$0xff]  ;;  %v6638_v30 = vpop.f32.mrb[6].mxu0 }
 0x61d   :  { %v4749_v6 = vpop.eup %4748  ;;  %v6408_v17 = vld [vmem:[#allocation3 + $0x21] sm:$0xff]  ;;  %2624 = vst.msk [vmem:[#allocation3 + $0x61] sm:$0xff] %vm106_vm8, %v2402_v24  ;;  %v2403_v36 = vmul.f32 %v2387_v31, %v6343_v22  ;;  %v2389_v62 = vadd.f32 0.5, %v2373_v38  ;;  %v2375_v21 = vmul.f32 0.5, %v4747_v5  ;;  %v3879_v22 = vld [vmem:[%s7061_s9 + $0x138] sm:$0xff]  ;;  %v6527_v49 = vpack.c.bf16 %v3915_v35, %v3914_v59 }
 0x61e   :  { %2703 = vrot.lane.b32.xlu0 %v6408_v17, %s4794_s16  ;;  %2623 = vst.msk [vmem:[#allocation3 + $0x51] sm:$0xff] %vm106_vm8, %v2401_v63  ;;  %v2406_v19 = vmul.f32 %v2390_v11, %v6347_v14  ;;  %v2392_v16 = vadd.f32 0.5, %v2376_v42  ;;  %v2377_v51 = vmul.f32 0.5, %v4749_v6  ;;  %v4450_v50 = vpack.c.bf16 %v3879_v22, %v3878_v15  ;;  %v3908_v14 = vld [vmem:[%s7061_s9 + $0x1a0] sm:$0xff]  ;;  %v3917_v31 = vld [vmem:[%s7061_s9 + $0x1e8] sm:$0xff]  ;;  %v3918_v11 = vld [vmem:[%s7061_s9 + $0x1f0] sm:$0xff] }
 0x61f   :  { %2625 = vst.msk [vmem:[#allocation3 + $0x71] sm:$0xff] %vm106_vm8, %v2403_v36  ;;  %v2405_v9 = vmul.f32 %v2389_v62, %v6351_v47  ;;  %v2391_v58 = vadd.f32 0.5, %v2375_v21  ;;  %v6437_v41 = vpack.c.bf16 %v3909_v45, %v3908_v14  ;;  %v4462_v27 = vpack.c.bf16 %v3887_v28, %v3886_v8  ;;  %v6533_v25 = vld [vmem:[#allocation3 + $0x101] sm:$0xff]  ;;  %v3919_v42 = vld [vmem:[%s7061_s9 + $0x1f8] sm:$0xff]  ;;  %v2417_v28 = vld [vmem:[%s7062_s10] sm:$0x1] }
 0x620   :  { %2628 = vst.msk [vmem:[#allocation3 + $0xc1] sm:$0xff] %vm106_vm8, %v2406_v19  ;;  %v2408_v20 = vmul.f32 %v2392_v16, %v6355_v7  ;;  %v2393_v2 = vadd.f32 0.5, %v2377_v51  ;;  %4451 = vmatpush1.bf16.msra.mxu1 %v4450_v50  ;;  %v3916_v24 = vld [vmem:[%s7061_s9 + $0x1e0] sm:$0xff]  ;;  %v6562_v36 = vpack.c.bf16 %v3919_v42, %v3918_v11  ;;  %v2666_v21 = vld [vmem:[#allocation3 + $0x111] sm:$0xff]  ;;  %v3921_v15 = vld [vmem:[%s7061_s9 + $0x208] sm:$0xff]  ;;  %s4796_s10 = smov [#allocation4]  }
 0x621   :  { %v2668_v1 = vld [vmem:[#allocation3 + $0x12] sm:$0xff]  ;;  %2627 = vst.msk [vmem:[#allocation3 + $0xb1] sm:$0xff] %vm106_vm8, %v2405_v9  ;;  %v2407_v47 = vmul.f32 %v2391_v58, %v6358_v46  ;;  %4472 = vmatpush1.bf16.msra.mxu0 %v6437_v41  ;;  %4452 = vmatprep.subr.bf16.mxu1 %v4790_v3  ;;  %v3881_v46 = vld [vmem:[%s7061_s9 + $0x148] sm:$0xff]  ;;  %v6545_v38 = vpack.c.bf16 %v3917_v31, %v3916_v24  ;;  %v3920_v51 = vld [vmem:[%s7061_s9 + $0x200] sm:$0xff] }
 0x622   :  { %v6433_v10 = vld [vmem:[#allocation3 + $0x11] sm:$0xff]  ;;  %3849 = vmatprep.mubr.msk.f32.mxu0 %vm106_vm8, %v2668_v1  ;;  %3888 = vmatprep.mubr.msk.f32.mxu1 %vm106_vm8, %v2668_v1  ;;  %v6441_v55 = vld [vmem:[#allocation3 + $0x41] sm:$0xff]  ;;  %2630 = vst.msk [vmem:[#allocation3 + $0xe1] sm:$0xff] %vm106_vm8, %v2408_v20  ;;  %v2409_v7 = vmul.f32 %v2393_v2, %v6361_v37  ;;  %v4453_v37 = vpack.c.bf16 %v3881_v46, %v3880_v32  ;;  %v2418_v59 = vld [vmem:[%s7064_s12] sm:$0x1]  ;;  %s3742_s12 = sshll.u32 %s4796_s10, 4  ;;  %s3743_s12 = int_to_ptr.vmem [resolvable:$true] %s3742_s12 }
 0x623   :  { %2701 = vrot.lane.b32.xlu1 %v6433_v10, %s4794_s16  ;;  %2707 = vrot.lane.b32.xlu0 %v6441_v55, %s4794_s16  ;;  %2629 = vst.msk [vmem:[#allocation3 + $0xd1] sm:$0xff] %vm106_vm8, %v2407_v47  ;;  %v6466_v56 = vld [vmem:[#allocation3 + $0x31] sm:$0xff]  ;;  %v4597_v5 = vpack.i.bf16 %v6433_v10, %v6533_v25  ;;  %v4602_v19 = vpack.i.bf16 %v6408_v17, %v2666_v21  ;;  %v3381_v14 = vld [vmem:[#allocation3 + $0x81] sm:$0xff]  ;;  %p4771_p1 = scmp.lt.s32.totalorder %s3743_s12, %s3743_s12 }
 0x624   :  { %2631 = vst.msk [vmem:[#allocation3 + $0xf1] sm:$0xff] %vm106_vm8, %v2409_v7  ;;  %4473 = vmatprep.subr.bf16.mxu0 %v4790_v3  ;;  %v6468_v33 = vld [vmem:[#allocation3 + $0x61] sm:$0xff]  ;;  %4454 = vmatpush1.bf16.msra.mxu1 %v4453_v37  ;;  %v4607_v6 = vpack.i.bf16 %v6408_v17, %v6466_v56  ;;  %v6579_v22 = vpack.c.bf16 %v3921_v15, %v3920_v51  ;;  %v3922_v58 = vld [vmem:[%s7061_s9 + $0x210] sm:$0xff]  ;;  %v3923_v50 = vld [vmem:[%s7061_s9 + $0x218] sm:$0xff] }
 0x625   :  { %4475 = vmatpush1.bf16.msra.mxu0 %v6470_v39  ;;  %4455 = vmatprep.subr.bf16.mxu1 %v4790_v3  ;;  %v6494_v54 = vld [vmem:[#allocation3 + $0x51] sm:$0xff]  ;;  %v4612_v17 = vpack.i.bf16 %v6466_v56, %v6441_v55  ;;  %v6595_v45 = vpack.c.bf16 %v3923_v50, %v3922_v58  ;;  %v3924_v1 = vld [vmem:[%s7061_s9 + $0x220] sm:$0xff]  ;;  %v3925_v10 = vld [vmem:[%s7061_s9 + $0x228] sm:$0xff]  ;;  %v4667_v57 = vpack.i.bf16 %v6533_v25, %v2666_v21 }
 0x626   :  { %4476 = vmatprep.subr.bf16.mxu0 %v4790_v3  ;;  %v6516_v60 = vld [vmem:[#allocation3 + $0x71] sm:$0xff]  ;;  %v4617_v16 = vpack.i.bf16 %v6441_v55, %v6494_v54  ;;  %v4622_v20 = vpack.i.bf16 %v6494_v54, %v6468_v33  ;;  %v6611_v7 = vpack.c.bf16 %v3925_v10, %v3924_v1  ;;  %v3389_v18 = vld [vmem:[#allocation3 + $0x121] sm:$0xff] }
 0x627   :  { %2705 = vrot.lane.b32.xlu1 %v6466_v56, %s4794_s16  ;;  %2711 = vrot.lane.b32.xlu0 %v6468_v33, %s4794_s16  ;;  %v6518_v61 = vld [vmem:[#allocation3 + $0xc1] sm:$0xff]  ;;  %v4627_v9 = vpack.i.bf16 %v6468_v33, %v6516_v60  ;;  %v4632_v47 = vpack.i.bf16 %v6516_v60, %v3381_v14  ;;  %v3382_v32 = vld [vmem:[#allocation3 + $0x91] sm:$0xff]  ;;  %v6627_v56 = vpack.c.bf16 %v3927_v29, %v3926_v0 }
 0x628   :  { %4457 = vmatpush1.bf16.msra.mxu1 %v4456_v4  ;;  %v2660_v40 = vld [vmem:[#allocation3 + $0xb1] sm:$0xff]  ;;  %v4642_v46 = vpack.i.bf16 %v3382_v32, %v6518_v61  ;;  %v4672_v48 = vpack.i.bf16 %v2666_v21, %v3389_v18 }
 0x629   :  { %4478 = vmatpush1.bf16.msra.mxu0 %v6496_v26  ;;  %4458 = vmatprep.subr.bf16.mxu1 %v4790_v3  ;;  %v6531_v23 = vld [vmem:[#allocation3 + $0xe1] sm:$0xff]  ;;  %v4637_v2 = vpack.i.bf16 %v3381_v14, %v2660_v40  ;;  %v2636_v31 = vld [vmem:[#allocation3 + $0x10] sm:$0xff] }
 0x62a   :  { %4479 = vmatprep.subr.bf16.mxu0 %v4790_v3  ;;  %v2662_v63 = vld [vmem:[#allocation3 + $0xd1] sm:$0xff] }
 0x62b   :  { %2709 = vrot.lane.b32.xlu1 %v6494_v54, %s4794_s16  ;;  %2715 = vrot.lane.b32.xlu0 %v2659_v43, %s4794_s16  ;;  %v2664_v62 = vld [vmem:[#allocation3 + $0xf1] sm:$0xff]  ;;  %v4647_v55 = vpack.i.bf16 %v6518_v61, %v2662_v63  ;;  %v4652_v33 = vpack.i.bf16 %v2662_v63, %v6531_v23  ;;  %v2540_v54 = vpop.f32.mrb[7].mxu0 }
 0x62c   :  { %4460 = vmatpush1.bf16.msra.mxu1 %v4459_v44  ;;  %v4657_v37 = vpack.i.bf16 %v6531_v23, %v2664_v62  ;;  %v3390_v43 = vld [vmem:[#allocation3 + $0x131] sm:$0xff]  ;;  %v4662_v4 = vpack.i.bf16 %v2664_v62, %v6533_v25  ;;  %v6640_v13 = vpop.f32.mrb[8].mxu0 }
 0x62d   :  { %4461 = vmatprep.subr.bf16.mxu1 %v4790_v3  ;;  %4481 = vmatpush1.bf16.msra.mxu0 %v6527_v49  ;;  %v4677_v53 = vpack.i.bf16 %v3390_v43, %v3389_v18  ;;  %v6642_v44 = vpop.f32.mrb[9].mxu0  ;;  %v6709_v18 = vld [vmem:[#allocation3 + $0x50] sm:$0xff] }
 0x62e   :  { %4482 = vmatprep.subr.bf16.mxu0 %v4790_v3  ;;  %v6644_v8 = vpop.f32.mrb[10].mxu0 }
 0x62f   :  { %2713 = vrot.lane.b32.xlu1 %v6516_v60, %s4794_s16  ;;  %2719 = vrot.lane.b32.xlu0 %v6518_v61, %s4794_s16  ;;  %v6652_v61 = vpop.f32.mrb[11].mxu0 }
 0x630   :  { %4463 = vmatpush1.bf16.msra.mxu1 %v4462_v27  ;;  %v6654_v35 = vpop.f32.mrb[12].mxu0 }
 0x631   :  { %4500 = vmatprep.subr.bf16.mxu1 %v4790_v3  ;;  %4484 = vmatpush1.bf16.msra.mxu0 %v6545_v38  ;;  %v6656_v27 = vpop.f32.mrb[13].mxu0 }
 0x632   :  { %4485 = vmatprep.subr.bf16.mxu0 %v4790_v3 }
 0x633   :  { %2717 = vrot.lane.b32.xlu1 %v2660_v40, %s4794_s16  ;;  %2723 = vrot.lane.b32.xlu0 %v6531_v23, %s4794_s16  ;;  %v2419_v40 = vadd.f32 %v2418_v59, %v2417_v28  ;;  %v6658_v23 = vpop.f32.mrb[14].mxu0 }
 0x634   :  { %v6660_v25 = vpop.f32.mrb[15].mxu0 }
 0x635   :  { %4487 = vmatpush1.bf16.msra.mxu0 %v6562_v36  ;;  %v6663_v11 = vpop.f32.mrb[16].mxu0  ;;  %v6666_v42 = vrot.slane %v2419_v40, %v5155_v12  ;;  %v6682_v12 = vld [vmem:[#allocation3 + $0x32] sm:$0xff] }
 0x636   :  { %4488 = vmatprep.subr.bf16.mxu0 %v4790_v3  ;;  %v6726_v40 = vld [vmem:[#allocation3 + $0x72] sm:$0xff] }
 0x637   :  { %2721 = vrot.lane.b32.xlu1 %v2662_v63, %s4794_s16  ;;  %4598 = vrot.lane.b32.xlu0 %v4597_v5, %s4794_s16 }
 0x639   :  { %4490 = vmatpush1.bf16.msra.mxu0 %v6579_v22 }
 0x63a   :  { %4491 = vmatprep.subr.bf16.mxu0 %v4790_v3 }
 0x63b   :  { %2725 = vrot.lane.b32.xlu1 %v2664_v62, %s4794_s16  ;;  %4608 = vrot.lane.b32.xlu0 %v4607_v6, %s4794_s16  ;;  %v6668_v6 = vld [vmem:[#allocation3 + $0x22] sm:$0xff]  ;;  %v6670_v62 = vpop.f32.mrb[17].mxu0 }
 0x63c   :  { %v6674_v21 = vpop.f32.mrb[18].mxu0 }
 0x63d   :  { %4493 = vmatpush1.bf16.msra.mxu0 %v6595_v45 }
 0x63e   :  { %4494 = vmatprep.subr.bf16.mxu0 %v4790_v3 }
 0x63f   :  { %4603 = vrot.lane.b32.xlu1 %v4602_v19, %s4794_s16  ;;  %4618 = vrot.lane.b32.xlu0 %v4617_v16, %s4794_s16  ;;  %v6676_v16 = vld [vmem:[#allocation3 + $0x20] sm:$0xff] }
 0x641   :  { %4496 = vmatpush1.bf16.msra.mxu0 %v6611_v7 }
 0x642   :  { %4497 = vmatprep.subr.bf16.mxu0 %v4790_v3 }
 0x643   :  { %4613 = vrot.lane.b32.xlu1 %v4612_v17, %s4794_s16  ;;  %4628 = vrot.lane.b32.xlu0 %v4627_v9, %s4794_s16  ;;  %v6680_v17 = vpop.f32.mrb[19].mxu0  ;;  %v2541_v9 = vadd.f32 %v2540_v54, %v6666_v42  ;;  %v6719_v54 = vld [vmem:[#allocation3 + $0x60] sm:$0xff] }
 0x644   :  { %v6685_v58 = vpop.f32.mrb[20].mxu0 }
 0x645   :  { %4499 = vmatpush1.bf16.msra.mxu0 %v6627_v56  ;;  %v6689_v50 = vpop.f32.mrb[21].mxu0 }
 0x646   :  { %v2901_v10 = vpop.f32.mrb[22].mxu0 }
 0x647   :  { %4623 = vrot.lane.b32.xlu1 %v4622_v20, %s4794_s16  ;;  %4638 = vrot.lane.b32.xlu0 %v4637_v2, %s4794_s16  ;;  %v6691_v20 = vld [vmem:[#allocation3 + $0x30] sm:$0xff]  ;;  %v2903_v32 = vpop.f32.mrb[23].mxu0 }
 0x64b   :  { %4633 = vrot.lane.b32.xlu1 %v4632_v47, %s4794_s16  ;;  %4648 = vrot.lane.b32.xlu0 %v4647_v55, %s4794_s16  ;;  %v6695_v47 = vld [vmem:[#allocation3 + $0x42] sm:$0xff]  ;;  %v6697_v55 = vadd.f32 %v2901_v10, %v2541_v9  ;;  %v6749_v10 = vld [vmem:[#allocation3 + $0xb2] sm:$0xff] }
 0x64f   :  { %4643 = vrot.lane.b32.xlu1 %v4642_v46, %s4794_s16  ;;  %4658 = vrot.lane.b32.xlu0 %v4657_v37, %s4794_s16  ;;  %v6701_v37 = vld [vmem:[#allocation3 + $0x40] sm:$0xff] }
 0x653   :  { %4653 = vrot.lane.b32.xlu1 %v4652_v33, %s4794_s16  ;;  %4668 = vrot.lane.b32.xlu0 %v4667_v57, %s4794_s16  ;;  %v6705_v33 = vld [vmem:[#allocation3 + $0x52] sm:$0xff] }
 0x657   :  { %4663 = vrot.lane.b32.xlu1 %v4662_v4, %s4794_s16  ;;  %4678 = vrot.lane.b32.xlu0 %v4677_v53, %s4794_s16  ;;  %v6715_v53 = vld [vmem:[#allocation3 + $0x62] sm:$0xff] }
 0x65b   :  { %4673 = vrot.lane.b32.xlu1 %v4672_v48, %s4794_s16  ;;  %s4766_s16 = scalar_lea.vmem %s3743_s12, 2048 }
 0x65c   :  { %p4767_p0 = scmp.ne.s32.totalorder %s3743_s12, %s4766_s16  ;;  %p4772_p2 = scmp.lt.s32.totalorder %s4766_s16, %s4766_s16 }
 0x65e   :  { %p4773_p3 = por %p4772_p2, %p4771_p1 }
 0x660   :  { %p4774_p4 = pnand %p4773_p3, %p4767_p0 }
 0x690   :  { %v2704_v60 = vpop.permute.xlu0 %2703 }
 0x691   :  { %v2749_v15 = vsel %vm106_vm8, %v6676_v16, %v2704_v60 }
 0x695   :  { %v2702_v24 = vpop.permute.xlu1 %2701  ;;  %v2708_v5 = vpop.permute.xlu0 %2707 }
 0x696   :  { %v2748_v63 = vsel %vm106_vm8, %v2636_v31, %v2702_v24  ;;  %v2751_v29 = vsel %vm106_vm8, %v6701_v37, %v2708_v5 }
 0x697   :  { %2905 = vmatmul.mubr.f32.gmra.mrb[24].mxu0 %v2748_v63  ;;  %v6733_v63 = vld [vmem:[#allocation3 + $0x70] sm:$0xff] }
 0x698   :  { %3850 = vmatprep.mubr.msk.f32.mxu0 %vm106_vm8, %v6668_v6 }
 0x699   :  { %v2706_v19 = vpop.permute.xlu1 %2705  ;;  %v2712_v51 = vpop.permute.xlu0 %2711 }
 0x69a   :  { %v2750_v1 = vsel %vm106_vm8, %v6691_v20, %v2706_v19  ;;  %v2753_v59 = vsel %vm106_vm8, %v6719_v54, %v2712_v51  ;;  %v2675_v19 = vld [vmem:[#allocation3 + $0xa2] sm:$0xff] }
 0x69b   :  { %2910 = vmatmul.mubr.f32.gmra.mrb[26].mxu0 %v2749_v15  ;;  %v2643_v15 = vld [vmem:[#allocation3 + $0xa0] sm:$0xff] }
 0x69c   :  { %3851 = vmatprep.mubr.msk.f32.mxu0 %vm106_vm8, %v6682_v12 }
 0x69d   :  { %v2710_v14 = vpop.permute.xlu1 %2709  ;;  %v2716_v2 = vpop.permute.xlu0 %2715 }
 0x69e   :  { %v2752_v4 = vsel %vm106_vm8, %v6709_v18, %v2710_v14 }
 0x69f   :  { %2915 = vmatmul.mubr.f32.gmra.mrb[28].mxu0 %v2750_v1 }
 0x6a0   :  { %3852 = vmatprep.mubr.msk.f32.mxu0 %vm106_vm8, %v6695_v47 }
 0x6a1   :  { %v2714_v46 = vpop.permute.xlu1 %2713  ;;  %v2720_v0 = vpop.permute.xlu0 %2719 }
 0x6a2   :  { %v2754_v51 = vsel %vm106_vm8, %v6733_v63, %v2714_v46  ;;  %v6759_v46 = vld [vmem:[#allocation3 + $0xb0] sm:$0xff] }
 0x6a3   :  { %2920 = vmatmul.mubr.f32.gmra.mrb[30].mxu0 %v2751_v29  ;;  %v6766_v29 = vld [vmem:[#allocation3 + $0xc2] sm:$0xff] }
 0x6a4   :  { %3853 = vmatprep.mubr.msk.f32.mxu0 %vm106_vm8, %v6705_v33 }
 0x6a5   :  { %v2718_v57 = vpop.permute.xlu1 %2717  ;;  %v6711_v43 = vpop.permute.xlu0 %2723 }
 0x6a7   :  { %2925 = vmatmul.mubr.f32.gmra.mrb[32].mxu0 %v2752_v4 }
 0x6a8   :  { %3854 = vmatprep.mubr.msk.f32.mxu0 %vm106_vm8, %v6715_v53 }
 0x6a9   :  { %v2722_v48 = vpop.permute.xlu1 %2721  ;;  %v6721_v28 = vpop.permute.xlu0 %4598 }
 0x6aa   :  { %v4601_v60 = vunpack.i.h.bf16 %v6721_v28 }
 0x6ab   :  { %2930 = vmatmul.mubr.f32.gmra.mrb[34].mxu0 %v2753_v59 }
 0x6ac   :  { %3855 = vmatprep.mubr.msk.f32.mxu0 %vm106_vm8, %v6726_v40  ;;  %v3108_v24 = vsel %vm106_vm8, %v2636_v31, %v4601_v60  ;;  %v2755_v31 = vsel %vm106_vm8, %v2643_v15, %v2716_v2 }
 0x6ad   :  { %v6731_v5 = vpop.permute.xlu1 %2725  ;;  %3262 = vmatmul.mubr.f32.vlgmr.msra.gmra.mrb[18].mxu1 %v3108_v24  ;;  %v6743_v9 = vpop.permute.xlu0 %4608  ;;  %v6776_v24 = vld [vmem:[#allocation3 + $0xc0] sm:$0xff] }
 0x6ae   :  { %3889 = vmatprep.mubr.msk.f32.mxu1 %vm106_vm8, %v6668_v6  ;;  %4512 = vmatpush1.bf16.msra.mxu1 %v6270_v52  ;;  %v4610_v52 = vunpack.i.l.bf16 %v6743_v9 }
 0x6af   :  { %2935 = vmatmul.mubr.f32.gmra.mrb[36].mxu0 %v2754_v51  ;;  %4501 = vmatprep.subr.bf16.mxu1 %v4790_v3 }
 0x6b0   :  { %3856 = vmatprep.mubr.msk.f32.mxu0 %vm106_vm8, %v2675_v19  ;;  %v3110_v59 = vsel %vm106_vm8, %v6691_v20, %v4610_v52 }
 0x6b1   :  { %v6745_v14 = vpop.permute.xlu1 %4603  ;;  %v6774_v60 = vpop.permute.xlu0 %4618 }
 0x6b2   :  { %v4606_v1 = vunpack.i.h.bf16 %v6745_v14  ;;  %4513 = vmatpush1.bf16.msra.mxu1 %v6392_v34  ;;  %v2756_v34 = vsel %vm106_vm8, %v6759_v46, %v2718_v57  ;;  %v6783_v57 = vld [vmem:[#allocation3 + $0xd2] sm:$0xff]  ;;  %v4620_v19 = vunpack.i.l.bf16 %v6774_v60 }
 0x6b3   :  { %2940 = vmatmul.mubr.f32.gmra.mrb[38].mxu0 %v2755_v31  ;;  %4502 = vmatprep.subr.bf16.mxu1 %v4790_v3  ;;  %v6793_v31 = vld [vmem:[#allocation3 + $0xd0] sm:$0xff] }
 0x6b4   :  { %3857 = vmatprep.mubr.msk.f32.mxu0 %vm106_vm8, %v6749_v10  ;;  %v3109_v2 = vsel %vm106_vm8, %v6676_v16, %v4606_v1  ;;  %v3112_v52 = vsel %vm106_vm8, %v6709_v18, %v4620_v19  ;;  %v6828_v19 = vld [vmem:[#allocation3 + $0xf0] sm:$0xff] }
 0x6b5   :  { %v6757_v32 = vpop.permute.xlu1 %4613  ;;  %3267 = vmatmul.mubr.f32.gmra.mrb[20].mxu1 %v3109_v2  ;;  %v6808_v2 = vpop.permute.xlu0 %4628 }
 0x6b6   :  { %3890 = vmatprep.mubr.msk.f32.mxu1 %vm106_vm8, %v6682_v12  ;;  %4514 = vmatpush1.bf16.msra.mxu1 %v6437_v41  ;;  %v4615_v4 = vunpack.i.l.bf16 %v6757_v32  ;;  %v2757_v41 = vsel %vm106_vm8, %v6776_v24, %v2720_v0  ;;  %v6800_v0 = vld [vmem:[#allocation3 + $0xe2] sm:$0xff] }
 0x6b7   :  { %2945 = vmatmul.mubr.f32.gmra.mrb[40].mxu0 %v2756_v34  ;;  %4503 = vmatprep.subr.bf16.mxu1 %v4790_v3  ;;  %v6810_v34 = vld [vmem:[#allocation3 + $0xe0] sm:$0xff] }
 0x6b8   :  { %3858 = vmatprep.mubr.msk.f32.mxu0 %vm106_vm8, %v6766_v29  ;;  %v3111_v15 = vsel %vm106_vm8, %v6701_v37, %v4615_v4  ;;  %v4630_v4 = vunpack.i.l.bf16 %v6808_v2 }
 0x6b9   :  { %3272 = vmatmul.mubr.f32.gmra.mrb[22].mxu1 %v3110_v59  ;;  %v6791_v51 = vpop.permute.xlu1 %4623 }
 0x6ba   :  { %3891 = vmatprep.mubr.msk.f32.mxu1 %vm106_vm8, %v6695_v47  ;;  %4515 = vmatpush1.bf16.msra.mxu1 %v6470_v39  ;;  %v2758_v39 = vsel %vm106_vm8, %v6793_v31, %v2722_v48  ;;  %v4625_v1 = vunpack.i.l.bf16 %v6791_v51  ;;  %v6818_v48 = vld [vmem:[#allocation3 + $0xf2] sm:$0xff] }
 0x6bb   :  { %2950 = vmatmul.mubr.f32.gmra.mrb[42].mxu0 %v2757_v41  ;;  %4504 = vmatprep.subr.bf16.mxu1 %v4790_v3 }
 0x6bc   :  { %3859 = vmatprep.mubr.msk.f32.mxu0 %vm106_vm8, %v6783_v57  ;;  %v3113_v59 = vsel %vm106_vm8, %v6719_v54, %v4625_v1  ;;  %v6845_v1 = vpop.permute.xlu0 %4638 }
 0x6bd   :  { %3277 = vmatmul.mubr.f32.gmra.mrb[24].mxu1 %v3111_v15  ;;  %v6826_v41 = vpop.permute.xlu1 %4633  ;;  %v6837_v15 = vld [vmem:[#allocation3 + $0x102] sm:$0xff] }
 0x6be   :  { %3892 = vmatprep.mubr.msk.f32.mxu1 %vm106_vm8, %v6705_v33  ;;  %4516 = vmatpush1.bf16.msra.mxu1 %v6496_v26  ;;  %v2759_v26 = vsel %vm106_vm8, %v6810_v34, %v6711_v43  ;;  %v2760_v43 = vsel %vm106_vm8, %v6828_v19, %v6731_v5  ;;  %v6849_v5 = vld [vmem:[#allocation3 + $0x100] sm:$0xff] }
 0x6bf   :  { %2955 = vmatmul.mubr.f32.gmra.mrb[44].mxu0 %v2758_v39  ;;  %4505 = vmatprep.subr.bf16.mxu1 %v4790_v3  ;;  %v4635_v39 = vunpack.i.l.bf16 %v6826_v41 }
 0x6c0   :  { %3860 = vmatprep.mubr.msk.f32.mxu0 %vm106_vm8, %v6800_v0 }
 0x6c1   :  { %3282 = vmatmul.mubr.f32.gmra.mrb[26].mxu1 %v3112_v52  ;;  %v6847_v52 = vld [vmem:[#allocation3 + $0x82] sm:$0xff] }
 0x6c2   :  { %3893 = vmatprep.mubr.msk.f32.mxu1 %vm106_vm8, %v6715_v53  ;;  %4517 = vmatpush1.bf16.msra.mxu1 %v6527_v49  ;;  %v4600_v49 = vunpack.i.l.bf16 %v6721_v28  ;;  %v3114_v28 = vsel %vm106_vm8, %v6733_v63, %v4630_v4  ;;  %v6859_v4 = vld [vmem:[#allocation3 + $0x80] sm:$0xff] }
 0x6c3   :  { %2960 = vmatmul.mubr.f32.gmra.mrb[46].mxu0 %v2759_v26  ;;  %4506 = vmatprep.subr.bf16.mxu1 %v4790_v3 }
 0x6c4   :  { %3861 = vmatprep.mubr.msk.f32.mxu0 %vm106_vm8, %v6818_v48  ;;  %v2761_v26 = vsel %vm106_vm8, %v6849_v5, %v4600_v49  ;;  %v6869_v49 = vld [vmem:[#allocation3 + $0x110] sm:$0xff] }
 0x6c5   :  { %3287 = vmatmul.mubr.f32.gmra.mrb[28].mxu1 %v3113_v59  ;;  %v6857_v59 = vld [vmem:[#allocation3 + $0x112] sm:$0xff] }
 0x6c6   :  { %3894 = vmatprep.mubr.msk.f32.mxu1 %vm106_vm8, %v6726_v40  ;;  %4518 = vmatpush1.bf16.msra.mxu1 %v6545_v38  ;;  %v4605_v38 = vunpack.i.l.bf16 %v6745_v14  ;;  %v3115_v14 = vsel %vm106_vm8, %v6859_v4, %v4635_v39 }
 0x6c7   :  { %2965 = vmatmul.mubr.f32.gmra.mrb[48].mxu0 %v2760_v43  ;;  %4507 = vmatprep.subr.bf16.mxu1 %v4790_v3  ;;  %v4640_v43 = vunpack.i.l.bf16 %v6845_v1 }
 0x6c8   :  { %3862 = vmatprep.mubr.msk.f32.mxu0 %vm106_vm8, %v6837_v15 }
 0x6c9   :  { %3292 = vmatmul.mubr.f32.gmra.mrb[30].mxu1 %v3114_v28  ;;  %v6867_v28 = vpop.permute.xlu1 %4643 }
 0x6ca   :  { %3895 = vmatprep.mubr.msk.f32.mxu1 %vm106_vm8, %v6847_v52  ;;  %4519 = vmatpush1.bf16.msra.mxu1 %v6562_v36  ;;  %v4611_v36 = vunpack.i.h.bf16 %v6743_v9  ;;  %v4645_v39 = vunpack.i.l.bf16 %v6867_v28  ;;  %v6883_v9 = vpop.permute.xlu0 %4648 }
 0x6cb   :  { %2970 = vmatmul.mubr.f32.gmra.mrb[50].mxu0 %v2761_v26  ;;  %4508 = vmatprep.subr.bf16.mxu1 %v4790_v3  ;;  %v2762_v26 = vsel %vm106_vm8, %v6869_v49, %v4605_v38  ;;  %v4621_v38 = vunpack.i.h.bf16 %v6774_v60 }
 0x6cc   :  { %3863 = vmatprep.mubr.msk.f32.mxu0 %vm106_vm8, %v6857_v59 }
 0x6cd   :  { %3297 = vmatmul.mubr.f32.gmra.mrb[32].mxu1 %v3115_v14  ;;  %v3116_v14 = vsel %vm106_vm8, %v6759_v46, %v4640_v43  ;;  %v3117_v46 = vsel %vm106_vm8, %v6776_v24, %v4645_v39  ;;  %v4626_v43 = vunpack.i.h.bf16 %v6791_v51  ;;  %v4631_v51 = vunpack.i.h.bf16 %v6808_v2 }
 0x6ce   :  { %3896 = vmatprep.mubr.msk.f32.mxu1 %vm106_vm8, %v6749_v10  ;;  %4520 = vmatpush1.bf16.msra.mxu1 %v6579_v22  ;;  %v4616_v10 = vunpack.i.h.bf16 %v6757_v32  ;;  %v3471_v22 = vsel %vm106_vm8, %v6676_v16, %v4611_v36  ;;  %v6897_v32 = vpop.permute.xlu1 %4653  ;;  %v6911_v60 = vpop.permute.xlu0 %4658 }
 0x6cf   :  { %2975 = vmatmul.mubr.f32.gmra.mrb[52].mxu0 %v2762_v26  ;;  %4509 = vmatprep.subr.bf16.mxu1 %v4790_v3  ;;  %v4655_v16 = vunpack.i.l.bf16 %v6897_v32  ;;  %v4636_v26 = vunpack.i.h.bf16 %v6826_v41  ;;  %v3475_v2 = vsel %vm106_vm8, %v6719_v54, %v4631_v51  ;;  %v2551_v51 = vadd.f32 %v6642_v44, %v6666_v42 }
 0x6d0   :  { %3928 = vmatprep.mubr.msk.f32.mxu0 %vm106_vm8, %v6668_v6  ;;  %v4650_v6 = vunpack.i.l.bf16 %v6883_v9 }
 0x6d1   :  { %3302 = vmatmul.mubr.f32.gmra.mrb[34].mxu1 %v3116_v14  ;;  %v4641_v14 = vunpack.i.h.bf16 %v6845_v1  ;;  %v3476_v41 = vsel %vm106_vm8, %v6733_v63, %v4636_v26  ;;  %v4646_v1 = vunpack.i.h.bf16 %v6867_v28  ;;  %v3011_v63 = vld [vmem:[#allocation3 + $0x120] sm:$0xff] }
 0x6d2   :  { %3897 = vmatprep.mubr.msk.f32.mxu1 %vm106_vm8, %v6766_v29  ;;  %4521 = vmatpush1.bf16.msra.mxu1 %v6595_v45  ;;  %v3472_v45 = vsel %vm106_vm8, %v6691_v20, %v4616_v10  ;;  %v3119_v20 = vsel %vm106_vm8, %v6810_v34, %v4655_v16  ;;  %v4669_v36 = vpop.permute.xlu0 %4668 }
 0x6d3   :  { %3625 = vmatmul.mubr.f32.vlgmr.msra.gmra.mrb[54].mxu0 %v3471_v22  ;;  %4510 = vmatprep.subr.bf16.mxu1 %v4790_v3  ;;  %v3043_v22 = vld [vmem:[#allocation3 + $0x122] sm:$0xff] }
 0x6d4   :  { %3929 = vmatprep.mubr.msk.f32.mxu0 %vm106_vm8, %v6682_v12  ;;  %v3118_v12 = vsel %vm106_vm8, %v6793_v31, %v4650_v6  ;;  %v3398_v6 = vld [vmem:[#allocation3 + $0x92] sm:$0xff] }
 0x6d5   :  { %3307 = vmatmul.mubr.f32.gmra.mrb[36].mxu1 %v3117_v46  ;;  %v3477_v46 = vsel %vm106_vm8, %v6859_v4, %v4641_v14 }
 0x6d6   :  { %3898 = vmatprep.mubr.msk.f32.mxu1 %vm106_vm8, %v6783_v57  ;;  %4522 = vmatpush1.bf16.msra.mxu1 %v6611_v7  ;;  %v3473_v7 = vsel %vm106_vm8, %v6701_v37, %v4621_v38  ;;  %v4679_v10 = vpop.permute.xlu0 %4678  ;;  %v3366_v38 = vld [vmem:[#allocation3 + $0x90] sm:$0xff] }
 0x6d7   :  { %3630 = vmatmul.mubr.f32.gmra.mrb[56].mxu0 %v3472_v45  ;;  %4511 = vmatprep.subr.bf16.mxu1 %v4790_v3  ;;  %v4660_v3 = vunpack.i.l.bf16 %v6911_v60  ;;  %v3406_v45 = vld [vmem:[#allocation3 + $0x132] sm:$0xff]  ;;  %v4681_v16 = vunpack.i.h.bf16 %v4679_v10  ;;  %v3478_v28 = vsel %vm106_vm8, %v3366_v38, %v4646_v1 }
 0x6d8   :  { %3930 = vmatprep.mubr.msk.f32.mxu0 %vm106_vm8, %v6695_v47  ;;  %v6924_v47 = vpop.permute.xlu1 %4663 }
 0x6d9   :  { %3312 = vmatmul.mubr.f32.gmra.mrb[38].mxu1 %v3118_v12  ;;  %v4665_v37 = vunpack.i.l.bf16 %v6924_v47  ;;  %v3374_v12 = vld [vmem:[#allocation3 + $0x130] sm:$0xff] }
 0x6da   :  { %3899 = vmatprep.mubr.msk.f32.mxu1 %vm106_vm8, %v6800_v0  ;;  %4523 = vmatpush1.bf16.msra.mxu1 %v6627_v56  ;;  %v3474_v56 = vsel %vm106_vm8, %v6709_v18, %v4626_v43  ;;  %v4670_v18 = vunpack.i.l.bf16 %v4669_v36  ;;  %v4651_v43 = vunpack.i.h.bf16 %v6883_v9  ;;  %v3486_v4 = vsel %vm106_vm8, %v3374_v12, %v4681_v16 }
 0x6db   :  { %3635 = vmatmul.mubr.f32.gmra.mrb[58].mxu0 %v3473_v7  ;;  %v4656_v7 = vunpack.i.h.bf16 %v6897_v32  ;;  %v4661_v9 = vunpack.i.h.bf16 %v6911_v60  ;;  %v2586_v12 = vadd.f32 %v6658_v23, %v6666_v42 }
 0x6dc   :  { %3931 = vmatprep.mubr.msk.f32.mxu0 %vm106_vm8, %v6705_v33  ;;  %v3120_v33 = vsel %vm106_vm8, %v6828_v19, %v4660_v3  ;;  %v4674_v39 = vpop.permute.xlu1 %4673  ;;  %v3479_v3 = vsel %vm106_vm8, %v6776_v24, %v4651_v43  ;;  %v4671_v24 = vunpack.i.h.bf16 %v4669_v36 }
 0x6dd   :  { %3317 = vmatmul.mubr.f32.gmra.mrb[40].mxu1 %v3119_v20  ;;  %v4675_v54 = vunpack.i.l.bf16 %v4674_v39  ;;  %v3480_v20 = vsel %vm106_vm8, %v6793_v31, %v4656_v7  ;;  %v3481_v32 = vsel %vm106_vm8, %v6810_v34, %v4661_v9  ;;  %v4676_v31 = vunpack.i.h.bf16 %v4674_v39 }
 0x6de   :  { %3900 = vmatprep.mubr.msk.f32.mxu1 %vm106_vm8, %v6818_v48  ;;  %v4680_v34 = vunpack.i.l.bf16 %v4679_v10  ;;  %v2566_v39 = vadd.f32 %v6644_v8, %v6666_v42  ;;  %v2581_v8 = vadd.f32 %v6660_v25, %v6666_v42 }
 0x6df   :  { %3640 = vmatmul.mubr.f32.gmra.mrb[60].mxu0 %v3474_v56 }
 0x6e0   :  { %3932 = vmatprep.mubr.msk.f32.mxu0 %vm106_vm8, %v6715_v53  ;;  %v3121_v53 = vsel %vm106_vm8, %v6849_v5, %v4665_v37 }
 0x6e1   :  { %3322 = vmatmul.mubr.f32.gmra.mrb[42].mxu1 %v3120_v33 }
 0x6e2   :  { %3901 = vmatprep.mubr.msk.f32.mxu1 %vm106_vm8, %v6837_v15 }
 0x6e3   :  { %3645 = vmatmul.mubr.f32.gmra.mrb[62].mxu0 %v3475_v2  ;;  %v2561_v2 = vadd.f32 %v6652_v61, %v6666_v42 }
 0x6e4   :  { %3933 = vmatprep.mubr.msk.f32.mxu0 %vm106_vm8, %v6726_v40  ;;  %v3122_v40 = vsel %vm106_vm8, %v6869_v49, %v4670_v18 }
 0x6e5   :  { %3327 = vmatmul.mubr.f32.gmra.mrb[44].mxu1 %v3121_v53 }
 0x6e6   :  { %3902 = vmatprep.mubr.msk.f32.mxu1 %vm106_vm8, %v6857_v59 }
 0x6e7   :  { %3650 = vmatmul.mubr.f32.gmra.mrb[64].mxu0 %v3476_v41 }
 0x6e8   :  { %3934 = vmatprep.mubr.msk.f32.mxu0 %vm106_vm8, %v6847_v52  ;;  %v3123_v52 = vsel %vm106_vm8, %v3011_v63, %v4675_v54  ;;  %v2571_v54 = vadd.f32 %v6656_v27, %v6666_v42 }
 0x6e9   :  { %3332 = vmatmul.mubr.f32.gmra.mrb[46].mxu1 %v3122_v40 }
 0x6ea   :  { %3903 = vmatprep.mubr.msk.f32.mxu1 %vm106_vm8, %v3043_v22 }
 0x6eb   :  { %3655 = vmatmul.mubr.f32.gmra.mrb[66].mxu0 %v3477_v46 }
 0x6ec   :  { %3935 = vmatprep.mubr.msk.f32.mxu0 %vm106_vm8, %v3398_v6  ;;  %v2576_v6 = vadd.f32 %v6654_v35, %v6666_v42 }
 0x6ed   :  { %3337 = vmatmul.mubr.f32.gmra.mrb[48].mxu1 %v3123_v52 }
 0x6ee   :  { %3943 = vmatprep.mubr.msk.f32.mxu1 %vm106_vm8, %v3406_v45 }
 0x6ef   :  { %3660 = vmatmul.mubr.f32.gmra.mrb[68].mxu0 %v3478_v28 }
 0x6f0   :  { %3936 = vmatprep.mubr.msk.f32.mxu0 %vm106_vm8, %v6766_v29  ;;  %v4666_v29 = vunpack.i.h.bf16 %v6924_v47 }
 0x6f1   :  { %3700 = vmatmul.mubr.f32.vlgmr.msra.gmra.mrb[50].mxu1 %v3486_v4 }
 0x6f3   :  { %3665 = vmatmul.mubr.f32.gmra.mrb[70].mxu0 %v3479_v3  ;;  %v2591_v3 = vadd.f32 %v6670_v62, %v6666_v42 }
 0x6f4   :  { %3937 = vmatprep.mubr.msk.f32.mxu0 %vm106_vm8, %v6783_v57  ;;  %v3482_v57 = vsel %vm106_vm8, %v6828_v19, %v4666_v29  ;;  %v3485_v19 = vsel %vm106_vm8, %v3011_v63, %v4680_v34 }
 0x6f7   :  { %3670 = vmatmul.mubr.f32.gmra.mrb[72].mxu0 %v3480_v20 }
 0x6f8   :  { %3938 = vmatprep.mubr.msk.f32.mxu0 %vm106_vm8, %v6800_v0  ;;  %v3483_v0 = vsel %vm106_vm8, %v6849_v5, %v4671_v24 }
 0x6fb   :  { %3675 = vmatmul.mubr.f32.gmra.mrb[74].mxu0 %v3481_v32 }
 0x6fc   :  { %3939 = vmatprep.mubr.msk.f32.mxu0 %vm106_vm8, %v6818_v48  ;;  %v3484_v48 = vsel %vm106_vm8, %v6869_v49, %v4676_v31  ;;  %v2556_v49 = vadd.f32 %v6640_v13, %v6666_v42 }
 0x6ff   :  { %3680 = vmatmul.mubr.f32.gmra.mrb[76].mxu0 %v3482_v57  ;;  %v2596_v57 = vadd.f32 %v6663_v11, %v6666_v42 }
 0x700   :  { %3940 = vmatprep.mubr.msk.f32.mxu0 %vm106_vm8, %v6837_v15  ;;  %v2546_v15 = vadd.f32 %v6638_v30, %v6666_v42 }
 0x703   :  { %3685 = vmatmul.mubr.f32.gmra.mrb[78].mxu0 %v3483_v0 }
 0x704   :  { %3941 = vmatprep.mubr.msk.f32.mxu0 %vm106_vm8, %v6857_v59 }
 0x707   :  { %3690 = vmatmul.mubr.f32.gmra.mrb[80].mxu0 %v3484_v48 }
 0x708   :  { %3942 = vmatprep.mubr.msk.f32.mxu0 %vm106_vm8, %v3043_v22 }
 0x70b   :  { %3695 = vmatmul.mubr.f32.gmra.mrb[82].mxu0 %v3485_v19 }
 0x76a   :  { %v2906_v60 = vpop.f32.mrb[24].mxu0 }
 0x76b   :  { %v2981_v47 = vadd.f32 %v2906_v60, %v2546_v15  ;;  %v2908_v5 = vpop.f32.mrb[25].mxu0  ;;  %v2601_v15 = vadd.f32 %v6680_v17, %v6666_v42 }
 0x76e   :  { %v2911_v59 = vpop.f32.mrb[26].mxu0 }
 0x76f   :  { %v2982_v56 = vadd.f32 %v2911_v59, %v2551_v51  ;;  %v2913_v37 = vpop.f32.mrb[27].mxu0 }
 0x772   :  { %v2916_v33 = vpop.f32.mrb[28].mxu0 }
 0x773   :  { %v2983_v36 = vadd.f32 %v2916_v33, %v2556_v49  ;;  %v2918_v26 = vpop.f32.mrb[29].mxu0 }
 0x776   :  { %v2921_v18 = vpop.f32.mrb[30].mxu0 }
 0x777   :  { %v2984_v30 = vadd.f32 %v2921_v18, %v2561_v2  ;;  %v2923_v53 = vpop.f32.mrb[31].mxu0  ;;  %v2611_v2 = vadd.f32 %v6689_v50, %v6666_v42 }
 0x77a   :  { %v2926_v14 = vpop.f32.mrb[32].mxu0 }
 0x77b   :  { %v2985_v44 = vadd.f32 %v2926_v14, %v2566_v39  ;;  %v2928_v41 = vpop.f32.mrb[33].mxu0 }
 0x77c   :  { %v2616_v41 = vadd.f32 %v6685_v58, %v6666_v42 }
 0x77e   :  { %v2931_v40 = vpop.f32.mrb[34].mxu0 }
 0x77f   :  { %v2986_v13 = vadd.f32 %v2931_v40, %v2571_v54  ;;  %v2933_v10 = vpop.f32.mrb[35].mxu0 }
 0x780   :  { %v3263_v22 = vpop.f32.mrb[18].mxu1 }
 0x781   :  { %v3342_v61 = vadd.f32 %v3263_v22, %v6697_v55  ;;  %v3265_v1 = vpop.f32.mrb[19].mxu1 }
 0x782   :  { %v2936_v46 = vpop.f32.mrb[36].mxu0 }
 0x783   :  { %v2987_v63 = vadd.f32 %v2936_v46, %v2576_v6  ;;  %v2938_v38 = vpop.f32.mrb[37].mxu0 }
 0x786   :  { %v2941_v45 = vpop.f32.mrb[38].mxu0 }
 0x787   :  { %v2988_v16 = vadd.f32 %v2941_v45, %v2581_v8  ;;  %v2943_v52 = vpop.f32.mrb[39].mxu0 }
 0x788   :  { %v3268_v27 = vpop.f32.mrb[20].mxu1 }
 0x789   :  { %v3343_v43 = vadd.f32 %v3268_v27, %v2981_v47  ;;  %v3270_v28 = vpop.f32.mrb[21].mxu1 }
 0x78a   :  { %v2946_v4 = vpop.f32.mrb[40].mxu0 }
 0x78b   :  { %v2989_v35 = vadd.f32 %v2946_v4, %v2586_v12  ;;  %v2948_v7 = vpop.f32.mrb[41].mxu0 }
 0x78c   :  { %v3273_v55 = vpop.f32.mrb[22].mxu1 }
 0x78d   :  { %v3344_v9 = vadd.f32 %v3273_v55, %v2982_v56  ;;  %v3275_v20 = vpop.f32.mrb[23].mxu1  ;;  %v2606_v56 = vadd.f32 %v6674_v21, %v6666_v42 }
 0x78e   :  { %v2951_v29 = vpop.f32.mrb[42].mxu0 }
 0x78f   :  { %v2990_v25 = vadd.f32 %v2951_v29, %v2591_v3  ;;  %v2953_v32 = vpop.f32.mrb[43].mxu0 }
 0x790   :  { %v3278_v24 = vpop.f32.mrb[24].mxu1 }
 0x791   :  { %v3345_v31 = vadd.f32 %v3278_v24, %v2983_v36  ;;  %v3280_v23 = vpop.f32.mrb[25].mxu1 }
 0x792   :  { %v2956_v0 = vpop.f32.mrb[44].mxu0 }
 0x793   :  { %v2991_v34 = vadd.f32 %v2956_v0, %v2596_v57  ;;  %v2958_v48 = vpop.f32.mrb[45].mxu0 }
 0x794   :  { %v3283_v19 = vpop.f32.mrb[26].mxu1 }
 0x795   :  { %v3346_v60 = vadd.f32 %v3283_v19, %v2984_v30  ;;  %v3285_v62 = vpop.f32.mrb[27].mxu1 }
 0x796   :  { %v2961_v47 = vpop.f32.mrb[46].mxu0 }
 0x797   :  { %v2992_v5 = vadd.f32 %v2961_v47, %v2601_v15  ;;  %v2963_v51 = vpop.f32.mrb[47].mxu0 }
 0x798   :  { %v3288_v59 = vpop.f32.mrb[28].mxu1 }
 0x799   :  { %v3347_v37 = vadd.f32 %v3288_v59, %v2985_v44  ;;  %v3290_v11 = vpop.f32.mrb[29].mxu1 }
 0x79a   :  { %v2966_v49 = vpop.f32.mrb[48].mxu0 }
 0x79b   :  { %v2993_v33 = vadd.f32 %v2966_v49, %v2606_v56  ;;  %v2968_v36 = vpop.f32.mrb[49].mxu0 }
 0x79c   :  { %v3293_v26 = vpop.f32.mrb[30].mxu1 }
 0x79d   :  { %v3348_v18 = vadd.f32 %v3293_v26, %v2986_v13  ;;  %v3295_v17 = vpop.f32.mrb[31].mxu1 }
 0x79e   :  { %v2971_v30 = vpop.f32.mrb[50].mxu0 }
 0x79f   :  { %v2994_v53 = vadd.f32 %v2971_v30, %v2611_v2  ;;  %v2973_v39 = vpop.f32.mrb[51].mxu0 }
 0x7a0   :  { %v3298_v14 = vpop.f32.mrb[32].mxu1 }
 0x7a1   :  { %v3349_v54 = vadd.f32 %v3298_v14, %v2987_v63  ;;  %v3300_v21 = vpop.f32.mrb[33].mxu1 }
 0x7a2   :  { %v2976_v44 = vpop.f32.mrb[52].mxu0 }
 0x7a3   :  { %v2995_v40 = vadd.f32 %v2976_v44, %v2616_v41  ;;  %v2978_v10 = vpop.f32.mrb[53].mxu0 }
 0x7a4   :  { %v3303_v22 = vpop.f32.mrb[34].mxu1 }
 0x7a5   :  { %v3350_v6 = vadd.f32 %v3303_v22, %v2988_v16  ;;  %v3305_v1 = vpop.f32.mrb[35].mxu1 }
 0x7a6   :  { %v3626_v46 = vpop.f32.mrb[54].mxu0 }
 0x7a7   :  { %v3705_v38 = vadd.f32 %v3626_v46, %v3342_v61  ;;  %v3628_v50 = vpop.f32.mrb[55].mxu0 }
 0x7a8   :  { %v3308_v13 = vpop.f32.mrb[36].mxu1 }
 0x7a9   :  { %3721 = vst.msk [vmem:[#allocation4] sm:$0xff] %vm106_vm8, %v3705_v38  ;;  %v3351_v8 = vadd.f32 %v3308_v13, %v2989_v35  ;;  %v3310_v45 = vpop.f32.mrb[37].mxu1 }
 0x7aa   :  { %v3631_v52 = vpop.f32.mrb[56].mxu0 }
 0x7ab   :  { %v3706_v27 = vadd.f32 %v3631_v52, %v3343_v43  ;;  %v3633_v12 = vpop.f32.mrb[57].mxu0 }
 0x7ac   :  { %v3313_v42 = vpop.f32.mrb[38].mxu1 }
 0x7ad   :  { %3722 = vst.msk [vmem:[#allocation4 + $0x8] sm:$0xff] %vm106_vm8, %v3706_v27  ;;  %v3352_v58 = vadd.f32 %v3313_v42, %v2990_v25  ;;  %v3315_v63 = vpop.f32.mrb[39].mxu1 }
 0x7ae   :  { %v3636_v28 = vpop.f32.mrb[58].mxu0 }
 0x7af   :  { %v3707_v4 = vadd.f32 %v3636_v28, %v3344_v9  ;;  %v3638_v16 = vpop.f32.mrb[59].mxu0 }
 0x7b0   :  { %v3318_v7 = vpop.f32.mrb[40].mxu1 }
 0x7b1   :  { %3723 = vst.msk [vmem:[#allocation4 + $0x10] sm:$0xff] %vm106_vm8, %v3707_v4  ;;  %v3353_v61 = vadd.f32 %v3318_v7, %v2991_v34  ;;  %v3320_v55 = vpop.f32.mrb[41].mxu1 }
 0x7b2   :  { %v3641_v3 = vpop.f32.mrb[60].mxu0 }
 0x7b3   :  { %v3708_v20 = vadd.f32 %v3641_v3, %v3345_v31  ;;  %v3643_v35 = vpop.f32.mrb[61].mxu0 }
 0x7b4   :  { %v3323_v29 = vpop.f32.mrb[42].mxu1 }
 0x7b5   :  { %3724 = vst.msk [vmem:[#allocation4 + $0x18] sm:$0xff] %vm106_vm8, %v3708_v20  ;;  %v3354_v43 = vadd.f32 %v3323_v29, %v2992_v5  ;;  %v3325_v32 = vpop.f32.mrb[43].mxu1 }
 0x7b6   :  { %v3646_v24 = vpop.f32.mrb[62].mxu0 }
 0x7b7   :  { %v3709_v57 = vadd.f32 %v3646_v24, %v3346_v60  ;;  %v3648_v25 = vpop.f32.mrb[63].mxu0 }
 0x7b8   :  { %v3328_v23 = vpop.f32.mrb[44].mxu1 }
 0x7b9   :  { %3725 = vst.msk [vmem:[#allocation4 + $0x20] sm:$0xff] %vm106_vm8, %v3709_v57  ;;  %v3355_v9 = vadd.f32 %v3328_v23, %v2993_v33  ;;  %v3330_v0 = vpop.f32.mrb[45].mxu1 }
 0x7ba   :  { %v3651_v48 = vpop.f32.mrb[64].mxu0 }
 0x7bb   :  { %v3710_v19 = vadd.f32 %v3651_v48, %v3347_v37  ;;  %v3653_v34 = vpop.f32.mrb[65].mxu0 }
 0x7bc   :  { %v3333_v15 = vpop.f32.mrb[46].mxu1 }
 0x7bd   :  { %3726 = vst.msk [vmem:[#allocation4 + $0x28] sm:$0xff] %vm106_vm8, %v3710_v19  ;;  %v3356_v31 = vadd.f32 %v3333_v15, %v2994_v53  ;;  %v3335_v62 = vpop.f32.mrb[47].mxu1 }
 0x7be   :  { %v3656_v47 = vpop.f32.mrb[66].mxu0 }
 0x7bf   :  { %v3711_v51 = vadd.f32 %v3656_v47, %v3348_v18  ;;  %v3658_v5 = vpop.f32.mrb[67].mxu0 }
 0x7c0   :  { %v3338_v59 = vpop.f32.mrb[48].mxu1 }
 0x7c1   :  { %3727 = vst.msk [vmem:[#allocation4 + $0x30] sm:$0xff] %vm106_vm8, %v3711_v51  ;;  %v3357_v60 = vadd.f32 %v3338_v59, %v2995_v40  ;;  %v3340_v56 = vpop.f32.mrb[49].mxu1 }
 0x7c2   :  { %v3661_v11 = vpop.f32.mrb[68].mxu0 }
 0x7c3   :  { %v3712_v49 = vadd.f32 %v3661_v11, %v3349_v54  ;;  %v3663_v33 = vpop.f32.mrb[69].mxu0 }
 0x7c4   :  { %v3701_v36 = vpop.f32.mrb[50].mxu1 }
 0x7c5   :  { %3728 = vst.msk [vmem:[#allocation4 + $0x38] sm:$0xff] %vm106_vm8, %v3712_v49  ;;  %v3720_v37 = vadd.f32 %v3701_v36, %v3357_v60  ;;  %v3703_v26 = vpop.f32.mrb[51].mxu1 }
 0x7c6   :  { %v3666_v2 = vpop.f32.mrb[70].mxu0 }
 0x7c7   :  { %3736 = vst.msk [vmem:[#allocation4 + $0x78] sm:$0xff] %vm106_vm8, %v3720_v37  ;;  %v3713_v17 = vadd.f32 %v3666_v2, %v3350_v6  ;;  %v3668_v30 = vpop.f32.mrb[71].mxu0 }
 0x7c9   :  { %3729 = vst.msk [vmem:[#allocation4 + $0x40] sm:$0xff] %vm106_vm8, %v3713_v17 }
 0x7ca   :  { %v3671_v18 = vpop.f32.mrb[72].mxu0 }
 0x7cb   :  { %v3714_v53 = vadd.f32 %v3671_v18, %v3351_v8  ;;  %v3673_v39 = vpop.f32.mrb[73].mxu0 }
 0x7cd   :  { %3730 = vst.msk [vmem:[#allocation4 + $0x48] sm:$0xff] %vm106_vm8, %v3714_v53 }
 0x7ce   :  { %v3676_v14 = vpop.f32.mrb[74].mxu0 }
 0x7cf   :  { %v3715_v41 = vadd.f32 %v3676_v14, %v3352_v58  ;;  %v3678_v54 = vpop.f32.mrb[75].mxu0 }
 0x7d1   :  { %3731 = vst.msk [vmem:[#allocation4 + $0x50] sm:$0xff] %vm106_vm8, %v3715_v41 }
 0x7d2   :  { %v3681_v21 = vpop.f32.mrb[76].mxu0 }
 0x7d3   :  { %v3716_v44 = vadd.f32 %v3681_v21, %v3353_v61  ;;  %v3683_v40 = vpop.f32.mrb[77].mxu0 }
 0x7d5   :  { %3732 = vst.msk [vmem:[#allocation4 + $0x58] sm:$0xff] %vm106_vm8, %v3716_v44 }
 0x7d6   :  { %v3686_v10 = vpop.f32.mrb[78].mxu0 }
 0x7d7   :  { %v3717_v22 = vadd.f32 %v3686_v10, %v3354_v43  ;;  %v3688_v6 = vpop.f32.mrb[79].mxu0 }
 0x7d9   :  { %3733 = vst.msk [vmem:[#allocation4 + $0x60] sm:$0xff] %vm106_vm8, %v3717_v22 }
 0x7da   :  { %v3691_v1 = vpop.f32.mrb[80].mxu0 }
 0x7db   :  { %v3718_v46 = vadd.f32 %v3691_v1, %v3355_v9  ;;  %v3693_v38 = vpop.f32.mrb[81].mxu0 }
 0x7dd   :  { %3734 = vst.msk [vmem:[#allocation4 + $0x68] sm:$0xff] %vm106_vm8, %v3718_v46 }
 0x7de   :  { %v3696_v50 = vpop.f32.mrb[82].mxu0 }
 0x7df   :  { %v3719_v13 = vadd.f32 %v3696_v50, %v3356_v31  ;;  %v3698_v8 = vpop.f32.mrb[83].mxu0 }
 0x7e1   :  { %3735 = vst.msk [vmem:[#allocation4 + $0x70] sm:$0xff] %vm106_vm8, %v3719_v13 }
 0x7e2   :  { %4777 = shalt.err (!%p4774_p4)
}
 0x7e3   :  { %s4778_s26 = scalar_lea.hbm %s7065_s13, 2048 }
 0x7e4   :  { %p4779_p5 = scmp.ne.s32.totalorder %s7065_s13, %s4778_s26  ;;  %p4782_p6 = scmp.lt.u32.totalorder %s4778_s26, %s7065_s13 }
 0x7e6   :  { %p4784_p7 = pnand %p4782_p6, %p4779_p5 }
 0x7e8   :  { %4787 = shalt.err (!%p4784_p7)
}
 0x7e9   :  { %s4797_s30 = smov 128   ;;  %s4798_s14 = smov 8  }
 0x7ea   :  { %3748 = dma.vmem_to_hbm [thread:$0]  %s3743_s12, 2048, %s7065_s13, [#allocation5], %s4797_s30, %s4797_s30, %s4798_s14  }
 0x7eb   :  { %4788 = dma.done.wait [#allocation5], 2048  }
 0x7ec   :  { %4789 = vsyncadd [#allocation5], 4294965248 }
 0x7ed   :  { %3752 = vsyncpa [#allocation5], 1 }

</bundles_post_ra>
